<compile_context>
chip_gen: v6e
topology: v6e:2x2x1
jax: 0.10.0
libtpu: 0.0.40
codegen_flags: <defaults>
</compile_context>

<pallas_src>
import jax
import jax.numpy as jnp
from jax.experimental import pallas as pl
from jax.experimental.pallas import tpu as pltpu


def _round_up(x, m):
    return -(-x // m) * m


def _derive_vmem_limit(L_win, L_tile, Lh, Cp, K, single_buffered_weights):
    """Double-buffer-aware VMEM budget for this kernel, clamped to the chip."""
    need = 0
    need += 2 * L_win * Cp * 2            # x window block (bf16, double-buffered)
    need += 2 * L_tile * Cp * 2           # output block (bf16, double-buffered)
    wbufs = 1 if single_buffered_weights else 2
    need += 2 * wbufs * K * Cp * Cp * 2   # w1 + w2 (bf16)
    need += 4 * 2 * Cp * 4                # scales / shifts (f32)
    need += Lh * Cp * 2                   # h staging scratch (bf16)
    need += 2 * Lh * Cp * 4               # headroom: f32 value-chain accumulator spills
    limit = max(2 * need, 32 * 1024 * 1024)
    try:
        phys = pltpu.get_tpu_info().vmem_capacity_bytes   # 128 MiB v5e/v6e, 64 MiB v7x
    except Exception:
        phys = 64 * 1024 * 1024
    return int(min(limit, (phys * 3) // 4))


def residual_block_pallas(x_ncl, params, l_tile_max=512):
    """x_ncl: (N, C, L) float32 (PyTorch Conv1d layout). Returns (N, C, L) f32."""
    w1, s1, t1, w2, s2, t2 = params       # bf16 weights (K, Cp, Cp); f32 (1, Cp) scale/shift
    N, C, L = x_ncl.shape
    K = w1.shape[0]
    Cp = w1.shape[-1]
    assert K % 2 == 1, "residual add requires an odd kernel_size (PyTorch default 16 is shape-invalid)"
    pad = K // 2

    # ---- L tiling: each output tile of L_tile rows needs x on a 2*pad halo ----
    if L <= l_tile_max:
        L_tile, n_tiles = L, 1
    else:
        L_tile = l_tile_max               # multiple of 8 -> clean (8,128) out blocks
        n_tiles = -(-L // L_tile)
    L_out = n_tiles * L_tile
    halo = 2 * pad                        # conv1 is recomputed on conv2's halo
    L_win = L_tile + 2 * halo             # per-tile input window
    Lh = L_tile + 2 * pad                 # conv1 output (h) extent per tile

    # NCL -> NLC, channels padded to lane multiple, zero halo at sequence ends,
    # bf16 activations (halves HBM/VMEM).
    x_nlc = jnp.transpose(x_ncl, (0, 2, 1))
    x_nlc = jnp.pad(x_nlc, ((0, 0), (halo, (L_out - L) + halo), (0, Cp - C)))
    x_nlc = x_nlc.astype(jnp.bfloat16)
    # Materialize overlapping halo'd windows once in HBM so every BlockSpec block
    # is a plain non-overlapping tile (no in-kernel VMEM->VMEM staging of x).
    x_tiles = jnp.stack(
        [x_nlc[:, t * L_tile: t * L_tile + L_win, :] for t in range(n_tiles)], axis=1)

    def kernel(x_ref, w1_ref, s1_ref, t1_ref, w2_ref, s2_ref, t2_ref, o_ref, h_ref):
        # x_ref : (L_win, Cp) bf16   halo'd input window for this (batch, L-tile)
        # wX    : (K, Cp, Cp) bf16   conv taps, w[k, c_in, c_out]
        # sX/tX : (1, Cp) f32        fused BN scale / shift (conv bias folded in)
        # o_ref : (L_tile, Cp) bf16  output tile
        # h_ref : (Lh, Cp) bf16      staged block1 activation (with conv2 halo)
        t_idx = pl.program_id(1)

        # ---- block1: conv1 + fused BN + ReLU over the extended (halo'd) range ----
        # Value-chain accumulation: stays in vregs / the MXU result path instead
        # of round-tripping a VMEM accumulator (store slot is the scarce one).
        acc = jnp.dot(x_ref[0:Lh, :], w1_ref[0], preferred_element_type=jnp.float32)
        for k in range(1, K):
            acc = acc + jnp.dot(x_ref[k:k + Lh, :], w1_ref[k],
                                preferred_element_type=jnp.float32)
        h = jnp.maximum(acc * s1_ref[...] + t1_ref[...], 0.0)

        # PyTorch zero-pads *h* before conv2, so h outside the true sequence must
        # be exactly zero (not conv1 of zero-padded x).  Mask halo rows outside [0, L).
        row = jax.lax.broadcasted_iota(jnp.int32, (Lh, Cp), 0)
        g = t_idx * L_tile - pad + row
        h = jnp.where((g >= 0) & (g < L), h, 0.0)
        h_ref[...] = h.astype(h_ref.dtype)     # single bf16 staging pass for the MXU

        # ---- block2: conv2 + fused BN + ReLU on the interior L_tile rows ----
        acc2 = jnp.dot(h_ref[0:L_tile, :], w2_ref[0], preferred_element_type=jnp.float32)
        for k in range(1, K):
            acc2 = acc2 + jnp.dot(h_ref[k:k + L_tile, :], w2_ref[k],
                                  preferred_element_type=jnp.float32)
        y = jnp.maximum(acc2 * s2_ref[...] + t2_ref[...], 0.0)

        # ---- residual add in f32; bf16 only on the final store ----
        x_res = x_ref[halo:halo + L_tile, :].astype(jnp.float32)
        o_ref[...] = (y + x_res).astype(o_ref.dtype)

    def call(weight_pipeline_mode):
        wkw = {} if weight_pipeline_mode is None else {"pipeline_mode": weight_pipeline_mode}
        grid_spec = pltpu.PrefetchScalarGridSpec(
            num_scalar_prefetch=0,
            grid=(N, n_tiles),
            in_specs=[
                pl.BlockSpec((None, None, L_win, Cp), lambda n, t: (n, t, 0, 0)),   # x windows
                pl.BlockSpec((K, Cp, Cp), lambda n, t: (0, 0, 0), **wkw),            # w1
                pl.BlockSpec((1, Cp), lambda n, t: (0, 0), **wkw),                   # scale1
                pl.BlockSpec((1, Cp), lambda n, t: (0, 0), **wkw),                   # shift1
                pl.BlockSpec((K, Cp, Cp), lambda n, t: (0, 0, 0), **wkw),            # w2
                pl.BlockSpec((1, Cp), lambda n, t: (0, 0), **wkw),                   # scale2
                pl.BlockSpec((1, Cp), lambda n, t: (0, 0), **wkw),                   # shift2
            ],
            out_specs=pl.BlockSpec((None, L_tile, Cp), lambda n, t: (n, t, 0)),
            scratch_shapes=[pltpu.VMEM((Lh, Cp), jnp.bfloat16)],   # staged h (bf16)
        )
        return pl.pallas_call(
            kernel,
            out_shape=jax.ShapeDtypeStruct((N, L_out, Cp), jnp.bfloat16),
            grid_spec=grid_spec,
            compiler_params=pltpu.CompilerParams(
                dimension_semantics=("parallel", "parallel"),      # megacore splits (N, L-tiles)
                vmem_limit_bytes=_derive_vmem_limit(
                    L_win, L_tile, Lh, Cp, K, weight_pipeline_mode is not None)),
        )(x_tiles, w1, s1, t1, w2, s2, t2)

    try:
        # Constant-index weight/scale blocks: single-buffer them (halves their VMEM).
        out_nlc = call(pl.Buffered(buffer_count=1))
    except Exception:
        out_nlc = call(None)

    # Back to PyTorch NCL layout: drop padded rows/channels, return f32.
    return jnp.transpose(out_nlc[:, :L, :C].astype(jnp.float32), (0, 2, 1))


def make_params(key, C, K):
    """Deterministic synthetic parameters for the two ConvBlocks, fused & padded."""
    assert K % 2 == 1
    lane = 128
    # Feed the 256-wide MXU (v6e/v7x) when there are enough real channels.
    Cp = _round_up(C, lane) if C <= lane else _round_up(C, 2 * lane)
    ks = jax.random.split(key, 8)
    eps = 1e-5

    def conv_bn(kw, kb, kg, kbeta):
        W = 0.1 * jax.random.normal(kw, (C, C, K), jnp.float32)   # PyTorch (out, in, K)
        b = 0.1 * jax.random.normal(kb, (C,), jnp.float32)
        gamma = 1.0 + 0.1 * jax.random.normal(kg, (C,), jnp.float32)
        beta = 0.1 * jax.random.normal(kbeta, (C,), jnp.float32)
        mean = jnp.zeros((C,), jnp.float32)   # fresh BN running stats
        var = jnp.ones((C,), jnp.float32)
        scale = gamma / jnp.sqrt(var + eps)
        shift = beta + (b - mean) * scale
        # (K, c_in, c_out) so each tap is x @ w[k]; pad channels to Cp, cast bf16.
        w_kic = jnp.transpose(W, (2, 1, 0))
        w_kic = jnp.pad(w_kic, ((0, 0), (0, Cp - C), (0, Cp - C))).astype(jnp.bfloat16)
        # Zero scale/shift on padded channels keeps them exactly 0 through ReLU/residual.
        scale_p = jnp.pad(scale, (0, Cp - C))[None, :]
        shift_p = jnp.pad(shift, (0, Cp - C))[None, :]
        return w_kic, scale_p, shift_p

    w1, s1, t1 = conv_bn(ks[0], ks[1], ks[2], ks[3])
    w2, s2, t2 = conv_bn(ks[4], ks[5], ks[6], ks[7])
    return (w1, s1, t1, w2, s2, t2)


def residual_block_reference(x_ncl, params):
    """Pure-JAX reference with the same numerics spec as the kernel
    (bf16 inputs/weights/staged h, f32 accumulation & epilogue, bf16 final store)."""
    w1, s1, t1, w2, s2, t2 = params
    K = w1.shape[0]
    pad = K // 2
    N, C, L = x_ncl.shape
    Cp = w1.shape[-1]

    x = jnp.pad(jnp.transpose(x_ncl, (0, 2, 1)), ((0, 0), (0, 0), (0, Cp - C)))
    x = x.astype(jnp.bfloat16).astype(jnp.float32)

    def convblock(v, w, s, t):
        vp = jnp.pad(v, ((0, 0), (pad, pad), (0, 0)))
        acc = jnp.zeros((N, L, Cp), jnp.float32)
        for k in range(K):
            acc = acc + jnp.einsum('nlc,cd->nld', vp[:, k:k + L, :],
                                   w[k].astype(jnp.float32))
        return jnp.maximum(acc * s + t, 0.0)

    h = convblock(x, w1, s1, t1)
    h = h.astype(jnp.bfloat16).astype(jnp.float32)     # kernel stages h in bf16
    y = convblock(h, w2, s2, t2)
    out = (x + y).astype(jnp.bfloat16).astype(jnp.float32)   # kernel stores bf16
    return jnp.transpose(out[:, :, :C], (0, 2, 1))


if __name__ == "__main__":
    N, C, L, K = 2, 4, 16, 7   # small shapes; odd K so the residual add is valid

    key = jax.random.PRNGKey(0)
    k_x, k_p = jax.random.split(key)

    x_ncl = jax.random.normal(k_x, (N, C, L), jnp.float32)   # PyTorch NCL input
    params = make_params(k_p, C, K)

    ref_ncl = residual_block_reference(x_ncl, params)

    # Single-tile path (L fits in one tile).
    out_ncl = residual_block_pallas(x_ncl, params)
    out_ncl = jax.block_until_ready(out_ncl)
    assert out_ncl.shape == (N, C, L)
    assert jnp.allclose(out_ncl, ref_ncl, atol=1e-2, rtol=1e-2), "single-tile mismatch vs reference"

    # Exercise the L-tiled halo-recompute path on the same input (2 tiles of 8 rows).
    out_tiled = residual_block_pallas(x_ncl, params, l_tile_max=8)
    out_tiled = jax.block_until_ready(out_tiled)
    assert jnp.allclose(out_tiled, ref_ncl, atol=1e-2, rtol=1e-2), "tiled-path mismatch vs reference"

    print("KERNEL_OK")
</pallas_src>

<mosaic_0001>
module attributes {stable_mosaic.version = 11 : i64} {
  func.func @kernel(%arg0: i32, %arg1: i32, %arg2: memref<1x1x28x128xbf16, #tpu.memory_space<vmem>>, %arg3: memref<7x128x128xbf16, #tpu.memory_space<vmem>>, %arg4: memref<1x128xf32, #tpu.memory_space<vmem>>, %arg5: memref<1x128xf32, #tpu.memory_space<vmem>>, %arg6: memref<7x128x128xbf16, #tpu.memory_space<vmem>>, %arg7: memref<1x128xf32, #tpu.memory_space<vmem>>, %arg8: memref<1x128xf32, #tpu.memory_space<vmem>>, %arg9: memref<1x16x128xbf16, #tpu.memory_space<vmem>>, %arg10: memref<22x128xbf16, #tpu.memory_space<vmem>>) attributes {dimension_semantics = [#tpu.dimension_semantics<parallel>, #tpu.dimension_semantics<parallel>], iteration_bounds = array<i64: 2, 1>, scalar_prefetch = 0 : i64, scratch_operands = 1 : i64, tpu.core_type = #tpu.core_type<tc>, window_params = [{transform_indices = @transform_0, window_bounds = array<i64: 1, 1, 28, 128>}, {pipeline_mode = #tpu.pipeline_mode<synchronous>, transform_indices = @transform_1, window_bounds = array<i64: 7, 128, 128>}, {pipeline_mode = #tpu.pipeline_mode<synchronous>, transform_indices = @transform_2, window_bounds = array<i64: 1, 128>}, {pipeline_mode = #tpu.pipeline_mode<synchronous>, transform_indices = @transform_3, window_bounds = array<i64: 1, 128>}, {pipeline_mode = #tpu.pipeline_mode<synchronous>, transform_indices = @transform_4, window_bounds = array<i64: 7, 128, 128>}, {pipeline_mode = #tpu.pipeline_mode<synchronous>, transform_indices = @transform_5, window_bounds = array<i64: 1, 128>}, {pipeline_mode = #tpu.pipeline_mode<synchronous>, transform_indices = @transform_6, window_bounds = array<i64: 1, 128>}, {transform_indices = @transform_7, window_bounds = array<i64: 1, 16, 128>}]} {
    %c0 = arith.constant 0 : index
    %c0_0 = arith.constant 0 : index
    %c0_1 = arith.constant 0 : index
    %c0_2 = arith.constant 0 : index
    %0 = vector.load %arg2[%c0, %c0_0, %c0_1, %c0_2] : memref<1x1x28x128xbf16, #tpu.memory_space<vmem>>, vector<1x1x22x128xbf16>
    %1 = vector.shape_cast %0 : vector<1x1x22x128xbf16> to vector<22x128xbf16>
    %c0_3 = arith.constant 0 : index
    %c0_4 = arith.constant 0 : index
    %c0_5 = arith.constant 0 : index
    %2 = vector.load %arg3[%c0_3, %c0_4, %c0_5] : memref<7x128x128xbf16, #tpu.memory_space<vmem>>, vector<1x128x128xbf16>
    %3 = vector.shape_cast %2 : vector<1x128x128xbf16> to vector<128x128xbf16>
    %cst = arith.constant dense<0.000000e+00> : vector<22x128xf32>
    %4 = tpu.matmul %1, %3, %cst {dimension_numbers = #tpu.dot_dimension_numbers<[1], [0], [0], [1], [0, 0, 1, 1], [], []>} : vector<22x128xbf16>, vector<128x128xbf16>, vector<22x128xf32> -> vector<22x128xf32>
    %c0_6 = arith.constant 0 : index
    %c0_7 = arith.constant 0 : index
    %c1 = arith.constant 1 : index
    %c0_8 = arith.constant 0 : index
    %5 = vector.load %arg2[%c0_6, %c0_7, %c1, %c0_8] : memref<1x1x28x128xbf16, #tpu.memory_space<vmem>>, vector<1x1x22x128xbf16>
    %6 = vector.shape_cast %5 : vector<1x1x22x128xbf16> to vector<22x128xbf16>
    %c1_9 = arith.constant 1 : index
    %c0_10 = arith.constant 0 : index
    %c0_11 = arith.constant 0 : index
    %7 = vector.load %arg3[%c1_9, %c0_10, %c0_11] : memref<7x128x128xbf16, #tpu.memory_space<vmem>>, vector<1x128x128xbf16>
    %8 = vector.shape_cast %7 : vector<1x128x128xbf16> to vector<128x128xbf16>
    %cst_12 = arith.constant dense<0.000000e+00> : vector<22x128xf32>
    %9 = tpu.matmul %6, %8, %cst_12 {dimension_numbers = #tpu.dot_dimension_numbers<[1], [0], [0], [1], [0, 0, 1, 1], [], []>} : vector<22x128xbf16>, vector<128x128xbf16>, vector<22x128xf32> -> vector<22x128xf32>
    %10 = arith.addf %4, %9 : vector<22x128xf32>
    %c0_13 = arith.constant 0 : index
    %c0_14 = arith.constant 0 : index
    %c2 = arith.constant 2 : index
    %c0_15 = arith.constant 0 : index
    %11 = vector.load %arg2[%c0_13, %c0_14, %c2, %c0_15] : memref<1x1x28x128xbf16, #tpu.memory_space<vmem>>, vector<1x1x22x128xbf16>
    %12 = vector.shape_cast %11 : vector<1x1x22x128xbf16> to vector<22x128xbf16>
    %c2_16 = arith.constant 2 : index
    %c0_17 = arith.constant 0 : index
    %c0_18 = arith.constant 0 : index
    %13 = vector.load %arg3[%c2_16, %c0_17, %c0_18] : memref<7x128x128xbf16, #tpu.memory_space<vmem>>, vector<1x128x128xbf16>
    %14 = vector.shape_cast %13 : vector<1x128x128xbf16> to vector<128x128xbf16>
    %cst_19 = arith.constant dense<0.000000e+00> : vector<22x128xf32>
    %15 = tpu.matmul %12, %14, %cst_19 {dimension_numbers = #tpu.dot_dimension_numbers<[1], [0], [0], [1], [0, 0, 1, 1], [], []>} : vector<22x128xbf16>, vector<128x128xbf16>, vector<22x128xf32> -> vector<22x128xf32>
    %16 = arith.addf %10, %15 : vector<22x128xf32>
    %c0_20 = arith.constant 0 : index
    %c0_21 = arith.constant 0 : index
    %c3 = arith.constant 3 : index
    %c0_22 = arith.constant 0 : index
    %17 = vector.load %arg2[%c0_20, %c0_21, %c3, %c0_22] : memref<1x1x28x128xbf16, #tpu.memory_space<vmem>>, vector<1x1x22x128xbf16>
    %18 = vector.shape_cast %17 : vector<1x1x22x128xbf16> to vector<22x128xbf16>
    %c3_23 = arith.constant 3 : index
    %c0_24 = arith.constant 0 : index
    %c0_25 = arith.constant 0 : index
    %19 = vector.load %arg3[%c3_23, %c0_24, %c0_25] : memref<7x128x128xbf16, #tpu.memory_space<vmem>>, vector<1x128x128xbf16>
    %20 = vector.shape_cast %19 : vector<1x128x128xbf16> to vector<128x128xbf16>
    %cst_26 = arith.constant dense<0.000000e+00> : vector<22x128xf32>
    %21 = tpu.matmul %18, %20, %cst_26 {dimension_numbers = #tpu.dot_dimension_numbers<[1], [0], [0], [1], [0, 0, 1, 1], [], []>} : vector<22x128xbf16>, vector<128x128xbf16>, vector<22x128xf32> -> vector<22x128xf32>
    %22 = arith.addf %16, %21 : vector<22x128xf32>
    %c0_27 = arith.constant 0 : index
    %c0_28 = arith.constant 0 : index
    %c4 = arith.constant 4 : index
    %c0_29 = arith.constant 0 : index
    %23 = vector.load %arg2[%c0_27, %c0_28, %c4, %c0_29] : memref<1x1x28x128xbf16, #tpu.memory_space<vmem>>, vector<1x1x22x128xbf16>
    %24 = vector.shape_cast %23 : vector<1x1x22x128xbf16> to vector<22x128xbf16>
    %c4_30 = arith.constant 4 : index
    %c0_31 = arith.constant 0 : index
    %c0_32 = arith.constant 0 : index
    %25 = vector.load %arg3[%c4_30, %c0_31, %c0_32] : memref<7x128x128xbf16, #tpu.memory_space<vmem>>, vector<1x128x128xbf16>
    %26 = vector.shape_cast %25 : vector<1x128x128xbf16> to vector<128x128xbf16>
    %cst_33 = arith.constant dense<0.000000e+00> : vector<22x128xf32>
    %27 = tpu.matmul %24, %26, %cst_33 {dimension_numbers = #tpu.dot_dimension_numbers<[1], [0], [0], [1], [0, 0, 1, 1], [], []>} : vector<22x128xbf16>, vector<128x128xbf16>, vector<22x128xf32> -> vector<22x128xf32>
    %28 = arith.addf %22, %27 : vector<22x128xf32>
    %c0_34 = arith.constant 0 : index
    %c0_35 = arith.constant 0 : index
    %c5 = arith.constant 5 : index
    %c0_36 = arith.constant 0 : index
    %29 = vector.load %arg2[%c0_34, %c0_35, %c5, %c0_36] : memref<1x1x28x128xbf16, #tpu.memory_space<vmem>>, vector<1x1x22x128xbf16>
    %30 = vector.shape_cast %29 : vector<1x1x22x128xbf16> to vector<22x128xbf16>
    %c5_37 = arith.constant 5 : index
    %c0_38 = arith.constant 0 : index
    %c0_39 = arith.constant 0 : index
    %31 = vector.load %arg3[%c5_37, %c0_38, %c0_39] : memref<7x128x128xbf16, #tpu.memory_space<vmem>>, vector<1x128x128xbf16>
    %32 = vector.shape_cast %31 : vector<1x128x128xbf16> to vector<128x128xbf16>
    %cst_40 = arith.constant dense<0.000000e+00> : vector<22x128xf32>
    %33 = tpu.matmul %30, %32, %cst_40 {dimension_numbers = #tpu.dot_dimension_numbers<[1], [0], [0], [1], [0, 0, 1, 1], [], []>} : vector<22x128xbf16>, vector<128x128xbf16>, vector<22x128xf32> -> vector<22x128xf32>
    %34 = arith.addf %28, %33 : vector<22x128xf32>
    %c0_41 = arith.constant 0 : index
    %c0_42 = arith.constant 0 : index
    %c6 = arith.constant 6 : index
    %c0_43 = arith.constant 0 : index
    %35 = vector.load %arg2[%c0_41, %c0_42, %c6, %c0_43] : memref<1x1x28x128xbf16, #tpu.memory_space<vmem>>, vector<1x1x22x128xbf16>
    %36 = vector.shape_cast %35 : vector<1x1x22x128xbf16> to vector<22x128xbf16>
    %c6_44 = arith.constant 6 : index
    %c0_45 = arith.constant 0 : index
    %c0_46 = arith.constant 0 : index
    %37 = vector.load %arg3[%c6_44, %c0_45, %c0_46] : memref<7x128x128xbf16, #tpu.memory_space<vmem>>, vector<1x128x128xbf16>
    %38 = vector.shape_cast %37 : vector<1x128x128xbf16> to vector<128x128xbf16>
    %cst_47 = arith.constant dense<0.000000e+00> : vector<22x128xf32>
    %39 = tpu.matmul %36, %38, %cst_47 {dimension_numbers = #tpu.dot_dimension_numbers<[1], [0], [0], [1], [0, 0, 1, 1], [], []>} : vector<22x128xbf16>, vector<128x128xbf16>, vector<22x128xf32> -> vector<22x128xf32>
    %40 = arith.addf %34, %39 : vector<22x128xf32>
    %c0_48 = arith.constant 0 : index
    %c0_49 = arith.constant 0 : index
    %41 = vector.load %arg4[%c0_48, %c0_49] : memref<1x128xf32, #tpu.memory_space<vmem>>, vector<1x128xf32>
    %42 = vector.broadcast %41 : vector<1x128xf32> to vector<22x128xf32>
    %43 = arith.mulf %40, %42 : vector<22x128xf32>
    %c0_50 = arith.constant 0 : index
    %c0_51 = arith.constant 0 : index
    %44 = vector.load %arg5[%c0_50, %c0_51] : memref<1x128xf32, #tpu.memory_space<vmem>>, vector<1x128xf32>
    %45 = vector.broadcast %44 : vector<1x128xf32> to vector<22x128xf32>
    %46 = arith.addf %43, %45 : vector<22x128xf32>
    %cst_52 = arith.constant 0.000000e+00 : f32
    %47 = vector.broadcast %cst_52 : f32 to vector<22x128xf32>
    %48 = arith.maximumf %46, %47 : vector<22x128xf32>
    %49 = tpu.iota {dimensions = array<i32: 0>} : vector<22x128xi32>
    %c16_i32 = arith.constant 16 : i32
    %50 = arith.muli %arg1, %c16_i32 : i32
    %c3_i32 = arith.constant 3 : i32
    %51 = arith.subi %50, %c3_i32 : i32
    %52 = vector.broadcast %51 : i32 to vector<22x128xi32>
    %53 = arith.addi %52, %49 : vector<22x128xi32>
    %c0_i32 = arith.constant 0 : i32
    %54 = vector.broadcast %c0_i32 : i32 to vector<22x128xi32>
    %55 = arith.cmpi sge, %53, %54 : vector<22x128xi32>
    %c16_i32_53 = arith.constant 16 : i32
    %56 = vector.broadcast %c16_i32_53 : i32 to vector<22x128xi32>
    %57 = arith.cmpi slt, %53, %56 : vector<22x128xi32>
    %58 = arith.andi %55, %57 : vector<22x128xi1>
    %cst_54 = arith.constant 0.000000e+00 : f32
    %59 = vector.broadcast %cst_54 : f32 to vector<22x128xf32>
    %60 = arith.select %58, %48, %59 : vector<22x128xi1>, vector<22x128xf32>
    %61 = arith.truncf %60 : vector<22x128xf32> to vector<22x128xbf16>
    %c0_55 = arith.constant 0 : index
    %c0_56 = arith.constant 0 : index
    %62 = vector.load %arg10[%c0_55, %c0_56] : memref<22x128xbf16, #tpu.memory_space<vmem>>, vector<22x128xbf16>
    tpu.vector_store %arg10[%c0_55, %c0_56], %61 {strides = array<i32>} : memref<22x128xbf16, #tpu.memory_space<vmem>>, vector<22x128xbf16>,
    %c0_57 = arith.constant 0 : index
    %c0_58 = arith.constant 0 : index
    %63 = vector.load %arg10[%c0_57, %c0_58] : memref<22x128xbf16, #tpu.memory_space<vmem>>, vector<16x128xbf16>
    %c0_59 = arith.constant 0 : index
    %c0_60 = arith.constant 0 : index
    %c0_61 = arith.constant 0 : index
    %64 = vector.load %arg6[%c0_59, %c0_60, %c0_61] : memref<7x128x128xbf16, #tpu.memory_space<vmem>>, vector<1x128x128xbf16>
    %65 = vector.shape_cast %64 : vector<1x128x128xbf16> to vector<128x128xbf16>
    %cst_62 = arith.constant dense<0.000000e+00> : vector<16x128xf32>
    %66 = tpu.matmul %63, %65, %cst_62 {dimension_numbers = #tpu.dot_dimension_numbers<[1], [0], [0], [1], [0, 0, 1, 1], [], []>} : vector<16x128xbf16>, vector<128x128xbf16>, vector<16x128xf32> -> vector<16x128xf32>
    %c1_63 = arith.constant 1 : index
    %c0_64 = arith.constant 0 : index
    %67 = vector.load %arg10[%c1_63, %c0_64] : memref<22x128xbf16, #tpu.memory_space<vmem>>, vector<16x128xbf16>
    %c1_65 = arith.constant 1 : index
    %c0_66 = arith.constant 0 : index
    %c0_67 = arith.constant 0 : index
    %68 = vector.load %arg6[%c1_65, %c0_66, %c0_67] : memref<7x128x128xbf16, #tpu.memory_space<vmem>>, vector<1x128x128xbf16>
    %69 = vector.shape_cast %68 : vector<1x128x128xbf16> to vector<128x128xbf16>
    %cst_68 = arith.constant dense<0.000000e+00> : vector<16x128xf32>
    %70 = tpu.matmul %67, %69, %cst_68 {dimension_numbers = #tpu.dot_dimension_numbers<[1], [0], [0], [1], [0, 0, 1, 1], [], []>} : vector<16x128xbf16>, vector<128x128xbf16>, vector<16x128xf32> -> vector<16x128xf32>
    %71 = arith.addf %66, %70 : vector<16x128xf32>
    %c2_69 = arith.constant 2 : index
    %c0_70 = arith.constant 0 : index
    %72 = vector.load %arg10[%c2_69, %c0_70] : memref<22x128xbf16, #tpu.memory_space<vmem>>, vector<16x128xbf16>
    %c2_71 = arith.constant 2 : index
    %c0_72 = arith.constant 0 : index
    %c0_73 = arith.constant 0 : index
    %73 = vector.load %arg6[%c2_71, %c0_72, %c0_73] : memref<7x128x128xbf16, #tpu.memory_space<vmem>>, vector<1x128x128xbf16>
    %74 = vector.shape_cast %73 : vector<1x128x128xbf16> to vector<128x128xbf16>
    %cst_74 = arith.constant dense<0.000000e+00> : vector<16x128xf32>
    %75 = tpu.matmul %72, %74, %cst_74 {dimension_numbers = #tpu.dot_dimension_numbers<[1], [0], [0], [1], [0, 0, 1, 1], [], []>} : vector<16x128xbf16>, vector<128x128xbf16>, vector<16x128xf32> -> vector<16x128xf32>
    %76 = arith.addf %71, %75 : vector<16x128xf32>
    %c3_75 = arith.constant 3 : index
    %c0_76 = arith.constant 0 : index
    %77 = vector.load %arg10[%c3_75, %c0_76] : memref<22x128xbf16, #tpu.memory_space<vmem>>, vector<16x128xbf16>
    %c3_77 = arith.constant 3 : index
    %c0_78 = arith.constant 0 : index
    %c0_79 = arith.constant 0 : index
    %78 = vector.load %arg6[%c3_77, %c0_78, %c0_79] : memref<7x128x128xbf16, #tpu.memory_space<vmem>>, vector<1x128x128xbf16>
    %79 = vector.shape_cast %78 : vector<1x128x128xbf16> to vector<128x128xbf16>
    %cst_80 = arith.constant dense<0.000000e+00> : vector<16x128xf32>
    %80 = tpu.matmul %77, %79, %cst_80 {dimension_numbers = #tpu.dot_dimension_numbers<[1], [0], [0], [1], [0, 0, 1, 1], [], []>} : vector<16x128xbf16>, vector<128x128xbf16>, vector<16x128xf32> -> vector<16x128xf32>
    %81 = arith.addf %76, %80 : vector<16x128xf32>
    %c4_81 = arith.constant 4 : index
    %c0_82 = arith.constant 0 : index
    %82 = vector.load %arg10[%c4_81, %c0_82] : memref<22x128xbf16, #tpu.memory_space<vmem>>, vector<16x128xbf16>
    %c4_83 = arith.constant 4 : index
    %c0_84 = arith.constant 0 : index
    %c0_85 = arith.constant 0 : index
    %83 = vector.load %arg6[%c4_83, %c0_84, %c0_85] : memref<7x128x128xbf16, #tpu.memory_space<vmem>>, vector<1x128x128xbf16>
    %84 = vector.shape_cast %83 : vector<1x128x128xbf16> to vector<128x128xbf16>
    %cst_86 = arith.constant dense<0.000000e+00> : vector<16x128xf32>
    %85 = tpu.matmul %82, %84, %cst_86 {dimension_numbers = #tpu.dot_dimension_numbers<[1], [0], [0], [1], [0, 0, 1, 1], [], []>} : vector<16x128xbf16>, vector<128x128xbf16>, vector<16x128xf32> -> vector<16x128xf32>
    %86 = arith.addf %81, %85 : vector<16x128xf32>
    %c5_87 = arith.constant 5 : index
    %c0_88 = arith.constant 0 : index
    %87 = vector.load %arg10[%c5_87, %c0_88] : memref<22x128xbf16, #tpu.memory_space<vmem>>, vector<16x128xbf16>
    %c5_89 = arith.constant 5 : index
    %c0_90 = arith.constant 0 : index
    %c0_91 = arith.constant 0 : index
    %88 = vector.load %arg6[%c5_89, %c0_90, %c0_91] : memref<7x128x128xbf16, #tpu.memory_space<vmem>>, vector<1x128x128xbf16>
    %89 = vector.shape_cast %88 : vector<1x128x128xbf16> to vector<128x128xbf16>
    %cst_92 = arith.constant dense<0.000000e+00> : vector<16x128xf32>
    %90 = tpu.matmul %87, %89, %cst_92 {dimension_numbers = #tpu.dot_dimension_numbers<[1], [0], [0], [1], [0, 0, 1, 1], [], []>} : vector<16x128xbf16>, vector<128x128xbf16>, vector<16x128xf32> -> vector<16x128xf32>
    %91 = arith.addf %86, %90 : vector<16x128xf32>
    %c6_93 = arith.constant 6 : index
    %c0_94 = arith.constant 0 : index
    %92 = vector.load %arg10[%c6_93, %c0_94] : memref<22x128xbf16, #tpu.memory_space<vmem>>, vector<16x128xbf16>
    %c6_95 = arith.constant 6 : index
    %c0_96 = arith.constant 0 : index
    %c0_97 = arith.constant 0 : index
    %93 = vector.load %arg6[%c6_95, %c0_96, %c0_97] : memref<7x128x128xbf16, #tpu.memory_space<vmem>>, vector<1x128x128xbf16>
    %94 = vector.shape_cast %93 : vector<1x128x128xbf16> to vector<128x128xbf16>
    %cst_98 = arith.constant dense<0.000000e+00> : vector<16x128xf32>
    %95 = tpu.matmul %92, %94, %cst_98 {dimension_numbers = #tpu.dot_dimension_numbers<[1], [0], [0], [1], [0, 0, 1, 1], [], []>} : vector<16x128xbf16>, vector<128x128xbf16>, vector<16x128xf32> -> vector<16x128xf32>
    %96 = arith.addf %91, %95 : vector<16x128xf32>
    %c0_99 = arith.constant 0 : index
    %c0_100 = arith.constant 0 : index
    %97 = vector.load %arg7[%c0_99, %c0_100] : memref<1x128xf32, #tpu.memory_space<vmem>>, vector<1x128xf32>
    %98 = vector.broadcast %97 : vector<1x128xf32> to vector<16x128xf32>
    %99 = arith.mulf %96, %98 : vector<16x128xf32>
    %c0_101 = arith.constant 0 : index
    %c0_102 = arith.constant 0 : index
    %100 = vector.load %arg8[%c0_101, %c0_102] : memref<1x128xf32, #tpu.memory_space<vmem>>, vector<1x128xf32>
    %101 = vector.broadcast %100 : vector<1x128xf32> to vector<16x128xf32>
    %102 = arith.addf %99, %101 : vector<16x128xf32>
    %cst_103 = arith.constant 0.000000e+00 : f32
    %103 = vector.broadcast %cst_103 : f32 to vector<16x128xf32>
    %104 = arith.maximumf %102, %103 : vector<16x128xf32>
    %c0_104 = arith.constant 0 : index
    %c0_105 = arith.constant 0 : index
    %c6_106 = arith.constant 6 : index
    %c0_107 = arith.constant 0 : index
    %105 = vector.load %arg2[%c0_104, %c0_105, %c6_106, %c0_107] : memref<1x1x28x128xbf16, #tpu.memory_space<vmem>>, vector<1x1x16x128xbf16>
    %106 = vector.shape_cast %105 : vector<1x1x16x128xbf16> to vector<16x128xbf16>
    %107 = arith.extf %106 : vector<16x128xbf16> to vector<16x128xf32>
    %108 = arith.addf %104, %107 : vector<16x128xf32>
    %109 = arith.truncf %108 : vector<16x128xf32> to vector<16x128xbf16>
    %c0_108 = arith.constant 0 : index
    %c0_109 = arith.constant 0 : index
    %c0_110 = arith.constant 0 : index
    %110 = vector.load %arg9[%c0_108, %c0_109, %c0_110] : memref<1x16x128xbf16, #tpu.memory_space<vmem>>, vector<1x16x128xbf16>
    %111 = vector.shape_cast %110 : vector<1x16x128xbf16> to vector<16x128xbf16>
    %112 = vector.shape_cast %109 : vector<16x128xbf16> to vector<1x16x128xbf16>
    tpu.vector_store %arg9[%c0_108, %c0_109, %c0_110], %112 {strides = array<i32>} : memref<1x16x128xbf16, #tpu.memory_space<vmem>>, vector<1x16x128xbf16>,
    return
  }
  func.func @transform_0(%arg0: i32, %arg1: i32) -> (i32, i32, i32, i32) {
    %c0_i32 = arith.constant 0 : i32
    %c0_i32_0 = arith.constant 0 : i32
    %c0_i32_1 = arith.constant 0 : i32
    return %arg0, %arg1, %c0_i32, %c0_i32_0 : i32, i32, i32, i32
  }
  func.func @transform_1(%arg0: i32, %arg1: i32) -> (i32, i32, i32) {
    %c0_i32 = arith.constant 0 : i32
    %c0_i32_0 = arith.constant 0 : i32
    %c0_i32_1 = arith.constant 0 : i32
    %c0_i32_2 = arith.constant 0 : i32
    return %c0_i32, %c0_i32_0, %c0_i32_1 : i32, i32, i32
  }
  func.func @transform_2(%arg0: i32, %arg1: i32) -> (i32, i32) {
    %c0_i32 = arith.constant 0 : i32
    %c0_i32_0 = arith.constant 0 : i32
    %c0_i32_1 = arith.constant 0 : i32
    return %c0_i32, %c0_i32_0 : i32, i32
  }
  func.func @transform_3(%arg0: i32, %arg1: i32) -> (i32, i32) {
    %c0_i32 = arith.constant 0 : i32
    %c0_i32_0 = arith.constant 0 : i32
    %c0_i32_1 = arith.constant 0 : i32
    return %c0_i32, %c0_i32_0 : i32, i32
  }
  func.func @transform_4(%arg0: i32, %arg1: i32) -> (i32, i32, i32) {
    %c0_i32 = arith.constant 0 : i32
    %c0_i32_0 = arith.constant 0 : i32
    %c0_i32_1 = arith.constant 0 : i32
    %c0_i32_2 = arith.constant 0 : i32
    return %c0_i32, %c0_i32_0, %c0_i32_1 : i32, i32, i32
  }
  func.func @transform_5(%arg0: i32, %arg1: i32) -> (i32, i32) {
    %c0_i32 = arith.constant 0 : i32
    %c0_i32_0 = arith.constant 0 : i32
    %c0_i32_1 = arith.constant 0 : i32
    return %c0_i32, %c0_i32_0 : i32, i32
  }
  func.func @transform_6(%arg0: i32, %arg1: i32) -> (i32, i32) {
    %c0_i32 = arith.constant 0 : i32
    %c0_i32_0 = arith.constant 0 : i32
    %c0_i32_1 = arith.constant 0 : i32
    return %c0_i32, %c0_i32_0 : i32, i32
  }
  func.func @transform_7(%arg0: i32, %arg1: i32) -> (i32, i32, i32) {
    %c0_i32 = arith.constant 0 : i32
    %c0_i32_0 = arith.constant 0 : i32
    return %arg0, %arg1, %c0_i32 : i32, i32, i32
  }
}

module attributes {stable_mosaic.version = 11 : i64} {
  func.func @kernel(%arg0: i32, %arg1: i32, %arg2: memref<1x1x28x128xbf16, #tpu.memory_space<vmem>>, %arg3: memref<7x128x128xbf16, #tpu.memory_space<vmem>>, %arg4: memref<1x128xf32, #tpu.memory_space<vmem>>, %arg5: memref<1x128xf32, #tpu.memory_space<vmem>>, %arg6: memref<7x128x128xbf16, #tpu.memory_space<vmem>>, %arg7: memref<1x128xf32, #tpu.memory_space<vmem>>, %arg8: memref<1x128xf32, #tpu.memory_space<vmem>>, %arg9: memref<1x16x128xbf16, #tpu.memory_space<vmem>>, %arg10: memref<22x128xbf16, #tpu.memory_space<vmem>>) attributes {dimension_semantics = [#tpu.dimension_semantics<parallel>, #tpu.dimension_semantics<parallel>], iteration_bounds = array<i64: 2, 1>, scalar_prefetch = 0 : i64, scratch_operands = 1 : i64, tpu.core_type = #tpu.core_type<tc>, window_params = [{transform_indices = @transform_0, window_bounds = array<i64: 1, 1, 28, 128>}, {pipeline_mode = #tpu.pipeline_mode<synchronous>, transform_indices = @transform_1, window_bounds = array<i64: 7, 128, 128>}, {pipeline_mode = #tpu.pipeline_mode<synchronous>, transform_indices = @transform_2, window_bounds = array<i64: 1, 128>}, {pipeline_mode = #tpu.pipeline_mode<synchronous>, transform_indices = @transform_3, window_bounds = array<i64: 1, 128>}, {pipeline_mode = #tpu.pipeline_mode<synchronous>, transform_indices = @transform_4, window_bounds = array<i64: 7, 128, 128>}, {pipeline_mode = #tpu.pipeline_mode<synchronous>, transform_indices = @transform_5, window_bounds = array<i64: 1, 128>}, {pipeline_mode = #tpu.pipeline_mode<synchronous>, transform_indices = @transform_6, window_bounds = array<i64: 1, 128>}, {transform_indices = @transform_7, window_bounds = array<i64: 1, 16, 128>}]} {
    %c0 = arith.constant 0 : index
    %c0_0 = arith.constant 0 : index
    %c0_1 = arith.constant 0 : index
    %c0_2 = arith.constant 0 : index
    %0 = vector.load %arg2[%c0, %c0_0, %c0_1, %c0_2] : memref<1x1x28x128xbf16, #tpu.memory_space<vmem>>, vector<1x1x22x128xbf16>
    %1 = vector.shape_cast %0 : vector<1x1x22x128xbf16> to vector<22x128xbf16>
    %c0_3 = arith.constant 0 : index
    %c0_4 = arith.constant 0 : index
    %c0_5 = arith.constant 0 : index
    %2 = vector.load %arg3[%c0_3, %c0_4, %c0_5] : memref<7x128x128xbf16, #tpu.memory_space<vmem>>, vector<1x128x128xbf16>
    %3 = vector.shape_cast %2 : vector<1x128x128xbf16> to vector<128x128xbf16>
    %cst = arith.constant dense<0.000000e+00> : vector<22x128xf32>
    %4 = tpu.matmul %1, %3, %cst {dimension_numbers = #tpu.dot_dimension_numbers<[1], [0], [0], [1], [0, 0, 1, 1], [], []>} : vector<22x128xbf16>, vector<128x128xbf16>, vector<22x128xf32> -> vector<22x128xf32>
    %c0_6 = arith.constant 0 : index
    %c0_7 = arith.constant 0 : index
    %c1 = arith.constant 1 : index
    %c0_8 = arith.constant 0 : index
    %5 = vector.load %arg2[%c0_6, %c0_7, %c1, %c0_8] : memref<1x1x28x128xbf16, #tpu.memory_space<vmem>>, vector<1x1x22x128xbf16>
    %6 = vector.shape_cast %5 : vector<1x1x22x128xbf16> to vector<22x128xbf16>
    %c1_9 = arith.constant 1 : index
    %c0_10 = arith.constant 0 : index
    %c0_11 = arith.constant 0 : index
    %7 = vector.load %arg3[%c1_9, %c0_10, %c0_11] : memref<7x128x128xbf16, #tpu.memory_space<vmem>>, vector<1x128x128xbf16>
    %8 = vector.shape_cast %7 : vector<1x128x128xbf16> to vector<128x128xbf16>
    %cst_12 = arith.constant dense<0.000000e+00> : vector<22x128xf32>
    %9 = tpu.matmul %6, %8, %cst_12 {dimension_numbers = #tpu.dot_dimension_numbers<[1], [0], [0], [1], [0, 0, 1, 1], [], []>} : vector<22x128xbf16>, vector<128x128xbf16>, vector<22x128xf32> -> vector<22x128xf32>
    %10 = arith.addf %4, %9 : vector<22x128xf32>
    %c0_13 = arith.constant 0 : index
    %c0_14 = arith.constant 0 : index
    %c2 = arith.constant 2 : index
    %c0_15 = arith.constant 0 : index
    %11 = vector.load %arg2[%c0_13, %c0_14, %c2, %c0_15] : memref<1x1x28x128xbf16, #tpu.memory_space<vmem>>, vector<1x1x22x128xbf16>
    %12 = vector.shape_cast %11 : vector<1x1x22x128xbf16> to vector<22x128xbf16>
    %c2_16 = arith.constant 2 : index
    %c0_17 = arith.constant 0 : index
    %c0_18 = arith.constant 0 : index
    %13 = vector.load %arg3[%c2_16, %c0_17, %c0_18] : memref<7x128x128xbf16, #tpu.memory_space<vmem>>, vector<1x128x128xbf16>
    %14 = vector.shape_cast %13 : vector<1x128x128xbf16> to vector<128x128xbf16>
    %cst_19 = arith.constant dense<0.000000e+00> : vector<22x128xf32>
    %15 = tpu.matmul %12, %14, %cst_19 {dimension_numbers = #tpu.dot_dimension_numbers<[1], [0], [0], [1], [0, 0, 1, 1], [], []>} : vector<22x128xbf16>, vector<128x128xbf16>, vector<22x128xf32> -> vector<22x128xf32>
    %16 = arith.addf %10, %15 : vector<22x128xf32>
    %c0_20 = arith.constant 0 : index
    %c0_21 = arith.constant 0 : index
    %c3 = arith.constant 3 : index
    %c0_22 = arith.constant 0 : index
    %17 = vector.load %arg2[%c0_20, %c0_21, %c3, %c0_22] : memref<1x1x28x128xbf16, #tpu.memory_space<vmem>>, vector<1x1x22x128xbf16>
    %18 = vector.shape_cast %17 : vector<1x1x22x128xbf16> to vector<22x128xbf16>
    %c3_23 = arith.constant 3 : index
    %c0_24 = arith.constant 0 : index
    %c0_25 = arith.constant 0 : index
    %19 = vector.load %arg3[%c3_23, %c0_24, %c0_25] : memref<7x128x128xbf16, #tpu.memory_space<vmem>>, vector<1x128x128xbf16>
    %20 = vector.shape_cast %19 : vector<1x128x128xbf16> to vector<128x128xbf16>
    %cst_26 = arith.constant dense<0.000000e+00> : vector<22x128xf32>
    %21 = tpu.matmul %18, %20, %cst_26 {dimension_numbers = #tpu.dot_dimension_numbers<[1], [0], [0], [1], [0, 0, 1, 1], [], []>} : vector<22x128xbf16>, vector<128x128xbf16>, vector<22x128xf32> -> vector<22x128xf32>
    %22 = arith.addf %16, %21 : vector<22x128xf32>
    %c0_27 = arith.constant 0 : index
    %c0_28 = arith.constant 0 : index
    %c4 = arith.constant 4 : index
    %c0_29 = arith.constant 0 : index
    %23 = vector.load %arg2[%c0_27, %c0_28, %c4, %c0_29] : memref<1x1x28x128xbf16, #tpu.memory_space<vmem>>, vector<1x1x22x128xbf16>
    %24 = vector.shape_cast %23 : vector<1x1x22x128xbf16> to vector<22x128xbf16>
    %c4_30 = arith.constant 4 : index
    %c0_31 = arith.constant 0 : index
    %c0_32 = arith.constant 0 : index
    %25 = vector.load %arg3[%c4_30, %c0_31, %c0_32] : memref<7x128x128xbf16, #tpu.memory_space<vmem>>, vector<1x128x128xbf16>
    %26 = vector.shape_cast %25 : vector<1x128x128xbf16> to vector<128x128xbf16>
    %cst_33 = arith.constant dense<0.000000e+00> : vector<22x128xf32>
    %27 = tpu.matmul %24, %26, %cst_33 {dimension_numbers = #tpu.dot_dimension_numbers<[1], [0], [0], [1], [0, 0, 1, 1], [], []>} : vector<22x128xbf16>, vector<128x128xbf16>, vector<22x128xf32> -> vector<22x128xf32>
    %28 = arith.addf %22, %27 : vector<22x128xf32>
    %c0_34 = arith.constant 0 : index
    %c0_35 = arith.constant 0 : index
    %c5 = arith.constant 5 : index
    %c0_36 = arith.constant 0 : index
    %29 = vector.load %arg2[%c0_34, %c0_35, %c5, %c0_36] : memref<1x1x28x128xbf16, #tpu.memory_space<vmem>>, vector<1x1x22x128xbf16>
    %30 = vector.shape_cast %29 : vector<1x1x22x128xbf16> to vector<22x128xbf16>
    %c5_37 = arith.constant 5 : index
    %c0_38 = arith.constant 0 : index
    %c0_39 = arith.constant 0 : index
    %31 = vector.load %arg3[%c5_37, %c0_38, %c0_39] : memref<7x128x128xbf16, #tpu.memory_space<vmem>>, vector<1x128x128xbf16>
    %32 = vector.shape_cast %31 : vector<1x128x128xbf16> to vector<128x128xbf16>
    %cst_40 = arith.constant dense<0.000000e+00> : vector<22x128xf32>
    %33 = tpu.matmul %30, %32, %cst_40 {dimension_numbers = #tpu.dot_dimension_numbers<[1], [0], [0], [1], [0, 0, 1, 1], [], []>} : vector<22x128xbf16>, vector<128x128xbf16>, vector<22x128xf32> -> vector<22x128xf32>
    %34 = arith.addf %28, %33 : vector<22x128xf32>
    %c0_41 = arith.constant 0 : index
    %c0_42 = arith.constant 0 : index
    %c6 = arith.constant 6 : index
    %c0_43 = arith.constant 0 : index
    %35 = vector.load %arg2[%c0_41, %c0_42, %c6, %c0_43] : memref<1x1x28x128xbf16, #tpu.memory_space<vmem>>, vector<1x1x22x128xbf16>
    %36 = vector.shape_cast %35 : vector<1x1x22x128xbf16> to vector<22x128xbf16>
    %c6_44 = arith.constant 6 : index
    %c0_45 = arith.constant 0 : index
    %c0_46 = arith.constant 0 : index
    %37 = vector.load %arg3[%c6_44, %c0_45, %c0_46] : memref<7x128x128xbf16, #tpu.memory_space<vmem>>, vector<1x128x128xbf16>
    %38 = vector.shape_cast %37 : vector<1x128x128xbf16> to vector<128x128xbf16>
    %cst_47 = arith.constant dense<0.000000e+00> : vector<22x128xf32>
    %39 = tpu.matmul %36, %38, %cst_47 {dimension_numbers = #tpu.dot_dimension_numbers<[1], [0], [0], [1], [0, 0, 1, 1], [], []>} : vector<22x128xbf16>, vector<128x128xbf16>, vector<22x128xf32> -> vector<22x128xf32>
    %40 = arith.addf %34, %39 : vector<22x128xf32>
    %c0_48 = arith.constant 0 : index
    %c0_49 = arith.constant 0 : index
    %41 = vector.load %arg4[%c0_48, %c0_49] : memref<1x128xf32, #tpu.memory_space<vmem>>, vector<1x128xf32>
    %42 = vector.broadcast %41 : vector<1x128xf32> to vector<22x128xf32>
    %43 = arith.mulf %40, %42 : vector<22x128xf32>
    %c0_50 = arith.constant 0 : index
    %c0_51 = arith.constant 0 : index
    %44 = vector.load %arg5[%c0_50, %c0_51] : memref<1x128xf32, #tpu.memory_space<vmem>>, vector<1x128xf32>
    %45 = vector.broadcast %44 : vector<1x128xf32> to vector<22x128xf32>
    %46 = arith.addf %43, %45 : vector<22x128xf32>
    %cst_52 = arith.constant 0.000000e+00 : f32
    %47 = vector.broadcast %cst_52 : f32 to vector<22x128xf32>
    %48 = arith.maximumf %46, %47 : vector<22x128xf32>
    %49 = tpu.iota {dimensions = array<i32: 0>} : vector<22x128xi32>
    %c16_i32 = arith.constant 16 : i32
    %50 = arith.muli %arg1, %c16_i32 : i32
    %c3_i32 = arith.constant 3 : i32
    %51 = arith.subi %50, %c3_i32 : i32
    %52 = vector.broadcast %51 : i32 to vector<22x128xi32>
    %53 = arith.addi %52, %49 : vector<22x128xi32>
    %c0_i32 = arith.constant 0 : i32
    %54 = vector.broadcast %c0_i32 : i32 to vector<22x128xi32>
    %55 = arith.cmpi sge, %53, %54 : vector<22x128xi32>
    %c16_i32_53 = arith.constant 16 : i32
    %56 = vector.broadcast %c16_i32_53 : i32 to vector<22x128xi32>
    %57 = arith.cmpi slt, %53, %56 : vector<22x128xi32>
    %58 = arith.andi %55, %57 : vector<22x128xi1>
    %cst_54 = arith.constant 0.000000e+00 : f32
    %59 = vector.broadcast %cst_54 : f32 to vector<22x128xf32>
    %60 = arith.select %58, %48, %59 : vector<22x128xi1>, vector<22x128xf32>
    %61 = arith.truncf %60 : vector<22x128xf32> to vector<22x128xbf16>
    %c0_55 = arith.constant 0 : index
    %c0_56 = arith.constant 0 : index
    %62 = vector.load %arg10[%c0_55, %c0_56] : memref<22x128xbf16, #tpu.memory_space<vmem>>, vector<22x128xbf16>
    tpu.vector_store %arg10[%c0_55, %c0_56], %61 {strides = array<i32>} : memref<22x128xbf16, #tpu.memory_space<vmem>>, vector<22x128xbf16>,
    %c0_57 = arith.constant 0 : index
    %c0_58 = arith.constant 0 : index
    %63 = vector.load %arg10[%c0_57, %c0_58] : memref<22x128xbf16, #tpu.memory_space<vmem>>, vector<16x128xbf16>
    %c0_59 = arith.constant 0 : index
    %c0_60 = arith.constant 0 : index
    %c0_61 = arith.constant 0 : index
    %64 = vector.load %arg6[%c0_59, %c0_60, %c0_61] : memref<7x128x128xbf16, #tpu.memory_space<vmem>>, vector<1x128x128xbf16>
    %65 = vector.shape_cast %64 : vector<1x128x128xbf16> to vector<128x128xbf16>
    %cst_62 = arith.constant dense<0.000000e+00> : vector<16x128xf32>
    %66 = tpu.matmul %63, %65, %cst_62 {dimension_numbers = #tpu.dot_dimension_numbers<[1], [0], [0], [1], [0, 0, 1, 1], [], []>} : vector<16x128xbf16>, vector<128x128xbf16>, vector<16x128xf32> -> vector<16x128xf32>
    %c1_63 = arith.constant 1 : index
    %c0_64 = arith.constant 0 : index
    %67 = vector.load %arg10[%c1_63, %c0_64] : memref<22x128xbf16, #tpu.memory_space<vmem>>, vector<16x128xbf16>
    %c1_65 = arith.constant 1 : index
    %c0_66 = arith.constant 0 : index
    %c0_67 = arith.constant 0 : index
    %68 = vector.load %arg6[%c1_65, %c0_66, %c0_67] : memref<7x128x128xbf16, #tpu.memory_space<vmem>>, vector<1x128x128xbf16>
    %69 = vector.shape_cast %68 : vector<1x128x128xbf16> to vector<128x128xbf16>
    %cst_68 = arith.constant dense<0.000000e+00> : vector<16x128xf32>
    %70 = tpu.matmul %67, %69, %cst_68 {dimension_numbers = #tpu.dot_dimension_numbers<[1], [0], [0], [1], [0, 0, 1, 1], [], []>} : vector<16x128xbf16>, vector<128x128xbf16>, vector<16x128xf32> -> vector<16x128xf32>
    %71 = arith.addf %66, %70 : vector<16x128xf32>
    %c2_69 = arith.constant 2 : index
    %c0_70 = arith.constant 0 : index
    %72 = vector.load %arg10[%c2_69, %c0_70] : memref<22x128xbf16, #tpu.memory_space<vmem>>, vector<16x128xbf16>
    %c2_71 = arith.constant 2 : index
    %c0_72 = arith.constant 0 : index
    %c0_73 = arith.constant 0 : index
    %73 = vector.load %arg6[%c2_71, %c0_72, %c0_73] : memref<7x128x128xbf16, #tpu.memory_space<vmem>>, vector<1x128x128xbf16>
    %74 = vector.shape_cast %73 : vector<1x128x128xbf16> to vector<128x128xbf16>
    %cst_74 = arith.constant dense<0.000000e+00> : vector<16x128xf32>
    %75 = tpu.matmul %72, %74, %cst_74 {dimension_numbers = #tpu.dot_dimension_numbers<[1], [0], [0], [1], [0, 0, 1, 1], [], []>} : vector<16x128xbf16>, vector<128x128xbf16>, vector<16x128xf32> -> vector<16x128xf32>
    %76 = arith.addf %71, %75 : vector<16x128xf32>
    %c3_75 = arith.constant 3 : index
    %c0_76 = arith.constant 0 : index
    %77 = vector.load %arg10[%c3_75, %c0_76] : memref<22x128xbf16, #tpu.memory_space<vmem>>, vector<16x128xbf16>
    %c3_77 = arith.constant 3 : index
    %c0_78 = arith.constant 0 : index
    %c0_79 = arith.constant 0 : index
    %78 = vector.load %arg6[%c3_77, %c0_78, %c0_79] : memref<7x128x128xbf16, #tpu.memory_space<vmem>>, vector<1x128x128xbf16>
    %79 = vector.shape_cast %78 : vector<1x128x128xbf16> to vector<128x128xbf16>
    %cst_80 = arith.constant dense<0.000000e+00> : vector<16x128xf32>
    %80 = tpu.matmul %77, %79, %cst_80 {dimension_numbers = #tpu.dot_dimension_numbers<[1], [0], [0], [1], [0, 0, 1, 1], [], []>} : vector<16x128xbf16>, vector<128x128xbf16>, vector<16x128xf32> -> vector<16x128xf32>
    %81 = arith.addf %76, %80 : vector<16x128xf32>
    %c4_81 = arith.constant 4 : index
    %c0_82 = arith.constant 0 : index
    %82 = vector.load %arg10[%c4_81, %c0_82] : memref<22x128xbf16, #tpu.memory_space<vmem>>, vector<16x128xbf16>
    %c4_83 = arith.constant 4 : index
    %c0_84 = arith.constant 0 : index
    %c0_85 = arith.constant 0 : index
    %83 = vector.load %arg6[%c4_83, %c0_84, %c0_85] : memref<7x128x128xbf16, #tpu.memory_space<vmem>>, vector<1x128x128xbf16>
    %84 = vector.shape_cast %83 : vector<1x128x128xbf16> to vector<128x128xbf16>
    %cst_86 = arith.constant dense<0.000000e+00> : vector<16x128xf32>
    %85 = tpu.matmul %82, %84, %cst_86 {dimension_numbers = #tpu.dot_dimension_numbers<[1], [0], [0], [1], [0, 0, 1, 1], [], []>} : vector<16x128xbf16>, vector<128x128xbf16>, vector<16x128xf32> -> vector<16x128xf32>
    %86 = arith.addf %81, %85 : vector<16x128xf32>
    %c5_87 = arith.constant 5 : index
    %c0_88 = arith.constant 0 : index
    %87 = vector.load %arg10[%c5_87, %c0_88] : memref<22x128xbf16, #tpu.memory_space<vmem>>, vector<16x128xbf16>
    %c5_89 = arith.constant 5 : index
    %c0_90 = arith.constant 0 : index
    %c0_91 = arith.constant 0 : index
    %88 = vector.load %arg6[%c5_89, %c0_90, %c0_91] : memref<7x128x128xbf16, #tpu.memory_space<vmem>>, vector<1x128x128xbf16>
    %89 = vector.shape_cast %88 : vector<1x128x128xbf16> to vector<128x128xbf16>
    %cst_92 = arith.constant dense<0.000000e+00> : vector<16x128xf32>
    %90 = tpu.matmul %87, %89, %cst_92 {dimension_numbers = #tpu.dot_dimension_numbers<[1], [0], [0], [1], [0, 0, 1, 1], [], []>} : vector<16x128xbf16>, vector<128x128xbf16>, vector<16x128xf32> -> vector<16x128xf32>
    %91 = arith.addf %86, %90 : vector<16x128xf32>
    %c6_93 = arith.constant 6 : index
    %c0_94 = arith.constant 0 : index
    %92 = vector.load %arg10[%c6_93, %c0_94] : memref<22x128xbf16, #tpu.memory_space<vmem>>, vector<16x128xbf16>
    %c6_95 = arith.constant 6 : index
    %c0_96 = arith.constant 0 : index
    %c0_97 = arith.constant 0 : index
    %93 = vector.load %arg6[%c6_95, %c0_96, %c0_97] : memref<7x128x128xbf16, #tpu.memory_space<vmem>>, vector<1x128x128xbf16>
    %94 = vector.shape_cast %93 : vector<1x128x128xbf16> to vector<128x128xbf16>
    %cst_98 = arith.constant dense<0.000000e+00> : vector<16x128xf32>
    %95 = tpu.matmul %92, %94, %cst_98 {dimension_numbers = #tpu.dot_dimension_numbers<[1], [0], [0], [1], [0, 0, 1, 1], [], []>} : vector<16x128xbf16>, vector<128x128xbf16>, vector<16x128xf32> -> vector<16x128xf32>
    %96 = arith.addf %91, %95 : vector<16x128xf32>
    %c0_99 = arith.constant 0 : index
    %c0_100 = arith.constant 0 : index
    %97 = vector.load %arg7[%c0_99, %c0_100] : memref<1x128xf32, #tpu.memory_space<vmem>>, vector<1x128xf32>
    %98 = vector.broadcast %97 : vector<1x128xf32> to vector<16x128xf32>
    %99 = arith.mulf %96, %98 : vector<16x128xf32>
    %c0_101 = arith.constant 0 : index
    %c0_102 = arith.constant 0 : index
    %100 = vector.load %arg8[%c0_101, %c0_102] : memref<1x128xf32, #tpu.memory_space<vmem>>, vector<1x128xf32>
    %101 = vector.broadcast %100 : vector<1x128xf32> to vector<16x128xf32>
    %102 = arith.addf %99, %101 : vector<16x128xf32>
    %cst_103 = arith.constant 0.000000e+00 : f32
    %103 = vector.broadcast %cst_103 : f32 to vector<16x128xf32>
    %104 = arith.maximumf %102, %103 : vector<16x128xf32>
    %c0_104 = arith.constant 0 : index
    %c0_105 = arith.constant 0 : index
    %c6_106 = arith.constant 6 : index
    %c0_107 = arith.constant 0 : index
    %105 = vector.load %arg2[%c0_104, %c0_105, %c6_106, %c0_107] : memref<1x1x28x128xbf16, #tpu.memory_space<vmem>>, vector<1x1x16x128xbf16>
    %106 = vector.shape_cast %105 : vector<1x1x16x128xbf16> to vector<16x128xbf16>
    %107 = arith.extf %106 : vector<16x128xbf16> to vector<16x128xf32>
    %108 = arith.addf %104, %107 : vector<16x128xf32>
    %109 = arith.truncf %108 : vector<16x128xf32> to vector<16x128xbf16>
    %c0_108 = arith.constant 0 : index
    %c0_109 = arith.constant 0 : index
    %c0_110 = arith.constant 0 : index
    %110 = vector.load %arg9[%c0_108, %c0_109, %c0_110] : memref<1x16x128xbf16, #tpu.memory_space<vmem>>, vector<1x16x128xbf16>
    %111 = vector.shape_cast %110 : vector<1x16x128xbf16> to vector<16x128xbf16>
    %112 = vector.shape_cast %109 : vector<16x128xbf16> to vector<1x16x128xbf16>
    tpu.vector_store %arg9[%c0_108, %c0_109, %c0_110], %112 {strides = array<i32>} : memref<1x16x128xbf16, #tpu.memory_space<vmem>>, vector<1x16x128xbf16>,
    return
  }
  func.func @transform_0(%arg0: i32, %arg1: i32) -> (i32, i32, i32, i32) {
    %c0_i32 = arith.constant 0 : i32
    %c0_i32_0 = arith.constant 0 : i32
    %c0_i32_1 = arith.constant 0 : i32
    return %arg0, %arg1, %c0_i32, %c0_i32_0 : i32, i32, i32, i32
  }
  func.func @transform_1(%arg0: i32, %arg1: i32) -> (i32, i32, i32) {
    %c0_i32 = arith.constant 0 : i32
    %c0_i32_0 = arith.constant 0 : i32
    %c0_i32_1 = arith.constant 0 : i32
    %c0_i32_2 = arith.constant 0 : i32
    return %c0_i32, %c0_i32_0, %c0_i32_1 : i32, i32, i32
  }
  func.func @transform_2(%arg0: i32, %arg1: i32) -> (i32, i32) {
    %c0_i32 = arith.constant 0 : i32
    %c0_i32_0 = arith.constant 0 : i32
    %c0_i32_1 = arith.constant 0 : i32
    return %c0_i32, %c0_i32_0 : i32, i32
  }
  func.func @transform_3(%arg0: i32, %arg1: i32) -> (i32, i32) {
    %c0_i32 = arith.constant 0 : i32
    %c0_i32_0 = arith.constant 0 : i32
    %c0_i32_1 = arith.constant 0 : i32
    return %c0_i32, %c0_i32_0 : i32, i32
  }
  func.func @transform_4(%arg0: i32, %arg1: i32) -> (i32, i32, i32) {
    %c0_i32 = arith.constant 0 : i32
    %c0_i32_0 = arith.constant 0 : i32
    %c0_i32_1 = arith.constant 0 : i32
    %c0_i32_2 = arith.constant 0 : i32
    return %c0_i32, %c0_i32_0, %c0_i32_1 : i32, i32, i32
  }
  func.func @transform_5(%arg0: i32, %arg1: i32) -> (i32, i32) {
    %c0_i32 = arith.constant 0 : i32
    %c0_i32_0 = arith.constant 0 : i32
    %c0_i32_1 = arith.constant 0 : i32
    return %c0_i32, %c0_i32_0 : i32, i32
  }
  func.func @transform_6(%arg0: i32, %arg1: i32) -> (i32, i32) {
    %c0_i32 = arith.constant 0 : i32
    %c0_i32_0 = arith.constant 0 : i32
    %c0_i32_1 = arith.constant 0 : i32
    return %c0_i32, %c0_i32_0 : i32, i32
  }
  func.func @transform_7(%arg0: i32, %arg1: i32) -> (i32, i32, i32) {
    %c0_i32 = arith.constant 0 : i32
    %c0_i32_0 = arith.constant 0 : i32
    return %arg0, %arg1, %c0_i32 : i32, i32, i32
  }
}

</mosaic_0001>

<bundles_post_ra>
// kernel: tpu_custom_call.1
= control target key start
LH: loop header
LB: loop body
LE: loop exit
PB: predicated region body
PF: predicated region fallthrough
CT: control target
= control target key end

     0   :  { %12 = vsyncpa [#allocation4], 0  ;;  %s3641_s0 = inlined_call_operand.vmem [shape: bf16[2,1,28,128], index: 0, kind: input, shape index: {}]   ;;  %s3642_s1 = inlined_call_operand.hbm [shape: bf16[7,128,128], index: 1, kind: input, shape index: {}]   ;;  %s3643_s2 = inlined_call_operand.vmem [shape: f32[1,128], index: 2, kind: input, shape index: {}]   ;;  %s3644_s3 = inlined_call_operand.vmem [shape: f32[1,128], index: 3, kind: input, shape index: {}]   ;;  %s3645_s4 = inlined_call_operand.hbm [shape: bf16[7,128,128], index: 4, kind: input, shape index: {}]   ;;  %s3646_s5 = inlined_call_operand.vmem [shape: f32[1,128], index: 5, kind: input, shape index: {}]   ;;  %s3647_s6 = inlined_call_operand.vmem [shape: f32[1,128], index: 6, kind: input, shape index: {}]   ;;  %s3648_s7 = inlined_call_operand.hbm [shape: bf16[2,16,128], index: 7, kind: output, shape index: {}]  }
   0x1   :  { %13 = vsyncpa [#allocation7], 0 }
   0x2   :  { %14 = vsyncpa [#allocation5], 0 }
   0x3   :  { %16 = vsyncpa [#allocation5 + $0x1], 0  ;;  %s3320_s24 = smov 0   ;;  %s3322_s25 = smov 0  }
   0x4   :  { %s3324_s26 = smov 0   ;;  %s3326_s27 = smov 0  }
   0x5   :  { %s3328_s28 = smov 0   ;;  %s3330_s29 = smov 0  }
   0x6 LB: > { %s2339_s30 = sadd.s32 4294967295, %s3269_s29   ;;  %s2340_s8 = sadd.s32 4294967294, %s3269_s29   ;;  %s3269_s29 = sphi %s3330_s29, %s22_s29   ;;  %s3265_s28 = sphi %s3328_s28, %s3661_s28   ;;  %s3261_s27 = sphi %s3326_s27, %s3660_s27   ;;  %s3257_s26 = sphi %s3324_s26, %s3659_s26   ;;  %s3253_s25 = sphi %s3322_s25, %s3658_s25   ;;  %s3249_s24 = sphi %s3320_s24, %s3657_s24  }
   0x7   : > { %s34_s9 = sadd.s32 1, %s3265_s28  ;;  %s197_s10 = sadd.s32 1, %s3257_s26 }
   0x8   : > { %p36_p0 = scmp.ge.s32.totalorder %s34_s9, 2  ;;  %p207_p1 = scmp.ne.s32.totalorder %s3257_s26, %s3253_s25 }
   0x9   : > { %p208_p2 = scmp.eq.s32.totalorder %s2339_s30, 1  ;;  %p213_p3 = scmp.ne.s32.totalorder %s3253_s25, %s3249_s24 }
   0xa   : > { %s3663_s9 = smov (%p36_p0, %s34_s9), 0  ;;  %p214_p5 = scmp.eq.s32.totalorder %s2340_s8, 1 }
   0xb   : > { %p3360_p4 = por %p208_p2, %p207_p1  ;;  %s192_s12 = ssub.s32 %s3265_s28, %s3663_s9 }
   0xc   : > { %p2341_p6 = scmp.ge.s32.totalorder %s3269_s29, 1  ;;  %p195_p7 = scmp.eq.s32.totalorder %s192_s12, 0 }
   0xd   : > { %s3650_s11 = scalar_select %p3360_p4, 1, 0 }
   0xe   : > { %p3367_p8 = por %p214_p5, %p213_p3  ;;  %p221_p9 = scmp.lt.s32.totalorder %s3269_s29, 3 }
   0xf   : > { %s3373_s14 = scalar_select %p195_p7, %s3257_s26, %s197_s10  }
  0x10   : > { %s3651_s13 = scalar_select %p3367_p8, 1, 0 }
  0x11   : > { %p3375_p10 = pnand %p2341_p6, %p221_p9  ;;  %p3379_p11 = scmp.eq.s32.totalorder %s2339_s30, 0 }
  0x12   : > { %s3271_s17 = smov [#allocation3]   ;;  %s3272_s20 = smov [#allocation6]  }
  0x13   : > { %p2933_p12 = pneg %p3375_p10  ;;  %s233_s18 = sshll.u32 %s3271_s17, 4  ;;  %s234_s18 = int_to_ptr.vmem [resolvable:$true] %s233_s18 }
  0x14   : > { %s252_s21 = sshll.u32 %s3272_s20, 4  ;;  %s3144_s22 = scalar_lea.vmem %s234_s18, 7168  ;;  %s253_s21 = int_to_ptr.vmem [resolvable:$true] %s252_s21 }
  0x15   : > { %p3387_p13 = pnand %p3379_p11, %p2933_p12  ;;  %p3145_p1 = scmp.ne.s32.totalorder %s234_s18, %s3144_s22 }
  0x16   : > { %p3152_p5 = scmp.lt.s32.totalorder %s234_s18, %s234_s18  ;;  %p3153_p6 = scmp.lt.s32.totalorder %s3144_s22, %s3144_s22 }
  0x17   : > { %p3135_p0 = pneg %p3387_p13 }
  0x18   : > { %p3154_p7 = por %p3153_p6, %p3152_p5 }
  0x19   : > { %p3147_p2 = pnand %p3145_p1, %p3135_p0 }
  0x1b   : > { %p3148_p3 = pneg %p3147_p2 }
  0x1d   : > { %p3155_p9 = pnand %p3154_p7, %p3148_p3 }
  0x1f   : > { %3158 = shalt.err (!%p3155_p9)
}
  0x20   : > { %s3273_s23 = smov 64   ;;  %s3274_s30 = smov 4  }
  0x21   : > { %2936 = dma.hbm_to_vmem [thread:$0]  (!%p3387_p13), %s3642_s1, 7168, %s234_s18, [#allocation4], %s3273_s23, %s3273_s23, %s3274_s30  }
  0x22   : > { %s3170_s12 = scalar_lea.vmem %s253_s21, 7168  ;;  %p3178_p8 = scmp.lt.s32.totalorder %s253_s21, %s253_s21 }
  0x23   : > { %p3171_p12 = scmp.ne.s32.totalorder %s253_s21, %s3170_s12  ;;  %p3179_p4 = scmp.lt.s32.totalorder %s3170_s12, %s3170_s12 }
  0x25   : > { %p3173_p1 = pnand %p3171_p12, %p3135_p0  ;;  %p3180_p5 = por %p3179_p4, %p3178_p8 }
  0x27   : > { %p3174_p2 = pneg %p3173_p1 }
  0x29   : > { %p3181_p3 = pnand %p3180_p5, %p3174_p2 }
  0x2b   : > { %3184 = shalt.err (!%p3181_p3)
}
  0x2c   : > { %2939 = dma.hbm_to_vmem [thread:$0]  (!%p3387_p13), %s3645_s4, 7168, %s253_s21, [#allocation7], %s3273_s23, %s3273_s23, %s3274_s30  }
  0x2d   : > { %286 = sbr.rel (%p3375_p10) target bundleno = 727 (0x2d7), region = 48 }
  0x32   : > { %3236 = dma.done.wait (%p3379_p11), [#allocation4], 7168  }
  0x33   : > { %3238 = vsyncadd (%p3379_p11), [#allocation4], 4294960128 }
  0x34   : > { %3240 = dma.done.wait (%p3379_p11), [#allocation7], 7168  }
  0x35   : > { %3242 = vsyncadd (%p3379_p11), [#allocation7], 4294960128  ;;  %v3005_v0 = vld [vmem:[#allocation3 + $0x78] sm:$0xff]   ;;  %v3007_v2 = vld [vmem:[#allocation3 + $0x70] sm:$0xff]   ;;  %p326_p4 = scmp.lt.s32.totalorder %s3261_s27, 1  ;;  %vm618_vm1 = vcmask 1046528  }
  0x36   : > { %v3006_v1 = vld [vmem:[#allocation3 + $0x38] sm:$0xff]   ;;  %2643 = vmatprep.subr.bf16.mxu0 %v3005_v0  ;;  %v3008_v3 = vld [vmem:[#allocation3 + $0x30] sm:$0xff]   ;;  %v3009_v4 = vld [vmem:[#allocation3 + $0x68] sm:$0xff]   ;;  %vm382_vm0 = vsmask.f32 7424  ;;  %vm894_vm4 = vcmask 1045504  }
  0x37   : > { %2663 = vmatprep.subr.bf16.mxu1 %v3006_v1  ;;  %2644 = vmatpush3.bf16.msra.mxu0 %v3005_v0  ;;  %v3010_v5 = vld [vmem:[#allocation3 + $0x28] sm:$0xff]   ;;  %s327_s15 = scalar_select %p326_p4, %s3261_s27, 1  ;;  %v3011_v6 = vld [vmem:[#allocation3 + $0x60] sm:$0xff]   ;;  %v3013_v8 = vld [vmem:[#allocation3 + $0x58] sm:$0xff]   ;;  %vm754_vm2 = vsmask.f32 6400 }
  0x38   : > { %2664 = vmatpush3.bf16.msra.mxu1 %v3006_v1  ;;  %2645 = vmatprep.subr.bf16.mxu0 %v3007_v2  ;;  %v3012_v7 = vld [vmem:[#allocation3 + $0x20] sm:$0xff]   ;;  %v3014_v9 = vld [vmem:[#allocation3 + $0x18] sm:$0xff]   ;;  %v3015_v10 = vld [vmem:[#allocation3 + $0x50] sm:$0xff]   ;;  %vm1020_vm3 = vsmask.f32 5376  ;;  %vm1160_vm5 = vcmask 1044480  }
  0x39   : > { %2665 = vmatprep.subr.bf16.mxu1 %v3008_v3  ;;  %s2493_s16 = sshll.u32 %s327_s15, 4  ;;  %v3016_v11 = vld [vmem:[#allocation3 + $0x10] sm:$0xff]   ;;  %v3017_v19 = vld [vmem:[#allocation3 + $0x48] sm:$0xff]   ;;  %v3019_v24 = vld [vmem:[#allocation3 + $0x40] sm:$0xff]   ;;  %vm3276_vm6 = vmmov 0   ;;  %s323_s15 = sand.u32 1, %s3253_s25  }
  0x3a   : > { %s3424_s21 = scalar_lea.vmem %s3641_s0, %s2493_s16  ;;  %v3018_v20 = vld [vmem:[#allocation3 + $0x8] sm:$0xff]   ;;  %v3020_v25 = vld [vmem:[#allocation3] sm:$0xff]   ;;  %v3024_v28 = vld [vmem:[#allocation3 + $0xb8] sm:$0xff]   ;;  %s2348_s16 = sshll.u32 %s323_s15, 3  ;;  %vm2199_vm9 = vcmask 1041408  }
  0x3b   : > { %2646 = vmatpush3.bf16.msra.mxu0 %v3007_v2  ;;  %v337_v12 = vld [vmem:[%s3424_s21] sm:$0xf]  ;;  %v338_v13 = vld [vmem:[%s3424_s21 + $0x4] sm:$0xf]  ;;  %v3429_v15 = vld [vmem:[%s3424_s21 + $0x8] ss:$0 sps:$4 sm:$0xff]  }
  0x3c   : > { %2666 = vmatpush3.bf16.msra.mxu1 %v3008_v3  ;;  %2647 = vmatprep.subr.bf16.mxu0 %v3009_v4  ;;  %v2351_v14 = vcombine.low %v337_v12, %v338_v13  ;;  %v391_v18 = vshll.u32 %v3429_v15, 16  ;;  %v395_v27 = vshrl.u32 %v3429_v15, 16  ;;  %v3023_v29 = vld [vmem:[%s3424_s21 + $0x8] ss:$0 sps:$4 sm:$0x77]   ;;  %v3026_v32 = vld [vmem:[#allocation3 + $0xb0] sm:$0xff]  }
  0x3d   : > { %2667 = vmatprep.subr.bf16.mxu1 %v3010_v5  ;;  %v3025_v30 = vld [vmem:[#allocation3 + $0xf8] sm:$0xff]   ;;  %v3027_v33 = vld [vmem:[#allocation3 + $0xf0] sm:$0xff]   ;;  %v3028_v35 = vld [vmem:[#allocation3 + $0xa8] sm:$0xff]   ;;  %v620_v37 = vrot.slane %v3429_v15, 1  ;;  %s2499_s18 = sshll.u32 %s3261_s27, 7  ;;  %s325_s19 = scalar_lea.vmem [#allocation8], %s2348_s16 }
  0x3e   : > { %v384_v16 = vshrl.u32 %v2351_v14, 16  ;;  %v386_v17 = vshll.u32 %v2351_v14, 16  ;;  %2679 = vmatprep.mubr.bf16.mxu1 %v2351_v14  ;;  %v393_v22 = vrot.slane %v391_v18, 1  ;;  %v597_v34 = vld [vmem:[%s3424_s21] sm:$0xe]  ;;  %v3029_v41 = vld [vmem:[#allocation3 + $0xe8] sm:$0xff]   ;;  %s3592_s30 = scalar_lea.hbm %s3648_s7, %s2499_s18 }
  0x3f   : > { %2648 = vmatpush3.bf16.msra.mxu0 %v3009_v4  ;;  %v2370_v36 = vcombine.low %v597_v34, %v338_v13  ;;  %v723_v38 = vld [vmem:[%s3424_s21] sm:$0xe]  ;;  %v3439_v39 = vld [vmem:[%s3424_s21 + $0x4] sm:$0xf]  ;;  %v725_v40 = vld [vmem:[%s3424_s21 + $0x8] sm:$0xf] }
  0x40   : > { %2668 = vmatpush3.bf16.msra.mxu1 %v3010_v5  ;;  %2649 = vmatprep.subr.bf16.mxu0 %v3011_v6  ;;  %v388_v21 = vrot.slane %v386_v17, 1  ;;  %v397_v31 = vor.u32 %v395_v27, %v393_v22  ;;  %v726_v43 = vld [vmem:[%s3424_s21 + $0xc] sm:$0x1]  ;;  %v2379_v44 = vcombine.low %v723_v38, %v3439_v39  ;;  %v3032_v58 = vld [vmem:[#allocation3 + $0x98] sm:$0xff]   ;;  %v3034_v62 = vld [vmem:[#allocation3 + $0x90] sm:$0xff]   ;;  %s3596_s8 = scalar_lea.sflag [#allocation5], %s323_s15 }
  0x41   : > { %2669 = vmatprep.subr.bf16.mxu1 %v3012_v7  ;;  %v619_v42 = vrot.slane %v2370_v36, 1  ;;  %v3444_v45 = vcombine.low %v725_v40, %v726_v43  ;;  %v3030_v46 = vld [vmem:[#allocation3 + $0xa0] sm:$0xff]   ;;  %v3033_v60 = vld [vmem:[#allocation3 + $0xd8] sm:$0xff]   ;;  %v3035_v63 = vld [vmem:[#allocation3 + $0xd0] sm:$0xff]   ;;  %p3655_p10 = scmp.ne.s32.totalorder %s3650_s11, 0  ;;  %s3277_s27 = smov [#allocation8]  }
  0x42   : > { %v389_v23 = vor.u32 %v388_v21, %v384_v16  ;;  %v756_v48 = vshrl.u32 %v2379_v44, 16  ;;  %v759_v49 = vshll.u32 %v2379_v44, 16  ;;  %v3031_v52 = vld [vmem:[#allocation3 + $0xe0] sm:$0xff]   ;;  %v3036_v0 = vld [vmem:[#allocation3 + $0x88] sm:$0xff]   ;;  %v873_v2 = vld [vmem:[%s3424_s21] sm:$0xc] }
  0x43   : > { %2650 = vmatpush3.bf16.msra.mxu0 %v3011_v6  ;;  %v621_v47 = vsel %vm618_vm1, %v619_v42, %v620_v37  ;;  %v764_v50 = vshrl.u32 %v3444_v45, 16  ;;  %v767_v51 = vshll.u32 %v3444_v45, 16  ;;  %v3037_v1 = vld [vmem:[#allocation3 + $0xc8] sm:$0xff]   ;;  %v2389_v3 = vcombine.low %v873_v2, %v3439_v39  ;;  %v999_v4 = vld [vmem:[%s3424_s21 + $0xc] sm:$0x3]  ;;  %v3041_v17 = vld [vmem:[#allocation3 + $0x138] sm:$0xff]  }
  0x44   : > { %2670 = vmatpush3.bf16.msra.mxu1 %v3012_v7  ;;  %2651 = vmatprep.subr.bf16.mxu0 %v3013_v8  ;;  %v394_v26 = vsel %vm382_vm0, %v389_v23, %v393_v22  ;;  %v758_v53 = vrot.slane %v756_v48, 1  ;;  %v761_v54 = vrot.slane %v759_v49, 2  ;;  %v3455_v5 = vcombine.low %v725_v40, %v999_v4  ;;  %v3038_v6 = vld [vmem:[#allocation3 + $0x80] sm:$0xff]   ;;  %v3044_v18 = vld [vmem:[#allocation3 + $0x178] sm:$0xff]   ;;  %v1139_v22 = vld [vmem:[%s3424_s21] sm:$0x8] }
  0x45   : > { %2671 = vmatprep.subr.bf16.mxu1 %v3014_v9  ;;  %2659 = vmatprep.mubr.bf16.mxu0 %v394_v26  ;;  %v766_v55 = vrot.slane %v764_v50, 1  ;;  %v769_v56 = vrot.slane %v767_v51, 2  ;;  %v3039_v7 = vld [vmem:[#allocation3 + $0xc0] sm:$0xff]   ;;  %v896_v21 = vrot.slane %v3444_v45, 2  ;;  %v3046_v23 = vld [vmem:[#allocation3 + $0x170] sm:$0xff]   ;;  %v2407_v26 = vcombine.low %v1139_v22, %v3439_v39  ;;  %v3051_v15 = vld [vmem:[#allocation3 + $0x118] sm:$0xff]  }
  0x46   : > { %v762_v57 = vor.u32 %v761_v54, %v758_v53  ;;  %v3050_v34 = vld [vmem:[#allocation3 + $0x160] sm:$0xff]   ;;  %v3053_v36 = vld [vmem:[#allocation3 + $0x110] sm:$0xff]   ;;  %v3055_v38 = vld [vmem:[#allocation3 + $0x108] sm:$0xff]   ;;  %s3189_s12 = sshll.u32 %s3277_s27, 4  ;;  %s3190_s12 = int_to_ptr.vmem [resolvable:$false] %s3189_s12 }
  0x47   : > { %2652 = vmatpush3.bf16.msra.mxu0 %v3013_v8  ;;  %v770_v59 = vor.u32 %v769_v56, %v766_v55  ;;  %v1022_v8 = vshrl.u32 %v2389_v3, 16  ;;  %v1161_v27 = vrot.slane %v2407_v26, 3  ;;  %v3056_v39 = vld [vmem:[#allocation3 + $0x148] sm:$0xff]   ;;  %v3057_v40 = vld [vmem:[#allocation3 + $0x100] sm:$0xff]   ;;  %v3060_v42 = vld [vmem:[#allocation3 + $0x1b8] sm:$0xff]   ;;  %s3191_s17 = scalar_lea.vmem %s3190_s12, 256 }
  0x48   : > { %2672 = vmatpush3.bf16.msra.mxu1 %v3014_v9  ;;  %2653 = vmatprep.subr.bf16.mxu0 %v3015_v10  ;;  %v1025_v9 = vshll.u32 %v2389_v3, 16  ;;  %v3062_v43 = vld [vmem:[#allocation3 + $0x1b0] sm:$0xff]   ;;  %v3065_v48 = vld [vmem:[#allocation3 + $0x198] sm:$0xff]   ;;  %v3067_v50 = vld [vmem:[#allocation3 + $0x188] sm:$0xff]  }
  0x49   : > { %2673 = vmatprep.subr.bf16.mxu1 %v3016_v11  ;;  %v771_v61 = vsel %vm754_vm2, %v762_v57, %v770_v59  ;;  %v1024_v12 = vrot.slane %v1022_v8, 2  ;;  %v3066_v49 = vld [vmem:[#allocation3 + $0x190] sm:$0xff]   ;;  %v3068_v45 = vld [vmem:[#allocation3 + $0x180] sm:$0xff]   ;;  %v3070_v51 = vld [vmem:[#allocation6 + $0x38] sm:$0xff]  }
  0x4a   : > { %v1027_v13 = vrot.slane %v1025_v9, 3  ;;  %v3071_v53 = vld [vmem:[#allocation6 + $0x30] sm:$0xff]   ;;  %v3072_v54 = vld [vmem:[#allocation6 + $0x78] sm:$0xff]   ;;  %v3073_v55 = vld [vmem:[#allocation6 + $0x28] sm:$0xff]  }
  0x4b   : > { %2654 = vmatpush3.bf16.msra.mxu0 %v3015_v10  ;;  %v1030_v10 = vshrl.u32 %v3455_v5, 16  ;;  %v3074_v56 = vld [vmem:[#allocation6 + $0x70] sm:$0xff]   ;;  %v3075_v57 = vld [vmem:[#allocation6 + $0x20] sm:$0xff]   ;;  %v3084_v2 = vld [vmem:[#allocation6 + $0x48] sm:$0xff]  }
  0x4c   : > { %2674 = vmatpush3.bf16.msra.mxu1 %v3016_v11  ;;  %2655 = vmatprep.subr.bf16.mxu0 %v3017_v19  ;;  %v1033_v11 = vshll.u32 %v3455_v5, 16 }
  0x4d   : > { %2675 = vmatprep.subr.bf16.mxu1 %v3018_v20  ;;  %v1032_v14 = vrot.slane %v1030_v10, 2 }
  0x4e   : > { %v1035_v16 = vrot.slane %v1033_v11, 3 }
  0x4f   : > { %2656 = vmatpush3.bf16.msra.mxu0 %v3017_v19  ;;  %v3045_v19 = vld [vmem:[#allocation3 + $0x130] sm:$0xff]  }
  0x50   : > { %2676 = vmatpush3.bf16.msra.mxu1 %v3018_v20  ;;  %2657 = vmatprep.subr.bf16.mxu0 %v3019_v24  ;;  %v895_v20 = vrot.slane %v2389_v3, 2  ;;  %v3087_v3 = vld [vmem:[#allocation6 + $0x40] sm:$0xff]  }
  0x51   : > { %2677 = vmatprep.subr.bf16.mxu1 %v3020_v25 }
  0x53   : > { %2658 = vmatpush3.bf16.msra.mxu0 %v3019_v24  ;;  %v1028_v24 = vor.u32 %v1027_v13, %v1024_v12 }
  0x54   : > { %2678 = vmatpush3.bf16.msra.mxu1 %v3020_v25  ;;  %2683 = vmatprep.subr.bf16.mxu0 %v3024_v28  ;;  %v1036_v25 = vor.u32 %v1035_v16, %v1032_v14 }
  0x55   : > { %2703 = vmatprep.subr.bf16.mxu1 %v3025_v30 }
  0x56   : > { %2660 = vmatmul.mubr.bf16.vlgmr.msra.gmra.mxu0 %v397_v31  ;;  %v3048_v31 = vld [vmem:[#allocation3 + $0x168] sm:$0xff]  }
  0x57   : > { %2680 = vmatmul.mubr.bf16.vlgmr.msra.gmra.mxu1 %v3023_v29  ;;  %2684 = vmatpush3.bf16.msra.mxu0 %v3024_v28  ;;  %v1162_v28 = vrot.slane %v3455_v5, 3  ;;  %v3047_v29 = vld [vmem:[#allocation3 + $0x128] sm:$0xff]  }
  0x58   : > { %2704 = vmatpush3.bf16.msra.mxu1 %v3025_v30  ;;  %2685 = vmatprep.subr.bf16.mxu0 %v3026_v32  ;;  %v897_v30 = vsel %vm894_vm4, %v895_v20, %v896_v21 }
  0x59   : > { %2705 = vmatprep.subr.bf16.mxu1 %v3027_v33  ;;  %2699 = vmatprep.mubr.bf16.mxu0 %v621_v47  ;;  %v1163_v44 = vsel %vm1160_vm5, %v1161_v27, %v1162_v28  ;;  %v3064_v47 = vld [vmem:[#allocation3 + $0x1a0] sm:$0xff]  }
  0x5a   : > { %2719 = vmatprep.mubr.bf16.mxu1 %v771_v61  ;;  %v3079_v61 = vld [vmem:[#allocation6 + $0x10] sm:$0xff]  }
  0x5b   : > { %2686 = vmatpush3.bf16.msra.mxu0 %v3026_v32  ;;  %v1037_v32 = vsel %vm1020_vm3, %v1028_v24, %v1036_v25 }
  0x5c   : > { %2706 = vmatpush3.bf16.msra.mxu1 %v3027_v33  ;;  %2687 = vmatprep.subr.bf16.mxu0 %v3028_v35  ;;  %v3049_v33 = vld [vmem:[#allocation3 + $0x120] sm:$0xff]  }
  0x5d   : > { %2707 = vmatprep.subr.bf16.mxu1 %v3029_v41 }
  0x5f   : > { %2688 = vmatpush3.bf16.msra.mxu0 %v3028_v35  ;;  %v3052_v35 = vld [vmem:[#allocation3 + $0x158] sm:$0xff]  }
  0x60   : > { %2708 = vmatpush3.bf16.msra.mxu1 %v3029_v41  ;;  %2689 = vmatprep.subr.bf16.mxu0 %v3030_v46  ;;  %v3058_v41 = vld [vmem:[#allocation3 + $0x140] sm:$0xff]  }
  0x61   : > { %2709 = vmatprep.subr.bf16.mxu1 %v3031_v52 }
  0x63   : > { %2690 = vmatpush3.bf16.msra.mxu0 %v3030_v46  ;;  %v3063_v46 = vld [vmem:[#allocation3 + $0x1a8] sm:$0xff]  }
  0x64   : > { %2710 = vmatpush3.bf16.msra.mxu1 %v3031_v52  ;;  %2691 = vmatprep.subr.bf16.mxu0 %v3032_v58  ;;  %v3275_v52 = vmov 0.0  }
  0x65   : > { %2711 = vmatprep.subr.bf16.mxu1 %v3033_v60 }
  0x67   : > { %2692 = vmatpush3.bf16.msra.mxu0 %v3032_v58  ;;  %v3076_v58 = vld [vmem:[#allocation6 + $0x68] sm:$0xff]  }
  0x68   : > { %2712 = vmatpush3.bf16.msra.mxu1 %v3033_v60  ;;  %2693 = vmatprep.subr.bf16.mxu0 %v3034_v62  ;;  %v3078_v60 = vld [vmem:[#allocation6 + $0x60] sm:$0xff]  }
  0x69   : > { %2713 = vmatprep.subr.bf16.mxu1 %v3035_v63 }
  0x6b   : > { %2694 = vmatpush3.bf16.msra.mxu0 %v3034_v62  ;;  %v3080_v62 = vld [vmem:[#allocation6 + $0x58] sm:$0xff]  }
  0x6c   : > { %2714 = vmatpush3.bf16.msra.mxu1 %v3035_v63  ;;  %2695 = vmatprep.subr.bf16.mxu0 %v3036_v0  ;;  %v3081_v63 = vld [vmem:[#allocation6 + $0x8] sm:$0xff]  }
  0x6d   : > { %2715 = vmatprep.subr.bf16.mxu1 %v3037_v1 }
  0x6f   : > { %2696 = vmatpush3.bf16.msra.mxu0 %v3036_v0  ;;  %v3082_v0 = vld [vmem:[#allocation6 + $0x50] sm:$0xff]  }
  0x70   : > { %2716 = vmatpush3.bf16.msra.mxu1 %v3037_v1  ;;  %2697 = vmatprep.subr.bf16.mxu0 %v3038_v6  ;;  %v3083_v1 = vld [vmem:[#allocation6] sm:$0xff]  }
  0x71   : > { %2717 = vmatprep.subr.bf16.mxu1 %v3039_v7 }
  0x73   : > { %2698 = vmatpush3.bf16.msra.mxu0 %v3038_v6 }
  0x74   : > { %2718 = vmatpush3.bf16.msra.mxu1 %v3039_v7  ;;  %2723 = vmatprep.subr.bf16.mxu0 %v3041_v17 }
  0x75   : > { %2743 = vmatprep.subr.bf16.mxu1 %v3044_v18 }
  0x76   : > { %2700 = vmatmul.mubr.bf16.vlgmr.msra.gmra.mxu0 %v620_v37  ;;  %v3054_v37 = vld [vmem:[#allocation3 + $0x150] sm:$0xff]  }
  0x77   : > { %2724 = vmatpush3.bf16.msra.mxu0 %v3041_v17  ;;  %2720 = vmatmul.mubr.bf16.vlgmr.msra.gmra.mxu1 %v770_v59  ;;  %v3077_v59 = vld [vmem:[#allocation6 + $0x18] sm:$0xff]  }
  0x78   : > { %2744 = vmatpush3.bf16.msra.mxu1 %v3044_v18  ;;  %2725 = vmatprep.subr.bf16.mxu0 %v3045_v19 }
  0x79   : > { %2745 = vmatprep.subr.bf16.mxu1 %v3046_v23  ;;  %2739 = vmatprep.mubr.bf16.mxu0 %v897_v30  ;;  %v1288_v30 = vlaneseq }
  0x7a   : > { %2759 = vmatprep.mubr.bf16.mxu1 %v1037_v32 }
  0x7b   : > { %2726 = vmatpush3.bf16.msra.mxu0 %v3045_v19 }
  0x7c   : > { %2746 = vmatpush3.bf16.msra.mxu1 %v3046_v23  ;;  %2727 = vmatprep.subr.bf16.mxu0 %v3047_v29 }
  0x7d   : > { %2747 = vmatprep.subr.bf16.mxu1 %v3048_v31 }
  0x7f   : > { %2728 = vmatpush3.bf16.msra.mxu0 %v3047_v29 }
  0x80   : > { %2748 = vmatpush3.bf16.msra.mxu1 %v3048_v31  ;;  %2729 = vmatprep.subr.bf16.mxu0 %v3049_v33 }
  0x81   : > { %2749 = vmatprep.subr.bf16.mxu1 %v3050_v34 }
  0x83   : > { %2730 = vmatpush3.bf16.msra.mxu0 %v3049_v33 }
  0x84   : > { %2750 = vmatpush3.bf16.msra.mxu1 %v3050_v34  ;;  %2731 = vmatprep.subr.bf16.mxu0 %v3051_v15  ;;  %v1289_v34 = vshrl.u32 %v1288_v30, 7  ;;  %v3097_v30 = vld [vmem:[#allocation6 + $0xd0] sm:$0xff]  }
  0x85   : > { %2751 = vmatprep.subr.bf16.mxu1 %v3052_v35 }
  0x87   : > { %2732 = vmatpush3.bf16.msra.mxu0 %v3051_v15 }
  0x88   : > { %2752 = vmatpush3.bf16.msra.mxu1 %v3052_v35  ;;  %2733 = vmatprep.subr.bf16.mxu0 %v3053_v36 }
  0x89   : > { %2753 = vmatprep.subr.bf16.mxu1 %v3054_v37 }
  0x8b   : > { %2734 = vmatpush3.bf16.msra.mxu0 %v3053_v36 }
  0x8c   : > { %2754 = vmatpush3.bf16.msra.mxu1 %v3054_v37  ;;  %2735 = vmatprep.subr.bf16.mxu0 %v3055_v38 }
  0x8d   : > { %2755 = vmatprep.subr.bf16.mxu1 %v3056_v39 }
  0x8f   : > { %2736 = vmatpush3.bf16.msra.mxu0 %v3055_v38 }
  0x90   : > { %2756 = vmatpush3.bf16.msra.mxu1 %v3056_v39  ;;  %2737 = vmatprep.subr.bf16.mxu0 %v3057_v40  ;;  %v1291_v39 = vadd.s32 16, %v1289_v34 }
  0x91   : > { %2757 = vmatprep.subr.bf16.mxu1 %v3058_v41 }
  0x93   : > { %2738 = vmatpush3.bf16.msra.mxu0 %v3057_v40 }
  0x94   : > { %2758 = vmatpush3.bf16.msra.mxu1 %v3058_v41  ;;  %2763 = vmatprep.subr.bf16.mxu0 %v3060_v42 }
  0x95   : > { %2783 = vmatprep.subr.bf16.mxu1 %v3275_v52 }
  0x96   : > { %2740 = vmatmul.mubr.bf16.vlgmr.msra.gmra.mxu0 %v896_v21 }
  0x97   : > { %2764 = vmatpush3.bf16.msra.mxu0 %v3060_v42  ;;  %2760 = vmatmul.mubr.bf16.vlgmr.msra.gmra.mxu1 %v1036_v25 }
  0x98   : > { %2765 = vmatprep.subr.bf16.mxu0 %v3062_v43  ;;  %2779 = vmatprep.mubr.bf16.mxu0 %v1163_v44 }
  0x99   : > { %2784 = vmatpush3.bf16.msra.mxu1 %v3072_v54  ;;  %2799 = vmatprep.mubr.msk.bf16.mxu1 %vm3276_vm6, %v3275_v52 }
  0x9a   : > { %2785 = vmatprep.subr.bf16.mxu1 %v3275_v52 }
  0x9b   : > { %2766 = vmatpush3.bf16.msra.mxu0 %v3062_v43  ;;  %v2416_v43 = vld [vmem:[%s3643_s2] ss:$0 sm:$0xff] }
  0x9c   : > { %2767 = vmatprep.subr.bf16.mxu0 %v3063_v46 }
  0x9d   : > { %2786 = vmatpush3.bf16.msra.mxu1 %v3074_v56 }
  0x9e   : > { %2787 = vmatprep.subr.bf16.mxu1 %v3275_v52 }
  0x9f   : > { %2768 = vmatpush3.bf16.msra.mxu0 %v3063_v46 }
  0xa0   : > { %2769 = vmatprep.subr.bf16.mxu0 %v3064_v47 }
  0xa1   : > { %2788 = vmatpush3.bf16.msra.mxu1 %v3076_v58 }
  0xa2   : > { %2789 = vmatprep.subr.bf16.mxu1 %v3275_v52 }
  0xa3   : > { %2770 = vmatpush3.bf16.msra.mxu0 %v3064_v47 }
  0xa4   : > { %2771 = vmatprep.subr.bf16.mxu0 %v3065_v48 }
  0xa5   : > { %2790 = vmatpush3.bf16.msra.mxu1 %v3078_v60 }
  0xa6   : > { %2791 = vmatprep.subr.bf16.mxu1 %v3275_v52 }
  0xa7   : > { %2772 = vmatpush3.bf16.msra.mxu0 %v3065_v48 }
  0xa8   : > { %2773 = vmatprep.subr.bf16.mxu0 %v3066_v49 }
  0xa9   : > { %2792 = vmatpush3.bf16.msra.mxu1 %v3080_v62 }
  0xaa   : > { %2793 = vmatprep.subr.bf16.mxu1 %v3275_v52 }
  0xab   : > { %2774 = vmatpush3.bf16.msra.mxu0 %v3066_v49  ;;  %v2417_v49 = vld [vmem:[%s3644_s3] ss:$0 sm:$0xff] }
  0xac   : > { %2775 = vmatprep.subr.bf16.mxu0 %v3067_v50 }
  0xad   : > { %2794 = vmatpush3.bf16.msra.mxu1 %v3082_v0 }
  0xae   : > { %2795 = vmatprep.subr.bf16.mxu1 %v3275_v52 }
  0xaf   : > { %2776 = vmatpush3.bf16.msra.mxu0 %v3067_v50  ;;  %v1297_v50 = vadd.s32 4294967293, %v1291_v39  ;;  %v3100_v39 = vld [vmem:[#allocation6 + $0x90] sm:$0xff]  }
  0xb0   : > { %2777 = vmatprep.subr.bf16.mxu0 %v3068_v45 }
  0xb1   : > { %2796 = vmatpush3.bf16.msra.mxu1 %v3084_v2  ;;  %vm1303_vm7 = vcmp.lt.s32.totalorder %v1297_v50, 16  ;;  %v3107_v50 = vld [vmem:[#allocation6 + $0x170] sm:$0xff]  }
  0xb2   : > { %2797 = vmatprep.subr.bf16.mxu1 %v3275_v52 }
  0xb3   : > { %2778 = vmatpush3.bf16.msra.mxu0 %v3068_v45 }
  0xb4   : > { %2803 = vmatprep.subr.bf16.mxu0 %v3275_v52 }
  0xb5   : > { %2798 = vmatpush3.bf16.msra.mxu1 %v3087_v3 }
  0xb6   : > { %2780 = vmatmul.mubr.bf16.vlgmr.msra.gmra.mxu0 %v1162_v28  ;;  %2823 = vmatprep.subr.bf16.mxu1 %v3275_v52 }
  0xb7   : > { %2804 = vmatpush3.bf16.msra.mxu0 %v3070_v51  ;;  %2819 = vmatprep.mubr.msk.bf16.mxu0 %vm3276_vm6, %v3275_v52 }
  0xb8   : > { %2805 = vmatprep.subr.bf16.mxu0 %v3275_v52 }
  0xbb   : > { %2806 = vmatpush3.bf16.msra.mxu0 %v3071_v53 }
  0xbc   : > { %2807 = vmatprep.subr.bf16.mxu0 %v3275_v52 }
  0xbf   : > { %2808 = vmatpush3.bf16.msra.mxu0 %v3073_v55 }
  0xc0   : > { %2809 = vmatprep.subr.bf16.mxu0 %v3275_v52 }
  0xc3   : > { %2810 = vmatpush3.bf16.msra.mxu0 %v3075_v57 }
  0xc4   : > { %2811 = vmatprep.subr.bf16.mxu0 %v3275_v52 }
  0xc7   : > { %2812 = vmatpush3.bf16.msra.mxu0 %v3077_v59 }
  0xc8   : > { %2813 = vmatprep.subr.bf16.mxu0 %v3275_v52 }
  0xcb   : > { %2814 = vmatpush3.bf16.msra.mxu0 %v3079_v61  ;;  %v1295_v61 = vadd.s32 4294967293, %v1289_v34  ;;  %v3098_v34 = vld [vmem:[#allocation6 + $0x98] sm:$0xff]  }
  0xcc   : > { %2815 = vmatprep.subr.bf16.mxu0 %v3275_v52 }
  0xcd   : > { %vm1298_vm8 = vcmp.ge.s32.totalorder %v1295_v61, 0 }
  0xcf   : > { %2816 = vmatpush3.bf16.msra.mxu0 %v3081_v63 }
  0xd0   : > { %2817 = vmatprep.subr.bf16.mxu0 %v3275_v52 }
  0xd3   : > { %2818 = vmatpush3.bf16.msra.mxu0 %v3083_v1 }
  0xd4   : > { %2843 = vmatprep.subr.bf16.mxu0 %v3275_v52 }
 0x116   : > { %v2661_v4 = vpop.f32.mrf.mxu0 }
 0x117   : > { %v2681_v5 = vpop.f32.mrf.mxu1 }
 0x118   : > { %v592_v6 = vadd.f32 %v2681_v5, %v2661_v4  ;;  %v482_v7 = vpop.f32.mrf.mxu0 }
 0x119   : > { %v583_v8 = vpop.f32.mrf.mxu1 }
 0x11a   : > { %v584_v9 = vadd.f32 %v583_v8, %v482_v7  ;;  %v2662_v10 = vpop.f32.mrf.mxu0 }
 0x11b   : > { %v2682_v11 = vpop.f32.mrf.mxu1  ;;  %v3086_v10 = vld [vmem:[#allocation6 + $0xf8] sm:$0xff]  }
 0x11c   : > { %v485_v12 = vpop.f32.mrf.mxu0 }
 0x11d   : > { %v586_v13 = vpop.f32.mrf.mxu1 }
 0x11e   : > { %v587_v32 = vadd.f32 %v586_v13, %v485_v12 }
 0x136   : > { %v2701_v14 = vpop.f32.mrf.mxu0 }
 0x137   : > { %v2721_v16 = vpop.f32.mrf.mxu1  ;;  %v722_v29 = vadd.f32 %v2701_v14, %v592_v6  ;;  %v3088_v14 = vld [vmem:[#allocation6 + $0xf0] sm:$0xff]  }
 0x138   : > { %v706_v17 = vpop.f32.mrf.mxu0 }
 0x139   : > { %v856_v18 = vpop.f32.mrf.mxu1  ;;  %v720_v31 = vadd.f32 %v706_v17, %v584_v9  ;;  %v872_v33 = vadd.f32 %v2721_v16, %v722_v29  ;;  %v3096_v29 = vld [vmem:[#allocation6 + $0xa0] sm:$0xff]  }
 0x13a   : > { %v2702_v19 = vpop.f32.mrf.mxu0 }
 0x13b   : > { %v2722_v20 = vpop.f32.mrf.mxu1  ;;  %v870_v15 = vadd.f32 %v856_v18, %v720_v31 }
 0x13c   : > { %v709_v21 = vpop.f32.mrf.mxu0  ;;  %v3090_v20 = vld [vmem:[#allocation6 + $0xb8] sm:$0xff]  }
 0x13d   : > { %v859_v22 = vpop.f32.mrf.mxu1  ;;  %v721_v35 = vadd.f32 %v709_v21, %v587_v32  ;;  %v3091_v21 = vld [vmem:[#allocation6 + $0xe8] sm:$0xff]  }
 0x13f   : > { %v871_v40 = vadd.f32 %v859_v22, %v721_v35 }
 0x156   : > { %v2741_v23 = vpop.f32.mrf.mxu0 }
 0x157   : > { %v2761_v24 = vpop.f32.mrf.mxu1  ;;  %v998_v36 = vadd.f32 %v2741_v23, %v872_v33  ;;  %v3092_v23 = vld [vmem:[#allocation6 + $0xb0] sm:$0xff]  }
 0x158   : > { %v982_v25 = vpop.f32.mrf.mxu0 }
 0x159   : > { %v1122_v26 = vpop.f32.mrf.mxu1  ;;  %v996_v37 = vadd.f32 %v982_v25, %v870_v15  ;;  %v1138_v41 = vadd.f32 %v2761_v24, %v998_v36  ;;  %v3093_v24 = vld [vmem:[#allocation6 + $0xe0] sm:$0xff]   ;;  %v3094_v25 = vld [vmem:[#allocation6 + $0xa8] sm:$0xff]  }
 0x15a   : > { %v2742_v27 = vpop.f32.mrf.mxu0  ;;  %v3099_v15 = vld [vmem:[#allocation6 + $0xc8] sm:$0xff]  }
 0x15b   : > { %v2762_v28 = vpop.f32.mrf.mxu1  ;;  %v1136_v44 = vadd.f32 %v1122_v26, %v996_v37  ;;  %v3095_v27 = vld [vmem:[#allocation6 + $0xd8] sm:$0xff]  }
 0x15c   : > { %v985_v38 = vpop.f32.mrf.mxu0 }
 0x15d   : > { %v997_v46 = vadd.f32 %v985_v38, %v871_v40  ;;  %v1125_v48 = vpop.f32.mrf.mxu1  ;;  %v3101_v40 = vld [vmem:[#allocation6 + $0xc0] sm:$0xff]  }
 0x15f   : > { %v1137_v55 = vadd.f32 %v1125_v48, %v997_v46 }
 0x176   : > { %v2781_v42 = vpop.f32.mrf.mxu0 }
 0x177   : > { %v1264_v47 = vadd.f32 %v2781_v42, %v1138_v41 }
 0x178   : > { %v1248_v45 = vpop.f32.mrf.mxu0 }
 0x179   : > { %v1274_v51 = vmul.f32 %v2416_v43, %v1264_v47  ;;  %v1262_v53 = vadd.f32 %v1248_v45, %v1136_v44  ;;  %v3102_v44 = vld [vmem:[#allocation6 + $0x88] sm:$0xff]   ;;  %v3105_v47 = vld [vmem:[#allocation6 + $0x178] sm:$0xff]  }
 0x17a   : > { %v2782_v54 = vpop.f32.mrf.mxu0 }
 0x17b   : > { %v1284_v56 = vadd.f32 %v2417_v49, %v1274_v51  ;;  %v1272_v57 = vmul.f32 %v2416_v43, %v1262_v53  ;;  %v3108_v53 = vld [vmem:[#allocation6 + $0x138] sm:$0xff]   ;;  %v3109_v54 = vld [vmem:[#allocation6 + $0x168] sm:$0xff]  }
 0x17c   : > { %v1251_v58 = vpop.f32.mrf.mxu0 }
 0x17d   : > { %v1287_v59 = vmax.f32 %v1284_v56, 0.0  ;;  %v1282_v60 = vadd.f32 %v2417_v49, %v1272_v57  ;;  %v1263_v62 = vadd.f32 %v1251_v58, %v1137_v55  ;;  %v3110_v56 = vld [vmem:[#allocation6 + $0x130] sm:$0xff]   ;;  %v3111_v57 = vld [vmem:[#allocation6 + $0x160] sm:$0xff]   ;;  %v3112_v58 = vld [vmem:[#allocation6 + $0x128] sm:$0xff]  }
 0x17f   : > { %v1309_v63 = vsel %vm1303_vm7, %v1287_v59, 0.0  ;;  %v1273_v0 = vmul.f32 %v2416_v43, %v1263_v62  ;;  %v1285_v2 = vmax.f32 %v1282_v60, 0.0  ;;  %v3113_v60 = vld [vmem:[#allocation6 + $0x158] sm:$0xff]   ;;  %v3114_v62 = vld [vmem:[#allocation6 + $0x120] sm:$0xff]  }
 0x180   : > { %v2496_v1 = vpack.c.bf16 %v1309_v63, %v1309_v63  ;;  %v3115_v63 = vld [vmem:[#allocation6 + $0x150] sm:$0xff]  }
 0x181   : > { %v1283_v3 = vadd.f32 %v2417_v49, %v1273_v0  ;;  %v1307_v5 = vsel %vm1298_vm8, %v1285_v2, 0.0  ;;  %v3106_v49 = vld [vmem:[#allocation6 + $0x80] sm:$0xff]  }
 0x182   : > { %1325 = vst [vmem:[#allocation2 + $0x8] sm:$0x7] %v2496_v1 }
 0x183   : > { %v1286_v4 = vmax.f32 %v1283_v3, 0.0  ;;  %v3116_v3 = vld [vmem:[#allocation6 + $0x118] sm:$0xff]  }
 0x185   : > { %v2503_v6 = vpack.c.bf16 %v1286_v4, %v1307_v5  ;;  %v3117_v4 = vld [vmem:[#allocation6 + $0x148] sm:$0xff]  }
 0x187   : > { %2504 = vst [vmem:[#allocation2] sm:$0xff] %v2503_v6  }
 0x189   : > { %v3504_v7 = vld [vmem:[#allocation2 + $0x8] ss:$0 sps:$4 sm:$0x11]  }
 0x18a   : > { %v1378_v13 = vshll.u32 %v3504_v7, 16  ;;  %v3523_v31 = vld [vmem:[#allocation2 + $0x8] ss:$0 sps:$4 sm:$0x33]   ;;  %v1584_v51 = vrot.slane %v3504_v7, 1 }
 0x18b   : > { %v1708_v35 = vshrl.u32 %v3523_v31, 16  ;;  %v1711_v36 = vshll.u32 %v3523_v31, 16  ;;  %v3551_v0 = vld [vmem:[#allocation2 + $0x8] ss:$0 sps:$4 sm:$0x77]  }
 0x18c   : > { %v1380_v19 = vrot.slane %v1378_v13, 1  ;;  %v1954_v5 = vshrl.u32 %v3551_v0, 16  ;;  %v1957_v6 = vshll.u32 %v3551_v0, 16 }
 0x18d   : > { %v1710_v41 = vrot.slane %v1708_v35, 1  ;;  %v1713_v42 = vrot.slane %v1711_v36, 2 }
 0x18e   : > { %v1326_v8 = vld [vmem:[#allocation2] sm:$0xf]  ;;  %v3506_v9 = vld [vmem:[#allocation2 + $0x4] sm:$0xf]  ;;  %v1959_v13 = vrot.slane %v1957_v6, 3 }
 0x18f   : > { %v2421_v11 = vcombine.low %v1326_v8, %v3506_v9  ;;  %v1562_v26 = vld [vmem:[#allocation2] sm:$0xe]  ;;  %v1714_v46 = vor.u32 %v1713_v42, %v1710_v41 }
 0x190   : > { %v2439_v28 = vcombine.low %v1562_v26, %v3506_v9  ;;  %v1808_v59 = vld [vmem:[#allocation2] sm:$0xc]  ;;  %v3127_v26 = vld [vmem:[#allocation6 + $0x1a0] sm:$0xff]  }
 0x191   : > { %2820 = vmatmul.mubr.bf16.vlgmr.msra.gmra.mxu0 %v2421_v11  ;;  %v1373_v12 = vshll.u32 %v2421_v11, 16  ;;  %v1371_v16 = vshrl.u32 %v2421_v11, 16  ;;  %v2457_v61 = vcombine.low %v1808_v59, %v3506_v9  ;;  %v3119_v11 = vld [vmem:[#allocation6 + $0x140] sm:$0xff]  }
 0x192   : > { %2844 = vmatpush3.bf16.msra.mxu0 %v3086_v10  ;;  %2859 = vmatprep.mubr.msk.bf16.mxu0 %vm3276_vm6, %v3275_v52  ;;  %v1700_v32 = vshrl.u32 %v2439_v28, 16  ;;  %v1703_v33 = vshll.u32 %v2439_v28, 16  ;;  %v1583_v45 = vrot.slane %v2439_v28, 1  ;;  %v3118_v10 = vld [vmem:[#allocation6 + $0x110] sm:$0xff]  }
 0x193   : > { %2845 = vmatprep.subr.bf16.mxu0 %v3275_v52  ;;  %v1375_v17 = vrot.slane %v1373_v12, 1  ;;  %v1946_v1 = vshrl.u32 %v2457_v61, 16  ;;  %v1949_v2 = vshll.u32 %v2457_v61, 16  ;;  %v1956_v12 = vrot.slane %v1954_v5, 2  ;;  %v3129_v28 = vld [vmem:[#allocation6 + $0x190] sm:$0xff]  }
 0x194   : > { %v1702_v37 = vrot.slane %v1700_v32, 1  ;;  %v1705_v38 = vrot.slane %v1703_v33, 2  ;;  %v1585_v55 = vsel %vm618_vm1, %v1583_v45, %v1584_v51  ;;  %v3131_v32 = vld [vmem:[#allocation6 + $0x180] sm:$0xff]   ;;  %v2192_v5 = vld [vmem:[%s3424_s21 + $0x8] sm:$0x7] }
 0x195   : > { %v1376_v18 = vor.u32 %v1375_v17, %v1371_v16  ;;  %v1948_v7 = vrot.slane %v1946_v1, 2  ;;  %v1951_v8 = vrot.slane %v1949_v2, 3  ;;  %v3120_v16 = vld [vmem:[#allocation6 + $0x108] sm:$0xff]   ;;  %v1960_v17 = vor.u32 %v1959_v13, %v1956_v12 }
 0x196   : > { %2846 = vmatpush3.bf16.msra.mxu0 %v3088_v14  ;;  %v1706_v43 = vor.u32 %v1705_v38, %v1702_v37 }
 0x197   : > { %v1381_v22 = vsel %vm382_vm0, %v1376_v18, %v1380_v19  ;;  %2847 = vmatprep.subr.bf16.mxu0 %v3275_v52  ;;  %v1952_v14 = vor.u32 %v1951_v8, %v1948_v7  ;;  %v3123_v19 = vld [vmem:[#allocation6 + $0x100] sm:$0xff]   ;;  %v2484_v7 = vld [vmem:[%s3646_s5] ss:$0 sm:$0xff] }
 0x198   : > { %2800 = vmatmul.mubr.bf16.vlgmr.msra.gmra.mxu1 %v1381_v22  ;;  %v1715_v48 = vsel %vm754_vm2, %v1706_v43, %v1714_v46  ;;  %v3124_v22 = vld [vmem:[#allocation6 + $0x1b8] sm:$0xff]  }
 0x199   : > { %2824 = vmatpush3.bf16.msra.mxu1 %v3090_v20  ;;  %2839 = vmatprep.mubr.msk.bf16.mxu1 %vm3276_vm6, %v3275_v52  ;;  %v1961_v18 = vsel %vm1020_vm3, %v1952_v14, %v1960_v17  ;;  %v1829_v20 = vrot.slane %v2457_v61, 2  ;;  %v2195_v14 = vunpack.c.l.bf16 %v2192_v5 }
 0x19a   : > { %2848 = vmatpush3.bf16.msra.mxu0 %v3091_v21  ;;  %2825 = vmatprep.subr.bf16.mxu1 %v3275_v52  ;;  %v1830_v21 = vrot.slane %v3523_v31, 2 }
 0x19b   : > { %2849 = vmatprep.subr.bf16.mxu0 %v3275_v52 }
 0x19d   : > { %2826 = vmatpush3.bf16.msra.mxu1 %v3092_v23  ;;  %v1831_v23 = vsel %vm894_vm4, %v1829_v20, %v1830_v21 }
 0x19e   : > { %2850 = vmatpush3.bf16.msra.mxu0 %v3093_v24  ;;  %2827 = vmatprep.subr.bf16.mxu1 %v3275_v52  ;;  %v3125_v24 = vld [vmem:[#allocation6 + $0x1b0] sm:$0xff]  }
 0x19f   : > { %2851 = vmatprep.subr.bf16.mxu0 %v3275_v52 }
 0x1a1   : > { %2828 = vmatpush3.bf16.msra.mxu1 %v3094_v25  ;;  %v3126_v25 = vld [vmem:[#allocation6 + $0x1a8] sm:$0xff]  }
 0x1a2   : > { %2852 = vmatpush3.bf16.msra.mxu0 %v3095_v27  ;;  %2829 = vmatprep.subr.bf16.mxu1 %v3275_v52  ;;  %v3128_v27 = vld [vmem:[#allocation6 + $0x198] sm:$0xff]  }
 0x1a3   : > { %2853 = vmatprep.subr.bf16.mxu0 %v3275_v52 }
 0x1a5   : > { %2830 = vmatpush3.bf16.msra.mxu1 %v3096_v29  ;;  %v2054_v29 = vld [vmem:[#allocation2] sm:$0x8] }
 0x1a6   : > { %2854 = vmatpush3.bf16.msra.mxu0 %v3097_v30  ;;  %2831 = vmatprep.subr.bf16.mxu1 %v3275_v52  ;;  %v3130_v30 = vld [vmem:[#allocation6 + $0x188] sm:$0xff]   ;;  %v2475_v31 = vcombine.low %v2054_v29, %v3506_v9 }
 0x1a7   : > { %2855 = vmatprep.subr.bf16.mxu0 %v3275_v52 }
 0x1a8   : > { %v2075_v33 = vrot.slane %v2475_v31, 3 }
 0x1a9   : > { %2832 = vmatpush3.bf16.msra.mxu1 %v3098_v34  ;;  %v2076_v34 = vrot.slane %v3551_v0, 3 }
 0x1aa   : > { %2856 = vmatpush3.bf16.msra.mxu0 %v3099_v15  ;;  %2833 = vmatprep.subr.bf16.mxu1 %v3275_v52 }
 0x1ab   : > { %2857 = vmatprep.subr.bf16.mxu0 %v3275_v52  ;;  %v2077_v15 = vsel %vm1160_vm5, %v2075_v33, %v2076_v34 }
 0x1ad   : > { %2834 = vmatpush3.bf16.msra.mxu1 %v3100_v39 }
 0x1ae   : > { %2858 = vmatpush3.bf16.msra.mxu0 %v3101_v40  ;;  %2835 = vmatprep.subr.bf16.mxu1 %v3275_v52 }
 0x1af   : > { %2883 = vmatprep.subr.bf16.mxu0 %v3275_v52 }
 0x1b1   : > { %2836 = vmatpush3.bf16.msra.mxu1 %v3102_v44  ;;  %2860 = vmatmul.mubr.bf16.vlgmr.msra.gmra.mxu0 %v1715_v48 }
 0x1b2   : > { %2884 = vmatpush3.bf16.msra.mxu0 %v3105_v47  ;;  %2837 = vmatprep.subr.bf16.mxu1 %v3275_v52 }
 0x1b3   : > { %2885 = vmatprep.subr.bf16.mxu0 %v3275_v52  ;;  %2899 = vmatprep.mubr.msk.bf16.mxu0 %vm3276_vm6, %v3275_v52 }
 0x1b5   : > { %2838 = vmatpush3.bf16.msra.mxu1 %v3106_v49 }
 0x1b6   : > { %2886 = vmatpush3.bf16.msra.mxu0 %v3107_v50  ;;  %2863 = vmatprep.subr.bf16.mxu1 %v3275_v52 }
 0x1b7   : > { %2887 = vmatprep.subr.bf16.mxu0 %v3275_v52 }
 0x1b8   : > { %2840 = vmatmul.mubr.bf16.vlgmr.msra.gmra.mxu1 %v1585_v55 }
 0x1b9   : > { %2864 = vmatpush3.bf16.msra.mxu1 %v3108_v53  ;;  %2879 = vmatprep.mubr.msk.bf16.mxu1 %vm3276_vm6, %v3275_v52 }
 0x1ba   : > { %2888 = vmatpush3.bf16.msra.mxu0 %v3109_v54  ;;  %2865 = vmatprep.subr.bf16.mxu1 %v3275_v52 }
 0x1bb   : > { %2889 = vmatprep.subr.bf16.mxu0 %v3275_v52 }
 0x1bd   : > { %2866 = vmatpush3.bf16.msra.mxu1 %v3110_v56 }
 0x1be   : > { %2890 = vmatpush3.bf16.msra.mxu0 %v3111_v57  ;;  %2867 = vmatprep.subr.bf16.mxu1 %v3275_v52 }
 0x1bf   : > { %2891 = vmatprep.subr.bf16.mxu0 %v3275_v52 }
 0x1c1   : > { %2868 = vmatpush3.bf16.msra.mxu1 %v3112_v58 }
 0x1c2   : > { %2892 = vmatpush3.bf16.msra.mxu0 %v3113_v60  ;;  %2869 = vmatprep.subr.bf16.mxu1 %v3275_v52 }
 0x1c3   : > { %2893 = vmatprep.subr.bf16.mxu0 %v3275_v52 }
 0x1c5   : > { %2870 = vmatpush3.bf16.msra.mxu1 %v3114_v62 }
 0x1c6   : > { %2894 = vmatpush3.bf16.msra.mxu0 %v3115_v63  ;;  %2871 = vmatprep.subr.bf16.mxu1 %v3275_v52 }
 0x1c7   : > { %2895 = vmatprep.subr.bf16.mxu0 %v3275_v52 }
 0x1c9   : > { %2872 = vmatpush3.bf16.msra.mxu1 %v3116_v3  ;;  %v2190_v3 = vld [vmem:[%s3424_s21] sm:$0x8] }
 0x1ca   : > { %2896 = vmatpush3.bf16.msra.mxu0 %v3117_v4  ;;  %2873 = vmatprep.subr.bf16.mxu1 %v3275_v52  ;;  %v2191_v4 = vld [vmem:[%s3424_s21 + $0x4] sm:$0xf]  ;;  %s2235_s21 = sshll.u32 %s325_s19, 4  ;;  %s3594_s21 = int_to_ptr.vmem [resolvable:$true] %s2235_s21 }
 0x1cb   : > { %2897 = vmatprep.subr.bf16.mxu0 %v3275_v52  ;;  %v2194_v12 = vunpack.c.l.bf16 %v2191_v4  ;;  %s3185_s10 = scalar_lea.vmem %s3594_s21, 128  ;;  %p3192_p0 = scmp.lt.s32.totalorder %s3594_s21, %s3190_s12 }
 0x1cc   : > { %p3186_p8 = scmp.ne.s32.totalorder %s3594_s21, %s3185_s10  ;;  %p3193_p6 = scmp.lt.s32.totalorder %s3191_s17, %s3185_s10 }
 0x1cd   : > { %2874 = vmatpush3.bf16.msra.mxu1 %v3118_v10  ;;  %v2485_v10 = vld [vmem:[%s3647_s6] ss:$0 sm:$0xff] }
 0x1ce   : > { %2898 = vmatpush3.bf16.msra.mxu0 %v3119_v11  ;;  %2875 = vmatprep.subr.bf16.mxu1 %v3275_v52  ;;  %v2193_v11 = vunpack.c.l.bf16 %v2190_v3  ;;  %p3187_p11 = pnand %p3186_p8, %p3655_p10  ;;  %p3194_p7 = por %p3193_p6, %p3192_p0 }
 0x1d0   : > { %v2200_v21 = vrot.slane %v2193_v11, 6  ;;  %p3188_p13 = pneg %p3187_p11 }
 0x1d1   : > { %2876 = vmatpush3.bf16.msra.mxu1 %v3120_v16  ;;  %2900 = vmatmul.mubr.bf16.vlgmr.msra.gmra.mxu0 %v1961_v18 }
 0x1d2   : > { %2877 = vmatprep.subr.bf16.mxu1 %v3275_v52  ;;  %p3195_p9 = pnand %p3194_p7, %p3188_p13 }
 0x1d5   : > { %2878 = vmatpush3.bf16.msra.mxu1 %v3123_v19 }
 0x1d6   : > { %2903 = vmatprep.subr.bf16.mxu1 %v3275_v52 }
 0x1d8   : > { %2880 = vmatmul.mubr.bf16.vlgmr.msra.gmra.mxu1 %v1831_v23  ;;  %v2203_v23 = vrot.slane %v2195_v14, 6 }
 0x1d9   : > { %2904 = vmatpush3.bf16.msra.mxu1 %v3124_v22  ;;  %2919 = vmatprep.mubr.msk.bf16.mxu1 %vm3276_vm6, %v3275_v52  ;;  %v2201_v22 = vrot.slane %v2194_v12, 6 }
 0x1da   : > { %2905 = vmatprep.subr.bf16.mxu1 %v3275_v52 }
 0x1db   : > { %v2204_v29 = vsel %vm2199_vm9, %v2201_v22, %v2203_v23 }
 0x1dd   : > { %2906 = vmatpush3.bf16.msra.mxu1 %v3125_v24 }
 0x1de   : > { %2907 = vmatprep.subr.bf16.mxu1 %v3275_v52 }
 0x1e1   : > { %2908 = vmatpush3.bf16.msra.mxu1 %v3126_v25 }
 0x1e2   : > { %2909 = vmatprep.subr.bf16.mxu1 %v3275_v52 }
 0x1e5   : > { %2910 = vmatpush3.bf16.msra.mxu1 %v3127_v26 }
 0x1e6   : > { %2911 = vmatprep.subr.bf16.mxu1 %v3275_v52 }
 0x1e9   : > { %2912 = vmatpush3.bf16.msra.mxu1 %v3128_v27 }
 0x1ea   : > { %2913 = vmatprep.subr.bf16.mxu1 %v3275_v52 }
 0x1ed   : > { %2914 = vmatpush3.bf16.msra.mxu1 %v3129_v28  ;;  %v2202_v28 = vsel %vm2199_vm9, %v2200_v21, %v2201_v22 }
 0x1ee   : > { %2915 = vmatprep.subr.bf16.mxu1 %v3275_v52 }
 0x1f1   : > { %2916 = vmatpush3.bf16.msra.mxu1 %v3130_v30 }
 0x1f2   : > { %2917 = vmatprep.subr.bf16.mxu1 %v3275_v52 }
 0x1f5   : > { %2918 = vmatpush3.bf16.msra.mxu1 %v3131_v32 }
 0x1f8   : > { %2920 = vmatmul.mubr.bf16.vlgmr.msra.gmra.mxu1 %v2077_v15 }
 0x251   : > { %v1555_v35 = vpop.f32.mrf.mxu0 }
 0x253   : > { %v2821_v36 = vpop.f32.mrf.mxu0 }
 0x255   : > { %v1558_v37 = vpop.f32.mrf.mxu0 }
 0x257   : > { %v2822_v38 = vpop.f32.mrf.mxu0 }
 0x258   : > { %v1465_v39 = vpop.f32.mrf.mxu1 }
 0x259   : > { %v1556_v40 = vadd.f32 %v1555_v35, %v1465_v39 }
 0x25a   : > { %v2801_v41 = vpop.f32.mrf.mxu1 }
 0x25c   : > { %v1468_v42 = vpop.f32.mrf.mxu1 }
 0x25d   : > { %v1559_v9 = vadd.f32 %v1558_v37, %v1468_v42 }
 0x25e   : > { %v2802_v43 = vpop.f32.mrf.mxu1 }
 0x271   : > { %v1799_v44 = vpop.f32.mrf.mxu0 }
 0x273   : > { %v2861_v46 = vpop.f32.mrf.mxu0 }
 0x275   : > { %v1802_v52 = vpop.f32.mrf.mxu0 }
 0x277   : > { %v2862_v47 = vpop.f32.mrf.mxu0 }
 0x278   : > { %v1669_v48 = vpop.f32.mrf.mxu1 }
 0x279   : > { %v1676_v49 = vadd.f32 %v1669_v48, %v1556_v40 }
 0x27a   : > { %v2841_v50 = vpop.f32.mrf.mxu1 }
 0x27b   : > { %v1806_v45 = vadd.f32 %v1799_v44, %v1676_v49 }
 0x27c   : > { %v1672_v51 = vpop.f32.mrf.mxu1 }
 0x27d   : > { %v1677_v53 = vadd.f32 %v1672_v51, %v1559_v9 }
 0x27e   : > { %v2842_v54 = vpop.f32.mrf.mxu1 }
 0x27f   : > { %v1807_v55 = vadd.f32 %v1802_v52, %v1677_v53 }
 0x291   : > { %v2045_v56 = vpop.f32.mrf.mxu0 }
 0x293   : > { %v2901_v57 = vpop.f32.mrf.mxu0 }
 0x295   : > { %v2048_v58 = vpop.f32.mrf.mxu0 }
 0x297   : > { %v2902_v59 = vpop.f32.mrf.mxu0 }
 0x298   : > { %v1915_v60 = vpop.f32.mrf.mxu1 }
 0x299   : > { %v1922_v0 = vadd.f32 %v1915_v60, %v1806_v45 }
 0x29a   : > { %v2881_v61 = vpop.f32.mrf.mxu1 }
 0x29b   : > { %v2052_v2 = vadd.f32 %v2045_v56, %v1922_v0 }
 0x29c   : > { %v1918_v62 = vpop.f32.mrf.mxu1 }
 0x29d   : > { %v1923_v1 = vadd.f32 %v1918_v62, %v1807_v55 }
 0x29e   : > { %v2882_v63 = vpop.f32.mrf.mxu1 }
 0x29f   : > { %v2053_v17 = vadd.f32 %v2048_v58, %v1923_v1 }
 0x2b8   : > { %v2161_v6 = vpop.f32.mrf.mxu1 }
 0x2b9   : > { %v2168_v8 = vadd.f32 %v2161_v6, %v2052_v2 }
 0x2ba   : > { %v2921_v13 = vpop.f32.mrf.mxu1 }
 0x2bb   : > { %v2177_v16 = vmul.f32 %v2484_v7, %v2168_v8 }
 0x2bc   : > { %v2164_v18 = vpop.f32.mrf.mxu1 }
 0x2bd   : > { %v2186_v19 = vadd.f32 %v2485_v10, %v2177_v16  ;;  %v2169_v20 = vadd.f32 %v2164_v18, %v2053_v17 }
 0x2be   : > { %v2922_v24 = vpop.f32.mrf.mxu1 }
 0x2bf   : > { %v2178_v25 = vmul.f32 %v2484_v7, %v2169_v20  ;;  %v2188_v26 = vmax.f32 %v2186_v19, 0.0 }
 0x2c1   : > { %v2187_v27 = vadd.f32 %v2485_v10, %v2178_v25  ;;  %v2207_v31 = vadd.f32 %v2202_v28, %v2188_v26 }
 0x2c3   : > { %v2189_v30 = vmax.f32 %v2187_v27, 0.0 }
 0x2c5   : > { %v2208_v32 = vadd.f32 %v2204_v29, %v2189_v30 }
 0x2c7   : > { %v2508_v33 = vpack.c.bf16 %v2208_v32, %v2207_v31 }
 0x2c9   : > { %2509 = vst [vmem:[%s325_s19] sm:$0xff] %v2508_v33  }
 0x2ca   : > { %3198 = shalt.err (!%p3195_p9)
}
 0x2cb   : > { %s3199_s20 = scalar_lea.hbm %s3592_s30, 128  ;;  %s3203_s18 = scalar_lea.hbm %s3648_s7, 256 }
 0x2cc   : > { %p3200_p12 = scmp.ne.s32.totalorder %s3592_s30, %s3199_s20  ;;  %p3204_p5 = scmp.lt.s32.totalorder %s3592_s30, %s3648_s7 }
 0x2cd   : > { %p3205_p3 = scmp.lt.s32.totalorder %s3203_s18, %s3199_s20 }
 0x2ce   : > { %p3201_p1 = pnand %p3200_p12, %p3655_p10 }
 0x2cf   : > { %p3206_p4 = por %p3205_p3, %p3204_p5 }
 0x2d0   : > { %p3202_p2 = pneg %p3201_p1 }
 0x2d2   : > { %p3207_p8 = pnand %p3206_p4, %p3202_p2 }
 0x2d4   : > { %3210 = shalt.err (!%p3207_p8)
}
 0x2d5   : > { %s3278_s23 = smov 64   ;;  %s3279_s10 = smov 4  }
 0x2d6   : > { %2931 = dma.vmem_to_hbm [thread:$0]  (%p3655_p10), %s3594_s21, 128, %s3592_s30, %s3596_s8, %s3278_s23, %s3278_s23, %s3279_s10  }
 0x2d7 PF: > { %p2948_p11 = scmp.ge.s32.totalorder %s3269_s29, 2  ;;  %s2250_s27 = sand.u32 1, %s3249_s24  }
 0x2d8   : > { %p3656_p13 = scmp.ne.s32.totalorder %s3651_s13, 0  ;;  %s2251_s12 = scalar_lea.sflag [#allocation5], %s2250_s27 }
 0x2da   : > { %p2941_p0 = pnand %p2948_p11, %p3656_p13 }
 0x2dc   : > { %p2942_p6 = pneg %p2941_p0 }
 0x2de   : > { %3244 = dma.done.wait (%p2942_p6), %s2251_s12, 128  }
 0x2df   : > { %3246 = vsyncadd (%p2942_p6), %s2251_s12, 4294967168  ;;  %s22_s29 = sadd.s32 1, %s3269_s29   ;;  %s3657_s24 = smov %s3253_s25 }
 0x2e0   : > { %p19_p7 = scmp.ge.s32.totalorder %s22_s29, 4   ;;  %s3658_s25 = smov %s3257_s26 }
 0x2e1   : > { %s3659_s26 = smov %s3373_s14  ;;  %s3660_s27 = smov %s3265_s28 }
 0x2e2   : > { %s3661_s28 = smov %s3663_s9  ;;  %21 = sbr.rel (!%p19_p7) target bundleno = 6 (0x6), region = 104 }
 0x2e7   :  { %2256 = vsyncpa [#allocation4], 1 }
 0x2e8   :  { %2258 = vsyncpa [#allocation4 + $0x1], 1 }
 0x2e9   :  { %2259 = vsyncpa [#allocation7], 1 }
 0x2ea   :  { %2260 = vsyncpa [#allocation5], 1 }
 0x2eb   :  { %2262 = vsyncpa [#allocation5 + $0x1], 1 }

// kernel: tpu_custom_call.1
= control target key start
LH: loop header
LB: loop body
LE: loop exit
PB: predicated region body
PF: predicated region fallthrough
CT: control target
= control target key end

     0   :  { %12 = vsyncpa [#allocation4], 0  ;;  %s3641_s0 = inlined_call_operand.vmem [shape: bf16[2,1,28,128], index: 0, kind: input, shape index: {}]   ;;  %s3642_s1 = inlined_call_operand.hbm [shape: bf16[7,128,128], index: 1, kind: input, shape index: {}]   ;;  %s3643_s2 = inlined_call_operand.vmem [shape: f32[1,128], index: 2, kind: input, shape index: {}]   ;;  %s3644_s3 = inlined_call_operand.vmem [shape: f32[1,128], index: 3, kind: input, shape index: {}]   ;;  %s3645_s4 = inlined_call_operand.hbm [shape: bf16[7,128,128], index: 4, kind: input, shape index: {}]   ;;  %s3646_s5 = inlined_call_operand.vmem [shape: f32[1,128], index: 5, kind: input, shape index: {}]   ;;  %s3647_s6 = inlined_call_operand.vmem [shape: f32[1,128], index: 6, kind: input, shape index: {}]   ;;  %s3648_s7 = inlined_call_operand.hbm [shape: bf16[2,16,128], index: 7, kind: output, shape index: {}]  }
   0x1   :  { %13 = vsyncpa [#allocation7], 0 }
   0x2   :  { %14 = vsyncpa [#allocation5], 0 }
   0x3   :  { %16 = vsyncpa [#allocation5 + $0x1], 0  ;;  %s3320_s24 = smov 0   ;;  %s3322_s25 = smov 0  }
   0x4   :  { %s3324_s26 = smov 0   ;;  %s3326_s27 = smov 0  }
   0x5   :  { %s3328_s28 = smov 0   ;;  %s3330_s29 = smov 0  }
   0x6 LB: > { %s2339_s30 = sadd.s32 4294967295, %s3269_s29   ;;  %s2340_s8 = sadd.s32 4294967294, %s3269_s29   ;;  %s3269_s29 = sphi %s3330_s29, %s22_s29   ;;  %s3265_s28 = sphi %s3328_s28, %s3661_s28   ;;  %s3261_s27 = sphi %s3326_s27, %s3660_s27   ;;  %s3257_s26 = sphi %s3324_s26, %s3659_s26   ;;  %s3253_s25 = sphi %s3322_s25, %s3658_s25   ;;  %s3249_s24 = sphi %s3320_s24, %s3657_s24  }
   0x7   : > { %s34_s9 = sadd.s32 1, %s3265_s28  ;;  %s197_s10 = sadd.s32 1, %s3257_s26 }
   0x8   : > { %p36_p0 = scmp.ge.s32.totalorder %s34_s9, 2  ;;  %p207_p1 = scmp.ne.s32.totalorder %s3257_s26, %s3253_s25 }
   0x9   : > { %p208_p2 = scmp.eq.s32.totalorder %s2339_s30, 1  ;;  %p213_p3 = scmp.ne.s32.totalorder %s3253_s25, %s3249_s24 }
   0xa   : > { %s3663_s9 = smov (%p36_p0, %s34_s9), 0  ;;  %p214_p5 = scmp.eq.s32.totalorder %s2340_s8, 1 }
   0xb   : > { %p3360_p4 = por %p208_p2, %p207_p1  ;;  %s192_s12 = ssub.s32 %s3265_s28, %s3663_s9 }
   0xc   : > { %p2341_p6 = scmp.ge.s32.totalorder %s3269_s29, 1  ;;  %p195_p7 = scmp.eq.s32.totalorder %s192_s12, 0 }
   0xd   : > { %s3650_s11 = scalar_select %p3360_p4, 1, 0 }
   0xe   : > { %p3367_p8 = por %p214_p5, %p213_p3  ;;  %p221_p9 = scmp.lt.s32.totalorder %s3269_s29, 3 }
   0xf   : > { %s3373_s14 = scalar_select %p195_p7, %s3257_s26, %s197_s10  }
  0x10   : > { %s3651_s13 = scalar_select %p3367_p8, 1, 0 }
  0x11   : > { %p3375_p10 = pnand %p2341_p6, %p221_p9  ;;  %p3379_p11 = scmp.eq.s32.totalorder %s2339_s30, 0 }
  0x12   : > { %s3271_s17 = smov [#allocation3]   ;;  %s3272_s20 = smov [#allocation6]  }
  0x13   : > { %p2933_p12 = pneg %p3375_p10  ;;  %s233_s18 = sshll.u32 %s3271_s17, 4  ;;  %s234_s18 = int_to_ptr.vmem [resolvable:$true] %s233_s18 }
  0x14   : > { %s252_s21 = sshll.u32 %s3272_s20, 4  ;;  %s3144_s22 = scalar_lea.vmem %s234_s18, 7168  ;;  %s253_s21 = int_to_ptr.vmem [resolvable:$true] %s252_s21 }
  0x15   : > { %p3387_p13 = pnand %p3379_p11, %p2933_p12  ;;  %p3145_p1 = scmp.ne.s32.totalorder %s234_s18, %s3144_s22 }
  0x16   : > { %p3152_p5 = scmp.lt.s32.totalorder %s234_s18, %s234_s18  ;;  %p3153_p6 = scmp.lt.s32.totalorder %s3144_s22, %s3144_s22 }
  0x17   : > { %p3135_p0 = pneg %p3387_p13 }
  0x18   : > { %p3154_p7 = por %p3153_p6, %p3152_p5 }
  0x19   : > { %p3147_p2 = pnand %p3145_p1, %p3135_p0 }
  0x1b   : > { %p3148_p3 = pneg %p3147_p2 }
  0x1d   : > { %p3155_p9 = pnand %p3154_p7, %p3148_p3 }
  0x1f   : > { %3158 = shalt.err (!%p3155_p9)
}
  0x20   : > { %s3273_s23 = smov 64   ;;  %s3274_s30 = smov 4  }
  0x21   : > { %2936 = dma.hbm_to_vmem [thread:$0]  (!%p3387_p13), %s3642_s1, 7168, %s234_s18, [#allocation4], %s3273_s23, %s3273_s23, %s3274_s30  }
  0x22   : > { %s3170_s12 = scalar_lea.vmem %s253_s21, 7168  ;;  %p3178_p8 = scmp.lt.s32.totalorder %s253_s21, %s253_s21 }
  0x23   : > { %p3171_p12 = scmp.ne.s32.totalorder %s253_s21, %s3170_s12  ;;  %p3179_p4 = scmp.lt.s32.totalorder %s3170_s12, %s3170_s12 }
  0x25   : > { %p3173_p1 = pnand %p3171_p12, %p3135_p0  ;;  %p3180_p5 = por %p3179_p4, %p3178_p8 }
  0x27   : > { %p3174_p2 = pneg %p3173_p1 }
  0x29   : > { %p3181_p3 = pnand %p3180_p5, %p3174_p2 }
  0x2b   : > { %3184 = shalt.err (!%p3181_p3)
}
  0x2c   : > { %2939 = dma.hbm_to_vmem [thread:$0]  (!%p3387_p13), %s3645_s4, 7168, %s253_s21, [#allocation7], %s3273_s23, %s3273_s23, %s3274_s30  }
  0x2d   : > { %286 = sbr.rel (%p3375_p10) target bundleno = 727 (0x2d7), region = 48 }
  0x32   : > { %3236 = dma.done.wait (%p3379_p11), [#allocation4], 7168  }
  0x33   : > { %3238 = vsyncadd (%p3379_p11), [#allocation4], 4294960128 }
  0x34   : > { %3240 = dma.done.wait (%p3379_p11), [#allocation7], 7168  }
  0x35   : > { %3242 = vsyncadd (%p3379_p11), [#allocation7], 4294960128  ;;  %v3005_v0 = vld [vmem:[#allocation3 + $0x78] sm:$0xff]   ;;  %v3007_v2 = vld [vmem:[#allocation3 + $0x70] sm:$0xff]   ;;  %p326_p4 = scmp.lt.s32.totalorder %s3261_s27, 1  ;;  %vm618_vm1 = vcmask 1046528  }
  0x36   : > { %v3006_v1 = vld [vmem:[#allocation3 + $0x38] sm:$0xff]   ;;  %2643 = vmatprep.subr.bf16.mxu0 %v3005_v0  ;;  %v3008_v3 = vld [vmem:[#allocation3 + $0x30] sm:$0xff]   ;;  %v3009_v4 = vld [vmem:[#allocation3 + $0x68] sm:$0xff]   ;;  %vm382_vm0 = vsmask.f32 7424  ;;  %vm894_vm4 = vcmask 1045504  }
  0x37   : > { %2663 = vmatprep.subr.bf16.mxu1 %v3006_v1  ;;  %2644 = vmatpush3.bf16.msra.mxu0 %v3005_v0  ;;  %v3010_v5 = vld [vmem:[#allocation3 + $0x28] sm:$0xff]   ;;  %s327_s15 = scalar_select %p326_p4, %s3261_s27, 1  ;;  %v3011_v6 = vld [vmem:[#allocation3 + $0x60] sm:$0xff]   ;;  %v3013_v8 = vld [vmem:[#allocation3 + $0x58] sm:$0xff]   ;;  %vm754_vm2 = vsmask.f32 6400 }
  0x38   : > { %2664 = vmatpush3.bf16.msra.mxu1 %v3006_v1  ;;  %2645 = vmatprep.subr.bf16.mxu0 %v3007_v2  ;;  %v3012_v7 = vld [vmem:[#allocation3 + $0x20] sm:$0xff]   ;;  %v3014_v9 = vld [vmem:[#allocation3 + $0x18] sm:$0xff]   ;;  %v3015_v10 = vld [vmem:[#allocation3 + $0x50] sm:$0xff]   ;;  %vm1020_vm3 = vsmask.f32 5376  ;;  %vm1160_vm5 = vcmask 1044480  }
  0x39   : > { %2665 = vmatprep.subr.bf16.mxu1 %v3008_v3  ;;  %s2493_s16 = sshll.u32 %s327_s15, 4  ;;  %v3016_v11 = vld [vmem:[#allocation3 + $0x10] sm:$0xff]   ;;  %v3017_v19 = vld [vmem:[#allocation3 + $0x48] sm:$0xff]   ;;  %v3019_v24 = vld [vmem:[#allocation3 + $0x40] sm:$0xff]   ;;  %vm3276_vm6 = vmmov 0   ;;  %s323_s15 = sand.u32 1, %s3253_s25  }
  0x3a   : > { %s3424_s21 = scalar_lea.vmem %s3641_s0, %s2493_s16  ;;  %v3018_v20 = vld [vmem:[#allocation3 + $0x8] sm:$0xff]   ;;  %v3020_v25 = vld [vmem:[#allocation3] sm:$0xff]   ;;  %v3024_v28 = vld [vmem:[#allocation3 + $0xb8] sm:$0xff]   ;;  %s2348_s16 = sshll.u32 %s323_s15, 3  ;;  %vm2199_vm9 = vcmask 1041408  }
  0x3b   : > { %2646 = vmatpush3.bf16.msra.mxu0 %v3007_v2  ;;  %v337_v12 = vld [vmem:[%s3424_s21] sm:$0xf]  ;;  %v338_v13 = vld [vmem:[%s3424_s21 + $0x4] sm:$0xf]  ;;  %v3429_v15 = vld [vmem:[%s3424_s21 + $0x8] ss:$0 sps:$4 sm:$0xff]  }
  0x3c   : > { %2666 = vmatpush3.bf16.msra.mxu1 %v3008_v3  ;;  %2647 = vmatprep.subr.bf16.mxu0 %v3009_v4  ;;  %v2351_v14 = vcombine.low %v337_v12, %v338_v13  ;;  %v391_v18 = vshll.u32 %v3429_v15, 16  ;;  %v395_v27 = vshrl.u32 %v3429_v15, 16  ;;  %v3023_v29 = vld [vmem:[%s3424_s21 + $0x8] ss:$0 sps:$4 sm:$0x77]   ;;  %v3026_v32 = vld [vmem:[#allocation3 + $0xb0] sm:$0xff]  }
  0x3d   : > { %2667 = vmatprep.subr.bf16.mxu1 %v3010_v5  ;;  %v3025_v30 = vld [vmem:[#allocation3 + $0xf8] sm:$0xff]   ;;  %v3027_v33 = vld [vmem:[#allocation3 + $0xf0] sm:$0xff]   ;;  %v3028_v35 = vld [vmem:[#allocation3 + $0xa8] sm:$0xff]   ;;  %v620_v37 = vrot.slane %v3429_v15, 1  ;;  %s2499_s18 = sshll.u32 %s3261_s27, 7  ;;  %s325_s19 = scalar_lea.vmem [#allocation8], %s2348_s16 }
  0x3e   : > { %v384_v16 = vshrl.u32 %v2351_v14, 16  ;;  %v386_v17 = vshll.u32 %v2351_v14, 16  ;;  %2679 = vmatprep.mubr.bf16.mxu1 %v2351_v14  ;;  %v393_v22 = vrot.slane %v391_v18, 1  ;;  %v597_v34 = vld [vmem:[%s3424_s21] sm:$0xe]  ;;  %v3029_v41 = vld [vmem:[#allocation3 + $0xe8] sm:$0xff]   ;;  %s3592_s30 = scalar_lea.hbm %s3648_s7, %s2499_s18 }
  0x3f   : > { %2648 = vmatpush3.bf16.msra.mxu0 %v3009_v4  ;;  %v2370_v36 = vcombine.low %v597_v34, %v338_v13  ;;  %v723_v38 = vld [vmem:[%s3424_s21] sm:$0xe]  ;;  %v3439_v39 = vld [vmem:[%s3424_s21 + $0x4] sm:$0xf]  ;;  %v725_v40 = vld [vmem:[%s3424_s21 + $0x8] sm:$0xf] }
  0x40   : > { %2668 = vmatpush3.bf16.msra.mxu1 %v3010_v5  ;;  %2649 = vmatprep.subr.bf16.mxu0 %v3011_v6  ;;  %v388_v21 = vrot.slane %v386_v17, 1  ;;  %v397_v31 = vor.u32 %v395_v27, %v393_v22  ;;  %v726_v43 = vld [vmem:[%s3424_s21 + $0xc] sm:$0x1]  ;;  %v2379_v44 = vcombine.low %v723_v38, %v3439_v39  ;;  %v3032_v58 = vld [vmem:[#allocation3 + $0x98] sm:$0xff]   ;;  %v3034_v62 = vld [vmem:[#allocation3 + $0x90] sm:$0xff]   ;;  %s3596_s8 = scalar_lea.sflag [#allocation5], %s323_s15 }
  0x41   : > { %2669 = vmatprep.subr.bf16.mxu1 %v3012_v7  ;;  %v619_v42 = vrot.slane %v2370_v36, 1  ;;  %v3444_v45 = vcombine.low %v725_v40, %v726_v43  ;;  %v3030_v46 = vld [vmem:[#allocation3 + $0xa0] sm:$0xff]   ;;  %v3033_v60 = vld [vmem:[#allocation3 + $0xd8] sm:$0xff]   ;;  %v3035_v63 = vld [vmem:[#allocation3 + $0xd0] sm:$0xff]   ;;  %p3655_p10 = scmp.ne.s32.totalorder %s3650_s11, 0  ;;  %s3277_s27 = smov [#allocation8]  }
  0x42   : > { %v389_v23 = vor.u32 %v388_v21, %v384_v16  ;;  %v756_v48 = vshrl.u32 %v2379_v44, 16  ;;  %v759_v49 = vshll.u32 %v2379_v44, 16  ;;  %v3031_v52 = vld [vmem:[#allocation3 + $0xe0] sm:$0xff]   ;;  %v3036_v0 = vld [vmem:[#allocation3 + $0x88] sm:$0xff]   ;;  %v873_v2 = vld [vmem:[%s3424_s21] sm:$0xc] }
  0x43   : > { %2650 = vmatpush3.bf16.msra.mxu0 %v3011_v6  ;;  %v621_v47 = vsel %vm618_vm1, %v619_v42, %v620_v37  ;;  %v764_v50 = vshrl.u32 %v3444_v45, 16  ;;  %v767_v51 = vshll.u32 %v3444_v45, 16  ;;  %v3037_v1 = vld [vmem:[#allocation3 + $0xc8] sm:$0xff]   ;;  %v2389_v3 = vcombine.low %v873_v2, %v3439_v39  ;;  %v999_v4 = vld [vmem:[%s3424_s21 + $0xc] sm:$0x3]  ;;  %v3041_v17 = vld [vmem:[#allocation3 + $0x138] sm:$0xff]  }
  0x44   : > { %2670 = vmatpush3.bf16.msra.mxu1 %v3012_v7  ;;  %2651 = vmatprep.subr.bf16.mxu0 %v3013_v8  ;;  %v394_v26 = vsel %vm382_vm0, %v389_v23, %v393_v22  ;;  %v758_v53 = vrot.slane %v756_v48, 1  ;;  %v761_v54 = vrot.slane %v759_v49, 2  ;;  %v3455_v5 = vcombine.low %v725_v40, %v999_v4  ;;  %v3038_v6 = vld [vmem:[#allocation3 + $0x80] sm:$0xff]   ;;  %v3044_v18 = vld [vmem:[#allocation3 + $0x178] sm:$0xff]   ;;  %v1139_v22 = vld [vmem:[%s3424_s21] sm:$0x8] }
  0x45   : > { %2671 = vmatprep.subr.bf16.mxu1 %v3014_v9  ;;  %2659 = vmatprep.mubr.bf16.mxu0 %v394_v26  ;;  %v766_v55 = vrot.slane %v764_v50, 1  ;;  %v769_v56 = vrot.slane %v767_v51, 2  ;;  %v3039_v7 = vld [vmem:[#allocation3 + $0xc0] sm:$0xff]   ;;  %v896_v21 = vrot.slane %v3444_v45, 2  ;;  %v3046_v23 = vld [vmem:[#allocation3 + $0x170] sm:$0xff]   ;;  %v2407_v26 = vcombine.low %v1139_v22, %v3439_v39  ;;  %v3051_v15 = vld [vmem:[#allocation3 + $0x118] sm:$0xff]  }
  0x46   : > { %v762_v57 = vor.u32 %v761_v54, %v758_v53  ;;  %v3050_v34 = vld [vmem:[#allocation3 + $0x160] sm:$0xff]   ;;  %v3053_v36 = vld [vmem:[#allocation3 + $0x110] sm:$0xff]   ;;  %v3055_v38 = vld [vmem:[#allocation3 + $0x108] sm:$0xff]   ;;  %s3189_s12 = sshll.u32 %s3277_s27, 4  ;;  %s3190_s12 = int_to_ptr.vmem [resolvable:$false] %s3189_s12 }
  0x47   : > { %2652 = vmatpush3.bf16.msra.mxu0 %v3013_v8  ;;  %v770_v59 = vor.u32 %v769_v56, %v766_v55  ;;  %v1022_v8 = vshrl.u32 %v2389_v3, 16  ;;  %v1161_v27 = vrot.slane %v2407_v26, 3  ;;  %v3056_v39 = vld [vmem:[#allocation3 + $0x148] sm:$0xff]   ;;  %v3057_v40 = vld [vmem:[#allocation3 + $0x100] sm:$0xff]   ;;  %v3060_v42 = vld [vmem:[#allocation3 + $0x1b8] sm:$0xff]   ;;  %s3191_s17 = scalar_lea.vmem %s3190_s12, 256 }
  0x48   : > { %2672 = vmatpush3.bf16.msra.mxu1 %v3014_v9  ;;  %2653 = vmatprep.subr.bf16.mxu0 %v3015_v10  ;;  %v1025_v9 = vshll.u32 %v2389_v3, 16  ;;  %v3062_v43 = vld [vmem:[#allocation3 + $0x1b0] sm:$0xff]   ;;  %v3065_v48 = vld [vmem:[#allocation3 + $0x198] sm:$0xff]   ;;  %v3067_v50 = vld [vmem:[#allocation3 + $0x188] sm:$0xff]  }
  0x49   : > { %2673 = vmatprep.subr.bf16.mxu1 %v3016_v11  ;;  %v771_v61 = vsel %vm754_vm2, %v762_v57, %v770_v59  ;;  %v1024_v12 = vrot.slane %v1022_v8, 2  ;;  %v3066_v49 = vld [vmem:[#allocation3 + $0x190] sm:$0xff]   ;;  %v3068_v45 = vld [vmem:[#allocation3 + $0x180] sm:$0xff]   ;;  %v3070_v51 = vld [vmem:[#allocation6 + $0x38] sm:$0xff]  }
  0x4a   : > { %v1027_v13 = vrot.slane %v1025_v9, 3  ;;  %v3071_v53 = vld [vmem:[#allocation6 + $0x30] sm:$0xff]   ;;  %v3072_v54 = vld [vmem:[#allocation6 + $0x78] sm:$0xff]   ;;  %v3073_v55 = vld [vmem:[#allocation6 + $0x28] sm:$0xff]  }
  0x4b   : > { %2654 = vmatpush3.bf16.msra.mxu0 %v3015_v10  ;;  %v1030_v10 = vshrl.u32 %v3455_v5, 16  ;;  %v3074_v56 = vld [vmem:[#allocation6 + $0x70] sm:$0xff]   ;;  %v3075_v57 = vld [vmem:[#allocation6 + $0x20] sm:$0xff]   ;;  %v3084_v2 = vld [vmem:[#allocation6 + $0x48] sm:$0xff]  }
  0x4c   : > { %2674 = vmatpush3.bf16.msra.mxu1 %v3016_v11  ;;  %2655 = vmatprep.subr.bf16.mxu0 %v3017_v19  ;;  %v1033_v11 = vshll.u32 %v3455_v5, 16 }
  0x4d   : > { %2675 = vmatprep.subr.bf16.mxu1 %v3018_v20  ;;  %v1032_v14 = vrot.slane %v1030_v10, 2 }
  0x4e   : > { %v1035_v16 = vrot.slane %v1033_v11, 3 }
  0x4f   : > { %2656 = vmatpush3.bf16.msra.mxu0 %v3017_v19  ;;  %v3045_v19 = vld [vmem:[#allocation3 + $0x130] sm:$0xff]  }
  0x50   : > { %2676 = vmatpush3.bf16.msra.mxu1 %v3018_v20  ;;  %2657 = vmatprep.subr.bf16.mxu0 %v3019_v24  ;;  %v895_v20 = vrot.slane %v2389_v3, 2  ;;  %v3087_v3 = vld [vmem:[#allocation6 + $0x40] sm:$0xff]  }
  0x51   : > { %2677 = vmatprep.subr.bf16.mxu1 %v3020_v25 }
  0x53   : > { %2658 = vmatpush3.bf16.msra.mxu0 %v3019_v24  ;;  %v1028_v24 = vor.u32 %v1027_v13, %v1024_v12 }
  0x54   : > { %2678 = vmatpush3.bf16.msra.mxu1 %v3020_v25  ;;  %2683 = vmatprep.subr.bf16.mxu0 %v3024_v28  ;;  %v1036_v25 = vor.u32 %v1035_v16, %v1032_v14 }
  0x55   : > { %2703 = vmatprep.subr.bf16.mxu1 %v3025_v30 }
  0x56   : > { %2660 = vmatmul.mubr.bf16.vlgmr.msra.gmra.mxu0 %v397_v31  ;;  %v3048_v31 = vld [vmem:[#allocation3 + $0x168] sm:$0xff]  }
  0x57   : > { %2680 = vmatmul.mubr.bf16.vlgmr.msra.gmra.mxu1 %v3023_v29  ;;  %2684 = vmatpush3.bf16.msra.mxu0 %v3024_v28  ;;  %v1162_v28 = vrot.slane %v3455_v5, 3  ;;  %v3047_v29 = vld [vmem:[#allocation3 + $0x128] sm:$0xff]  }
  0x58   : > { %2704 = vmatpush3.bf16.msra.mxu1 %v3025_v30  ;;  %2685 = vmatprep.subr.bf16.mxu0 %v3026_v32  ;;  %v897_v30 = vsel %vm894_vm4, %v895_v20, %v896_v21 }
  0x59   : > { %2705 = vmatprep.subr.bf16.mxu1 %v3027_v33  ;;  %2699 = vmatprep.mubr.bf16.mxu0 %v621_v47  ;;  %v1163_v44 = vsel %vm1160_vm5, %v1161_v27, %v1162_v28  ;;  %v3064_v47 = vld [vmem:[#allocation3 + $0x1a0] sm:$0xff]  }
  0x5a   : > { %2719 = vmatprep.mubr.bf16.mxu1 %v771_v61  ;;  %v3079_v61 = vld [vmem:[#allocation6 + $0x10] sm:$0xff]  }
  0x5b   : > { %2686 = vmatpush3.bf16.msra.mxu0 %v3026_v32  ;;  %v1037_v32 = vsel %vm1020_vm3, %v1028_v24, %v1036_v25 }
  0x5c   : > { %2706 = vmatpush3.bf16.msra.mxu1 %v3027_v33  ;;  %2687 = vmatprep.subr.bf16.mxu0 %v3028_v35  ;;  %v3049_v33 = vld [vmem:[#allocation3 + $0x120] sm:$0xff]  }
  0x5d   : > { %2707 = vmatprep.subr.bf16.mxu1 %v3029_v41 }
  0x5f   : > { %2688 = vmatpush3.bf16.msra.mxu0 %v3028_v35  ;;  %v3052_v35 = vld [vmem:[#allocation3 + $0x158] sm:$0xff]  }
  0x60   : > { %2708 = vmatpush3.bf16.msra.mxu1 %v3029_v41  ;;  %2689 = vmatprep.subr.bf16.mxu0 %v3030_v46  ;;  %v3058_v41 = vld [vmem:[#allocation3 + $0x140] sm:$0xff]  }
  0x61   : > { %2709 = vmatprep.subr.bf16.mxu1 %v3031_v52 }
  0x63   : > { %2690 = vmatpush3.bf16.msra.mxu0 %v3030_v46  ;;  %v3063_v46 = vld [vmem:[#allocation3 + $0x1a8] sm:$0xff]  }
  0x64   : > { %2710 = vmatpush3.bf16.msra.mxu1 %v3031_v52  ;;  %2691 = vmatprep.subr.bf16.mxu0 %v3032_v58  ;;  %v3275_v52 = vmov 0.0  }
  0x65   : > { %2711 = vmatprep.subr.bf16.mxu1 %v3033_v60 }
  0x67   : > { %2692 = vmatpush3.bf16.msra.mxu0 %v3032_v58  ;;  %v3076_v58 = vld [vmem:[#allocation6 + $0x68] sm:$0xff]  }
  0x68   : > { %2712 = vmatpush3.bf16.msra.mxu1 %v3033_v60  ;;  %2693 = vmatprep.subr.bf16.mxu0 %v3034_v62  ;;  %v3078_v60 = vld [vmem:[#allocation6 + $0x60] sm:$0xff]  }
  0x69   : > { %2713 = vmatprep.subr.bf16.mxu1 %v3035_v63 }
  0x6b   : > { %2694 = vmatpush3.bf16.msra.mxu0 %v3034_v62  ;;  %v3080_v62 = vld [vmem:[#allocation6 + $0x58] sm:$0xff]  }
  0x6c   : > { %2714 = vmatpush3.bf16.msra.mxu1 %v3035_v63  ;;  %2695 = vmatprep.subr.bf16.mxu0 %v3036_v0  ;;  %v3081_v63 = vld [vmem:[#allocation6 + $0x8] sm:$0xff]  }
  0x6d   : > { %2715 = vmatprep.subr.bf16.mxu1 %v3037_v1 }
  0x6f   : > { %2696 = vmatpush3.bf16.msra.mxu0 %v3036_v0  ;;  %v3082_v0 = vld [vmem:[#allocation6 + $0x50] sm:$0xff]  }
  0x70   : > { %2716 = vmatpush3.bf16.msra.mxu1 %v3037_v1  ;;  %2697 = vmatprep.subr.bf16.mxu0 %v3038_v6  ;;  %v3083_v1 = vld [vmem:[#allocation6] sm:$0xff]  }
  0x71   : > { %2717 = vmatprep.subr.bf16.mxu1 %v3039_v7 }
  0x73   : > { %2698 = vmatpush3.bf16.msra.mxu0 %v3038_v6 }
  0x74   : > { %2718 = vmatpush3.bf16.msra.mxu1 %v3039_v7  ;;  %2723 = vmatprep.subr.bf16.mxu0 %v3041_v17 }
  0x75   : > { %2743 = vmatprep.subr.bf16.mxu1 %v3044_v18 }
  0x76   : > { %2700 = vmatmul.mubr.bf16.vlgmr.msra.gmra.mxu0 %v620_v37  ;;  %v3054_v37 = vld [vmem:[#allocation3 + $0x150] sm:$0xff]  }
  0x77   : > { %2724 = vmatpush3.bf16.msra.mxu0 %v3041_v17  ;;  %2720 = vmatmul.mubr.bf16.vlgmr.msra.gmra.mxu1 %v770_v59  ;;  %v3077_v59 = vld [vmem:[#allocation6 + $0x18] sm:$0xff]  }
  0x78   : > { %2744 = vmatpush3.bf16.msra.mxu1 %v3044_v18  ;;  %2725 = vmatprep.subr.bf16.mxu0 %v3045_v19 }
  0x79   : > { %2745 = vmatprep.subr.bf16.mxu1 %v3046_v23  ;;  %2739 = vmatprep.mubr.bf16.mxu0 %v897_v30  ;;  %v1288_v30 = vlaneseq }
  0x7a   : > { %2759 = vmatprep.mubr.bf16.mxu1 %v1037_v32 }
  0x7b   : > { %2726 = vmatpush3.bf16.msra.mxu0 %v3045_v19 }
  0x7c   : > { %2746 = vmatpush3.bf16.msra.mxu1 %v3046_v23  ;;  %2727 = vmatprep.subr.bf16.mxu0 %v3047_v29 }
  0x7d   : > { %2747 = vmatprep.subr.bf16.mxu1 %v3048_v31 }
  0x7f   : > { %2728 = vmatpush3.bf16.msra.mxu0 %v3047_v29 }
  0x80   : > { %2748 = vmatpush3.bf16.msra.mxu1 %v3048_v31  ;;  %2729 = vmatprep.subr.bf16.mxu0 %v3049_v33 }
  0x81   : > { %2749 = vmatprep.subr.bf16.mxu1 %v3050_v34 }
  0x83   : > { %2730 = vmatpush3.bf16.msra.mxu0 %v3049_v33 }
  0x84   : > { %2750 = vmatpush3.bf16.msra.mxu1 %v3050_v34  ;;  %2731 = vmatprep.subr.bf16.mxu0 %v3051_v15  ;;  %v1289_v34 = vshrl.u32 %v1288_v30, 7  ;;  %v3097_v30 = vld [vmem:[#allocation6 + $0xd0] sm:$0xff]  }
  0x85   : > { %2751 = vmatprep.subr.bf16.mxu1 %v3052_v35 }
  0x87   : > { %2732 = vmatpush3.bf16.msra.mxu0 %v3051_v15 }
  0x88   : > { %2752 = vmatpush3.bf16.msra.mxu1 %v3052_v35  ;;  %2733 = vmatprep.subr.bf16.mxu0 %v3053_v36 }
  0x89   : > { %2753 = vmatprep.subr.bf16.mxu1 %v3054_v37 }
  0x8b   : > { %2734 = vmatpush3.bf16.msra.mxu0 %v3053_v36 }
  0x8c   : > { %2754 = vmatpush3.bf16.msra.mxu1 %v3054_v37  ;;  %2735 = vmatprep.subr.bf16.mxu0 %v3055_v38 }
  0x8d   : > { %2755 = vmatprep.subr.bf16.mxu1 %v3056_v39 }
  0x8f   : > { %2736 = vmatpush3.bf16.msra.mxu0 %v3055_v38 }
  0x90   : > { %2756 = vmatpush3.bf16.msra.mxu1 %v3056_v39  ;;  %2737 = vmatprep.subr.bf16.mxu0 %v3057_v40  ;;  %v1291_v39 = vadd.s32 16, %v1289_v34 }
  0x91   : > { %2757 = vmatprep.subr.bf16.mxu1 %v3058_v41 }
  0x93   : > { %2738 = vmatpush3.bf16.msra.mxu0 %v3057_v40 }
  0x94   : > { %2758 = vmatpush3.bf16.msra.mxu1 %v3058_v41  ;;  %2763 = vmatprep.subr.bf16.mxu0 %v3060_v42 }
  0x95   : > { %2783 = vmatprep.subr.bf16.mxu1 %v3275_v52 }
  0x96   : > { %2740 = vmatmul.mubr.bf16.vlgmr.msra.gmra.mxu0 %v896_v21 }
  0x97   : > { %2764 = vmatpush3.bf16.msra.mxu0 %v3060_v42  ;;  %2760 = vmatmul.mubr.bf16.vlgmr.msra.gmra.mxu1 %v1036_v25 }
  0x98   : > { %2765 = vmatprep.subr.bf16.mxu0 %v3062_v43  ;;  %2779 = vmatprep.mubr.bf16.mxu0 %v1163_v44 }
  0x99   : > { %2784 = vmatpush3.bf16.msra.mxu1 %v3072_v54  ;;  %2799 = vmatprep.mubr.msk.bf16.mxu1 %vm3276_vm6, %v3275_v52 }
  0x9a   : > { %2785 = vmatprep.subr.bf16.mxu1 %v3275_v52 }
  0x9b   : > { %2766 = vmatpush3.bf16.msra.mxu0 %v3062_v43  ;;  %v2416_v43 = vld [vmem:[%s3643_s2] ss:$0 sm:$0xff] }
  0x9c   : > { %2767 = vmatprep.subr.bf16.mxu0 %v3063_v46 }
  0x9d   : > { %2786 = vmatpush3.bf16.msra.mxu1 %v3074_v56 }
  0x9e   : > { %2787 = vmatprep.subr.bf16.mxu1 %v3275_v52 }
  0x9f   : > { %2768 = vmatpush3.bf16.msra.mxu0 %v3063_v46 }
  0xa0   : > { %2769 = vmatprep.subr.bf16.mxu0 %v3064_v47 }
  0xa1   : > { %2788 = vmatpush3.bf16.msra.mxu1 %v3076_v58 }
  0xa2   : > { %2789 = vmatprep.subr.bf16.mxu1 %v3275_v52 }
  0xa3   : > { %2770 = vmatpush3.bf16.msra.mxu0 %v3064_v47 }
  0xa4   : > { %2771 = vmatprep.subr.bf16.mxu0 %v3065_v48 }
  0xa5   : > { %2790 = vmatpush3.bf16.msra.mxu1 %v3078_v60 }
  0xa6   : > { %2791 = vmatprep.subr.bf16.mxu1 %v3275_v52 }
  0xa7   : > { %2772 = vmatpush3.bf16.msra.mxu0 %v3065_v48 }
  0xa8   : > { %2773 = vmatprep.subr.bf16.mxu0 %v3066_v49 }
  0xa9   : > { %2792 = vmatpush3.bf16.msra.mxu1 %v3080_v62 }
  0xaa   : > { %2793 = vmatprep.subr.bf16.mxu1 %v3275_v52 }
  0xab   : > { %2774 = vmatpush3.bf16.msra.mxu0 %v3066_v49  ;;  %v2417_v49 = vld [vmem:[%s3644_s3] ss:$0 sm:$0xff] }
  0xac   : > { %2775 = vmatprep.subr.bf16.mxu0 %v3067_v50 }
  0xad   : > { %2794 = vmatpush3.bf16.msra.mxu1 %v3082_v0 }
  0xae   : > { %2795 = vmatprep.subr.bf16.mxu1 %v3275_v52 }
  0xaf   : > { %2776 = vmatpush3.bf16.msra.mxu0 %v3067_v50  ;;  %v1297_v50 = vadd.s32 4294967293, %v1291_v39  ;;  %v3100_v39 = vld [vmem:[#allocation6 + $0x90] sm:$0xff]  }
  0xb0   : > { %2777 = vmatprep.subr.bf16.mxu0 %v3068_v45 }
  0xb1   : > { %2796 = vmatpush3.bf16.msra.mxu1 %v3084_v2  ;;  %vm1303_vm7 = vcmp.lt.s32.totalorder %v1297_v50, 16  ;;  %v3107_v50 = vld [vmem:[#allocation6 + $0x170] sm:$0xff]  }
  0xb2   : > { %2797 = vmatprep.subr.bf16.mxu1 %v3275_v52 }
  0xb3   : > { %2778 = vmatpush3.bf16.msra.mxu0 %v3068_v45 }
  0xb4   : > { %2803 = vmatprep.subr.bf16.mxu0 %v3275_v52 }
  0xb5   : > { %2798 = vmatpush3.bf16.msra.mxu1 %v3087_v3 }
  0xb6   : > { %2780 = vmatmul.mubr.bf16.vlgmr.msra.gmra.mxu0 %v1162_v28  ;;  %2823 = vmatprep.subr.bf16.mxu1 %v3275_v52 }
  0xb7   : > { %2804 = vmatpush3.bf16.msra.mxu0 %v3070_v51  ;;  %2819 = vmatprep.mubr.msk.bf16.mxu0 %vm3276_vm6, %v3275_v52 }
  0xb8   : > { %2805 = vmatprep.subr.bf16.mxu0 %v3275_v52 }
  0xbb   : > { %2806 = vmatpush3.bf16.msra.mxu0 %v3071_v53 }
  0xbc   : > { %2807 = vmatprep.subr.bf16.mxu0 %v3275_v52 }
  0xbf   : > { %2808 = vmatpush3.bf16.msra.mxu0 %v3073_v55 }
  0xc0   : > { %2809 = vmatprep.subr.bf16.mxu0 %v3275_v52 }
  0xc3   : > { %2810 = vmatpush3.bf16.msra.mxu0 %v3075_v57 }
  0xc4   : > { %2811 = vmatprep.subr.bf16.mxu0 %v3275_v52 }
  0xc7   : > { %2812 = vmatpush3.bf16.msra.mxu0 %v3077_v59 }
  0xc8   : > { %2813 = vmatprep.subr.bf16.mxu0 %v3275_v52 }
  0xcb   : > { %2814 = vmatpush3.bf16.msra.mxu0 %v3079_v61  ;;  %v1295_v61 = vadd.s32 4294967293, %v1289_v34  ;;  %v3098_v34 = vld [vmem:[#allocation6 + $0x98] sm:$0xff]  }
  0xcc   : > { %2815 = vmatprep.subr.bf16.mxu0 %v3275_v52 }
  0xcd   : > { %vm1298_vm8 = vcmp.ge.s32.totalorder %v1295_v61, 0 }
  0xcf   : > { %2816 = vmatpush3.bf16.msra.mxu0 %v3081_v63 }
  0xd0   : > { %2817 = vmatprep.subr.bf16.mxu0 %v3275_v52 }
  0xd3   : > { %2818 = vmatpush3.bf16.msra.mxu0 %v3083_v1 }
  0xd4   : > { %2843 = vmatprep.subr.bf16.mxu0 %v3275_v52 }
 0x116   : > { %v2661_v4 = vpop.f32.mrf.mxu0 }
 0x117   : > { %v2681_v5 = vpop.f32.mrf.mxu1 }
 0x118   : > { %v592_v6 = vadd.f32 %v2681_v5, %v2661_v4  ;;  %v482_v7 = vpop.f32.mrf.mxu0 }
 0x119   : > { %v583_v8 = vpop.f32.mrf.mxu1 }
 0x11a   : > { %v584_v9 = vadd.f32 %v583_v8, %v482_v7  ;;  %v2662_v10 = vpop.f32.mrf.mxu0 }
 0x11b   : > { %v2682_v11 = vpop.f32.mrf.mxu1  ;;  %v3086_v10 = vld [vmem:[#allocation6 + $0xf8] sm:$0xff]  }
 0x11c   : > { %v485_v12 = vpop.f32.mrf.mxu0 }
 0x11d   : > { %v586_v13 = vpop.f32.mrf.mxu1 }
 0x11e   : > { %v587_v32 = vadd.f32 %v586_v13, %v485_v12 }
 0x136   : > { %v2701_v14 = vpop.f32.mrf.mxu0 }
 0x137   : > { %v2721_v16 = vpop.f32.mrf.mxu1  ;;  %v722_v29 = vadd.f32 %v2701_v14, %v592_v6  ;;  %v3088_v14 = vld [vmem:[#allocation6 + $0xf0] sm:$0xff]  }
 0x138   : > { %v706_v17 = vpop.f32.mrf.mxu0 }
 0x139   : > { %v856_v18 = vpop.f32.mrf.mxu1  ;;  %v720_v31 = vadd.f32 %v706_v17, %v584_v9  ;;  %v872_v33 = vadd.f32 %v2721_v16, %v722_v29  ;;  %v3096_v29 = vld [vmem:[#allocation6 + $0xa0] sm:$0xff]  }
 0x13a   : > { %v2702_v19 = vpop.f32.mrf.mxu0 }
 0x13b   : > { %v2722_v20 = vpop.f32.mrf.mxu1  ;;  %v870_v15 = vadd.f32 %v856_v18, %v720_v31 }
 0x13c   : > { %v709_v21 = vpop.f32.mrf.mxu0  ;;  %v3090_v20 = vld [vmem:[#allocation6 + $0xb8] sm:$0xff]  }
 0x13d   : > { %v859_v22 = vpop.f32.mrf.mxu1  ;;  %v721_v35 = vadd.f32 %v709_v21, %v587_v32  ;;  %v3091_v21 = vld [vmem:[#allocation6 + $0xe8] sm:$0xff]  }
 0x13f   : > { %v871_v40 = vadd.f32 %v859_v22, %v721_v35 }
 0x156   : > { %v2741_v23 = vpop.f32.mrf.mxu0 }
 0x157   : > { %v2761_v24 = vpop.f32.mrf.mxu1  ;;  %v998_v36 = vadd.f32 %v2741_v23, %v872_v33  ;;  %v3092_v23 = vld [vmem:[#allocation6 + $0xb0] sm:$0xff]  }
 0x158   : > { %v982_v25 = vpop.f32.mrf.mxu0 }
 0x159   : > { %v1122_v26 = vpop.f32.mrf.mxu1  ;;  %v996_v37 = vadd.f32 %v982_v25, %v870_v15  ;;  %v1138_v41 = vadd.f32 %v2761_v24, %v998_v36  ;;  %v3093_v24 = vld [vmem:[#allocation6 + $0xe0] sm:$0xff]   ;;  %v3094_v25 = vld [vmem:[#allocation6 + $0xa8] sm:$0xff]  }
 0x15a   : > { %v2742_v27 = vpop.f32.mrf.mxu0  ;;  %v3099_v15 = vld [vmem:[#allocation6 + $0xc8] sm:$0xff]  }
 0x15b   : > { %v2762_v28 = vpop.f32.mrf.mxu1  ;;  %v1136_v44 = vadd.f32 %v1122_v26, %v996_v37  ;;  %v3095_v27 = vld [vmem:[#allocation6 + $0xd8] sm:$0xff]  }
 0x15c   : > { %v985_v38 = vpop.f32.mrf.mxu0 }
 0x15d   : > { %v997_v46 = vadd.f32 %v985_v38, %v871_v40  ;;  %v1125_v48 = vpop.f32.mrf.mxu1  ;;  %v3101_v40 = vld [vmem:[#allocation6 + $0xc0] sm:$0xff]  }
 0x15f   : > { %v1137_v55 = vadd.f32 %v1125_v48, %v997_v46 }
 0x176   : > { %v2781_v42 = vpop.f32.mrf.mxu0 }
 0x177   : > { %v1264_v47 = vadd.f32 %v2781_v42, %v1138_v41 }
 0x178   : > { %v1248_v45 = vpop.f32.mrf.mxu0 }
 0x179   : > { %v1274_v51 = vmul.f32 %v2416_v43, %v1264_v47  ;;  %v1262_v53 = vadd.f32 %v1248_v45, %v1136_v44  ;;  %v3102_v44 = vld [vmem:[#allocation6 + $0x88] sm:$0xff]   ;;  %v3105_v47 = vld [vmem:[#allocation6 + $0x178] sm:$0xff]  }
 0x17a   : > { %v2782_v54 = vpop.f32.mrf.mxu0 }
 0x17b   : > { %v1284_v56 = vadd.f32 %v2417_v49, %v1274_v51  ;;  %v1272_v57 = vmul.f32 %v2416_v43, %v1262_v53  ;;  %v3108_v53 = vld [vmem:[#allocation6 + $0x138] sm:$0xff]   ;;  %v3109_v54 = vld [vmem:[#allocation6 + $0x168] sm:$0xff]  }
 0x17c   : > { %v1251_v58 = vpop.f32.mrf.mxu0 }
 0x17d   : > { %v1287_v59 = vmax.f32 %v1284_v56, 0.0  ;;  %v1282_v60 = vadd.f32 %v2417_v49, %v1272_v57  ;;  %v1263_v62 = vadd.f32 %v1251_v58, %v1137_v55  ;;  %v3110_v56 = vld [vmem:[#allocation6 + $0x130] sm:$0xff]   ;;  %v3111_v57 = vld [vmem:[#allocation6 + $0x160] sm:$0xff]   ;;  %v3112_v58 = vld [vmem:[#allocation6 + $0x128] sm:$0xff]  }
 0x17f   : > { %v1309_v63 = vsel %vm1303_vm7, %v1287_v59, 0.0  ;;  %v1273_v0 = vmul.f32 %v2416_v43, %v1263_v62  ;;  %v1285_v2 = vmax.f32 %v1282_v60, 0.0  ;;  %v3113_v60 = vld [vmem:[#allocation6 + $0x158] sm:$0xff]   ;;  %v3114_v62 = vld [vmem:[#allocation6 + $0x120] sm:$0xff]  }
 0x180   : > { %v2496_v1 = vpack.c.bf16 %v1309_v63, %v1309_v63  ;;  %v3115_v63 = vld [vmem:[#allocation6 + $0x150] sm:$0xff]  }
 0x181   : > { %v1283_v3 = vadd.f32 %v2417_v49, %v1273_v0  ;;  %v1307_v5 = vsel %vm1298_vm8, %v1285_v2, 0.0  ;;  %v3106_v49 = vld [vmem:[#allocation6 + $0x80] sm:$0xff]  }
 0x182   : > { %1325 = vst [vmem:[#allocation2 + $0x8] sm:$0x7] %v2496_v1 }
 0x183   : > { %v1286_v4 = vmax.f32 %v1283_v3, 0.0  ;;  %v3116_v3 = vld [vmem:[#allocation6 + $0x118] sm:$0xff]  }
 0x185   : > { %v2503_v6 = vpack.c.bf16 %v1286_v4, %v1307_v5  ;;  %v3117_v4 = vld [vmem:[#allocation6 + $0x148] sm:$0xff]  }
 0x187   : > { %2504 = vst [vmem:[#allocation2] sm:$0xff] %v2503_v6  }
 0x189   : > { %v3504_v7 = vld [vmem:[#allocation2 + $0x8] ss:$0 sps:$4 sm:$0x11]  }
 0x18a   : > { %v1378_v13 = vshll.u32 %v3504_v7, 16  ;;  %v3523_v31 = vld [vmem:[#allocation2 + $0x8] ss:$0 sps:$4 sm:$0x33]   ;;  %v1584_v51 = vrot.slane %v3504_v7, 1 }
 0x18b   : > { %v1708_v35 = vshrl.u32 %v3523_v31, 16  ;;  %v1711_v36 = vshll.u32 %v3523_v31, 16  ;;  %v3551_v0 = vld [vmem:[#allocation2 + $0x8] ss:$0 sps:$4 sm:$0x77]  }
 0x18c   : > { %v1380_v19 = vrot.slane %v1378_v13, 1  ;;  %v1954_v5 = vshrl.u32 %v3551_v0, 16  ;;  %v1957_v6 = vshll.u32 %v3551_v0, 16 }
 0x18d   : > { %v1710_v41 = vrot.slane %v1708_v35, 1  ;;  %v1713_v42 = vrot.slane %v1711_v36, 2 }
 0x18e   : > { %v1326_v8 = vld [vmem:[#allocation2] sm:$0xf]  ;;  %v3506_v9 = vld [vmem:[#allocation2 + $0x4] sm:$0xf]  ;;  %v1959_v13 = vrot.slane %v1957_v6, 3 }
 0x18f   : > { %v2421_v11 = vcombine.low %v1326_v8, %v3506_v9  ;;  %v1562_v26 = vld [vmem:[#allocation2] sm:$0xe]  ;;  %v1714_v46 = vor.u32 %v1713_v42, %v1710_v41 }
 0x190   : > { %v2439_v28 = vcombine.low %v1562_v26, %v3506_v9  ;;  %v1808_v59 = vld [vmem:[#allocation2] sm:$0xc]  ;;  %v3127_v26 = vld [vmem:[#allocation6 + $0x1a0] sm:$0xff]  }
 0x191   : > { %2820 = vmatmul.mubr.bf16.vlgmr.msra.gmra.mxu0 %v2421_v11  ;;  %v1373_v12 = vshll.u32 %v2421_v11, 16  ;;  %v1371_v16 = vshrl.u32 %v2421_v11, 16  ;;  %v2457_v61 = vcombine.low %v1808_v59, %v3506_v9  ;;  %v3119_v11 = vld [vmem:[#allocation6 + $0x140] sm:$0xff]  }
 0x192   : > { %2844 = vmatpush3.bf16.msra.mxu0 %v3086_v10  ;;  %2859 = vmatprep.mubr.msk.bf16.mxu0 %vm3276_vm6, %v3275_v52  ;;  %v1700_v32 = vshrl.u32 %v2439_v28, 16  ;;  %v1703_v33 = vshll.u32 %v2439_v28, 16  ;;  %v1583_v45 = vrot.slane %v2439_v28, 1  ;;  %v3118_v10 = vld [vmem:[#allocation6 + $0x110] sm:$0xff]  }
 0x193   : > { %2845 = vmatprep.subr.bf16.mxu0 %v3275_v52  ;;  %v1375_v17 = vrot.slane %v1373_v12, 1  ;;  %v1946_v1 = vshrl.u32 %v2457_v61, 16  ;;  %v1949_v2 = vshll.u32 %v2457_v61, 16  ;;  %v1956_v12 = vrot.slane %v1954_v5, 2  ;;  %v3129_v28 = vld [vmem:[#allocation6 + $0x190] sm:$0xff]  }
 0x194   : > { %v1702_v37 = vrot.slane %v1700_v32, 1  ;;  %v1705_v38 = vrot.slane %v1703_v33, 2  ;;  %v1585_v55 = vsel %vm618_vm1, %v1583_v45, %v1584_v51  ;;  %v3131_v32 = vld [vmem:[#allocation6 + $0x180] sm:$0xff]   ;;  %v2192_v5 = vld [vmem:[%s3424_s21 + $0x8] sm:$0x7] }
 0x195   : > { %v1376_v18 = vor.u32 %v1375_v17, %v1371_v16  ;;  %v1948_v7 = vrot.slane %v1946_v1, 2  ;;  %v1951_v8 = vrot.slane %v1949_v2, 3  ;;  %v3120_v16 = vld [vmem:[#allocation6 + $0x108] sm:$0xff]   ;;  %v1960_v17 = vor.u32 %v1959_v13, %v1956_v12 }
 0x196   : > { %2846 = vmatpush3.bf16.msra.mxu0 %v3088_v14  ;;  %v1706_v43 = vor.u32 %v1705_v38, %v1702_v37 }
 0x197   : > { %v1381_v22 = vsel %vm382_vm0, %v1376_v18, %v1380_v19  ;;  %2847 = vmatprep.subr.bf16.mxu0 %v3275_v52  ;;  %v1952_v14 = vor.u32 %v1951_v8, %v1948_v7  ;;  %v3123_v19 = vld [vmem:[#allocation6 + $0x100] sm:$0xff]   ;;  %v2484_v7 = vld [vmem:[%s3646_s5] ss:$0 sm:$0xff] }
 0x198   : > { %2800 = vmatmul.mubr.bf16.vlgmr.msra.gmra.mxu1 %v1381_v22  ;;  %v1715_v48 = vsel %vm754_vm2, %v1706_v43, %v1714_v46  ;;  %v3124_v22 = vld [vmem:[#allocation6 + $0x1b8] sm:$0xff]  }
 0x199   : > { %2824 = vmatpush3.bf16.msra.mxu1 %v3090_v20  ;;  %2839 = vmatprep.mubr.msk.bf16.mxu1 %vm3276_vm6, %v3275_v52  ;;  %v1961_v18 = vsel %vm1020_vm3, %v1952_v14, %v1960_v17  ;;  %v1829_v20 = vrot.slane %v2457_v61, 2  ;;  %v2195_v14 = vunpack.c.l.bf16 %v2192_v5 }
 0x19a   : > { %2848 = vmatpush3.bf16.msra.mxu0 %v3091_v21  ;;  %2825 = vmatprep.subr.bf16.mxu1 %v3275_v52  ;;  %v1830_v21 = vrot.slane %v3523_v31, 2 }
 0x19b   : > { %2849 = vmatprep.subr.bf16.mxu0 %v3275_v52 }
 0x19d   : > { %2826 = vmatpush3.bf16.msra.mxu1 %v3092_v23  ;;  %v1831_v23 = vsel %vm894_vm4, %v1829_v20, %v1830_v21 }
 0x19e   : > { %2850 = vmatpush3.bf16.msra.mxu0 %v3093_v24  ;;  %2827 = vmatprep.subr.bf16.mxu1 %v3275_v52  ;;  %v3125_v24 = vld [vmem:[#allocation6 + $0x1b0] sm:$0xff]  }
 0x19f   : > { %2851 = vmatprep.subr.bf16.mxu0 %v3275_v52 }
 0x1a1   : > { %2828 = vmatpush3.bf16.msra.mxu1 %v3094_v25  ;;  %v3126_v25 = vld [vmem:[#allocation6 + $0x1a8] sm:$0xff]  }
 0x1a2   : > { %2852 = vmatpush3.bf16.msra.mxu0 %v3095_v27  ;;  %2829 = vmatprep.subr.bf16.mxu1 %v3275_v52  ;;  %v3128_v27 = vld [vmem:[#allocation6 + $0x198] sm:$0xff]  }
 0x1a3   : > { %2853 = vmatprep.subr.bf16.mxu0 %v3275_v52 }
 0x1a5   : > { %2830 = vmatpush3.bf16.msra.mxu1 %v3096_v29  ;;  %v2054_v29 = vld [vmem:[#allocation2] sm:$0x8] }
 0x1a6   : > { %2854 = vmatpush3.bf16.msra.mxu0 %v3097_v30  ;;  %2831 = vmatprep.subr.bf16.mxu1 %v3275_v52  ;;  %v3130_v30 = vld [vmem:[#allocation6 + $0x188] sm:$0xff]   ;;  %v2475_v31 = vcombine.low %v2054_v29, %v3506_v9 }
 0x1a7   : > { %2855 = vmatprep.subr.bf16.mxu0 %v3275_v52 }
 0x1a8   : > { %v2075_v33 = vrot.slane %v2475_v31, 3 }
 0x1a9   : > { %2832 = vmatpush3.bf16.msra.mxu1 %v3098_v34  ;;  %v2076_v34 = vrot.slane %v3551_v0, 3 }
 0x1aa   : > { %2856 = vmatpush3.bf16.msra.mxu0 %v3099_v15  ;;  %2833 = vmatprep.subr.bf16.mxu1 %v3275_v52 }
 0x1ab   : > { %2857 = vmatprep.subr.bf16.mxu0 %v3275_v52  ;;  %v2077_v15 = vsel %vm1160_vm5, %v2075_v33, %v2076_v34 }
 0x1ad   : > { %2834 = vmatpush3.bf16.msra.mxu1 %v3100_v39 }
 0x1ae   : > { %2858 = vmatpush3.bf16.msra.mxu0 %v3101_v40  ;;  %2835 = vmatprep.subr.bf16.mxu1 %v3275_v52 }
 0x1af   : > { %2883 = vmatprep.subr.bf16.mxu0 %v3275_v52 }
 0x1b1   : > { %2836 = vmatpush3.bf16.msra.mxu1 %v3102_v44  ;;  %2860 = vmatmul.mubr.bf16.vlgmr.msra.gmra.mxu0 %v1715_v48 }
 0x1b2   : > { %2884 = vmatpush3.bf16.msra.mxu0 %v3105_v47  ;;  %2837 = vmatprep.subr.bf16.mxu1 %v3275_v52 }
 0x1b3   : > { %2885 = vmatprep.subr.bf16.mxu0 %v3275_v52  ;;  %2899 = vmatprep.mubr.msk.bf16.mxu0 %vm3276_vm6, %v3275_v52 }
 0x1b5   : > { %2838 = vmatpush3.bf16.msra.mxu1 %v3106_v49 }
 0x1b6   : > { %2886 = vmatpush3.bf16.msra.mxu0 %v3107_v50  ;;  %2863 = vmatprep.subr.bf16.mxu1 %v3275_v52 }
 0x1b7   : > { %2887 = vmatprep.subr.bf16.mxu0 %v3275_v52 }
 0x1b8   : > { %2840 = vmatmul.mubr.bf16.vlgmr.msra.gmra.mxu1 %v1585_v55 }
 0x1b9   : > { %2864 = vmatpush3.bf16.msra.mxu1 %v3108_v53  ;;  %2879 = vmatprep.mubr.msk.bf16.mxu1 %vm3276_vm6, %v3275_v52 }
 0x1ba   : > { %2888 = vmatpush3.bf16.msra.mxu0 %v3109_v54  ;;  %2865 = vmatprep.subr.bf16.mxu1 %v3275_v52 }
 0x1bb   : > { %2889 = vmatprep.subr.bf16.mxu0 %v3275_v52 }
 0x1bd   : > { %2866 = vmatpush3.bf16.msra.mxu1 %v3110_v56 }
 0x1be   : > { %2890 = vmatpush3.bf16.msra.mxu0 %v3111_v57  ;;  %2867 = vmatprep.subr.bf16.mxu1 %v3275_v52 }
 0x1bf   : > { %2891 = vmatprep.subr.bf16.mxu0 %v3275_v52 }
 0x1c1   : > { %2868 = vmatpush3.bf16.msra.mxu1 %v3112_v58 }
 0x1c2   : > { %2892 = vmatpush3.bf16.msra.mxu0 %v3113_v60  ;;  %2869 = vmatprep.subr.bf16.mxu1 %v3275_v52 }
 0x1c3   : > { %2893 = vmatprep.subr.bf16.mxu0 %v3275_v52 }
 0x1c5   : > { %2870 = vmatpush3.bf16.msra.mxu1 %v3114_v62 }
 0x1c6   : > { %2894 = vmatpush3.bf16.msra.mxu0 %v3115_v63  ;;  %2871 = vmatprep.subr.bf16.mxu1 %v3275_v52 }
 0x1c7   : > { %2895 = vmatprep.subr.bf16.mxu0 %v3275_v52 }
 0x1c9   : > { %2872 = vmatpush3.bf16.msra.mxu1 %v3116_v3  ;;  %v2190_v3 = vld [vmem:[%s3424_s21] sm:$0x8] }
 0x1ca   : > { %2896 = vmatpush3.bf16.msra.mxu0 %v3117_v4  ;;  %2873 = vmatprep.subr.bf16.mxu1 %v3275_v52  ;;  %v2191_v4 = vld [vmem:[%s3424_s21 + $0x4] sm:$0xf]  ;;  %s2235_s21 = sshll.u32 %s325_s19, 4  ;;  %s3594_s21 = int_to_ptr.vmem [resolvable:$true] %s2235_s21 }
 0x1cb   : > { %2897 = vmatprep.subr.bf16.mxu0 %v3275_v52  ;;  %v2194_v12 = vunpack.c.l.bf16 %v2191_v4  ;;  %s3185_s10 = scalar_lea.vmem %s3594_s21, 128  ;;  %p3192_p0 = scmp.lt.s32.totalorder %s3594_s21, %s3190_s12 }
 0x1cc   : > { %p3186_p8 = scmp.ne.s32.totalorder %s3594_s21, %s3185_s10  ;;  %p3193_p6 = scmp.lt.s32.totalorder %s3191_s17, %s3185_s10 }
 0x1cd   : > { %2874 = vmatpush3.bf16.msra.mxu1 %v3118_v10  ;;  %v2485_v10 = vld [vmem:[%s3647_s6] ss:$0 sm:$0xff] }
 0x1ce   : > { %2898 = vmatpush3.bf16.msra.mxu0 %v3119_v11  ;;  %2875 = vmatprep.subr.bf16.mxu1 %v3275_v52  ;;  %v2193_v11 = vunpack.c.l.bf16 %v2190_v3  ;;  %p3187_p11 = pnand %p3186_p8, %p3655_p10  ;;  %p3194_p7 = por %p3193_p6, %p3192_p0 }
 0x1d0   : > { %v2200_v21 = vrot.slane %v2193_v11, 6  ;;  %p3188_p13 = pneg %p3187_p11 }
 0x1d1   : > { %2876 = vmatpush3.bf16.msra.mxu1 %v3120_v16  ;;  %2900 = vmatmul.mubr.bf16.vlgmr.msra.gmra.mxu0 %v1961_v18 }
 0x1d2   : > { %2877 = vmatprep.subr.bf16.mxu1 %v3275_v52  ;;  %p3195_p9 = pnand %p3194_p7, %p3188_p13 }
 0x1d5   : > { %2878 = vmatpush3.bf16.msra.mxu1 %v3123_v19 }
 0x1d6   : > { %2903 = vmatprep.subr.bf16.mxu1 %v3275_v52 }
 0x1d8   : > { %2880 = vmatmul.mubr.bf16.vlgmr.msra.gmra.mxu1 %v1831_v23  ;;  %v2203_v23 = vrot.slane %v2195_v14, 6 }
 0x1d9   : > { %2904 = vmatpush3.bf16.msra.mxu1 %v3124_v22  ;;  %2919 = vmatprep.mubr.msk.bf16.mxu1 %vm3276_vm6, %v3275_v52  ;;  %v2201_v22 = vrot.slane %v2194_v12, 6 }
 0x1da   : > { %2905 = vmatprep.subr.bf16.mxu1 %v3275_v52 }
 0x1db   : > { %v2204_v29 = vsel %vm2199_vm9, %v2201_v22, %v2203_v23 }
 0x1dd   : > { %2906 = vmatpush3.bf16.msra.mxu1 %v3125_v24 }
 0x1de   : > { %2907 = vmatprep.subr.bf16.mxu1 %v3275_v52 }
 0x1e1   : > { %2908 = vmatpush3.bf16.msra.mxu1 %v3126_v25 }
 0x1e2   : > { %2909 = vmatprep.subr.bf16.mxu1 %v3275_v52 }
 0x1e5   : > { %2910 = vmatpush3.bf16.msra.mxu1 %v3127_v26 }
 0x1e6   : > { %2911 = vmatprep.subr.bf16.mxu1 %v3275_v52 }
 0x1e9   : > { %2912 = vmatpush3.bf16.msra.mxu1 %v3128_v27 }
 0x1ea   : > { %2913 = vmatprep.subr.bf16.mxu1 %v3275_v52 }
 0x1ed   : > { %2914 = vmatpush3.bf16.msra.mxu1 %v3129_v28  ;;  %v2202_v28 = vsel %vm2199_vm9, %v2200_v21, %v2201_v22 }
 0x1ee   : > { %2915 = vmatprep.subr.bf16.mxu1 %v3275_v52 }
 0x1f1   : > { %2916 = vmatpush3.bf16.msra.mxu1 %v3130_v30 }
 0x1f2   : > { %2917 = vmatprep.subr.bf16.mxu1 %v3275_v52 }
 0x1f5   : > { %2918 = vmatpush3.bf16.msra.mxu1 %v3131_v32 }
 0x1f8   : > { %2920 = vmatmul.mubr.bf16.vlgmr.msra.gmra.mxu1 %v2077_v15 }
 0x251   : > { %v1555_v35 = vpop.f32.mrf.mxu0 }
 0x253   : > { %v2821_v36 = vpop.f32.mrf.mxu0 }
 0x255   : > { %v1558_v37 = vpop.f32.mrf.mxu0 }
 0x257   : > { %v2822_v38 = vpop.f32.mrf.mxu0 }
 0x258   : > { %v1465_v39 = vpop.f32.mrf.mxu1 }
 0x259   : > { %v1556_v40 = vadd.f32 %v1555_v35, %v1465_v39 }
 0x25a   : > { %v2801_v41 = vpop.f32.mrf.mxu1 }
 0x25c   : > { %v1468_v42 = vpop.f32.mrf.mxu1 }
 0x25d   : > { %v1559_v9 = vadd.f32 %v1558_v37, %v1468_v42 }
 0x25e   : > { %v2802_v43 = vpop.f32.mrf.mxu1 }
 0x271   : > { %v1799_v44 = vpop.f32.mrf.mxu0 }
 0x273   : > { %v2861_v46 = vpop.f32.mrf.mxu0 }
 0x275   : > { %v1802_v52 = vpop.f32.mrf.mxu0 }
 0x277   : > { %v2862_v47 = vpop.f32.mrf.mxu0 }
 0x278   : > { %v1669_v48 = vpop.f32.mrf.mxu1 }
 0x279   : > { %v1676_v49 = vadd.f32 %v1669_v48, %v1556_v40 }
 0x27a   : > { %v2841_v50 = vpop.f32.mrf.mxu1 }
 0x27b   : > { %v1806_v45 = vadd.f32 %v1799_v44, %v1676_v49 }
 0x27c   : > { %v1672_v51 = vpop.f32.mrf.mxu1 }
 0x27d   : > { %v1677_v53 = vadd.f32 %v1672_v51, %v1559_v9 }
 0x27e   : > { %v2842_v54 = vpop.f32.mrf.mxu1 }
 0x27f   : > { %v1807_v55 = vadd.f32 %v1802_v52, %v1677_v53 }
 0x291   : > { %v2045_v56 = vpop.f32.mrf.mxu0 }
 0x293   : > { %v2901_v57 = vpop.f32.mrf.mxu0 }
 0x295   : > { %v2048_v58 = vpop.f32.mrf.mxu0 }
 0x297   : > { %v2902_v59 = vpop.f32.mrf.mxu0 }
 0x298   : > { %v1915_v60 = vpop.f32.mrf.mxu1 }
 0x299   : > { %v1922_v0 = vadd.f32 %v1915_v60, %v1806_v45 }
 0x29a   : > { %v2881_v61 = vpop.f32.mrf.mxu1 }
 0x29b   : > { %v2052_v2 = vadd.f32 %v2045_v56, %v1922_v0 }
 0x29c   : > { %v1918_v62 = vpop.f32.mrf.mxu1 }
 0x29d   : > { %v1923_v1 = vadd.f32 %v1918_v62, %v1807_v55 }
 0x29e   : > { %v2882_v63 = vpop.f32.mrf.mxu1 }
 0x29f   : > { %v2053_v17 = vadd.f32 %v2048_v58, %v1923_v1 }
 0x2b8   : > { %v2161_v6 = vpop.f32.mrf.mxu1 }
 0x2b9   : > { %v2168_v8 = vadd.f32 %v2161_v6, %v2052_v2 }
 0x2ba   : > { %v2921_v13 = vpop.f32.mrf.mxu1 }
 0x2bb   : > { %v2177_v16 = vmul.f32 %v2484_v7, %v2168_v8 }
 0x2bc   : > { %v2164_v18 = vpop.f32.mrf.mxu1 }
 0x2bd   : > { %v2186_v19 = vadd.f32 %v2485_v10, %v2177_v16  ;;  %v2169_v20 = vadd.f32 %v2164_v18, %v2053_v17 }
 0x2be   : > { %v2922_v24 = vpop.f32.mrf.mxu1 }
 0x2bf   : > { %v2178_v25 = vmul.f32 %v2484_v7, %v2169_v20  ;;  %v2188_v26 = vmax.f32 %v2186_v19, 0.0 }
 0x2c1   : > { %v2187_v27 = vadd.f32 %v2485_v10, %v2178_v25  ;;  %v2207_v31 = vadd.f32 %v2202_v28, %v2188_v26 }
 0x2c3   : > { %v2189_v30 = vmax.f32 %v2187_v27, 0.0 }
 0x2c5   : > { %v2208_v32 = vadd.f32 %v2204_v29, %v2189_v30 }
 0x2c7   : > { %v2508_v33 = vpack.c.bf16 %v2208_v32, %v2207_v31 }
 0x2c9   : > { %2509 = vst [vmem:[%s325_s19] sm:$0xff] %v2508_v33  }
 0x2ca   : > { %3198 = shalt.err (!%p3195_p9)
}
 0x2cb   : > { %s3199_s20 = scalar_lea.hbm %s3592_s30, 128  ;;  %s3203_s18 = scalar_lea.hbm %s3648_s7, 256 }
 0x2cc   : > { %p3200_p12 = scmp.ne.s32.totalorder %s3592_s30, %s3199_s20  ;;  %p3204_p5 = scmp.lt.s32.totalorder %s3592_s30, %s3648_s7 }
 0x2cd   : > { %p3205_p3 = scmp.lt.s32.totalorder %s3203_s18, %s3199_s20 }
 0x2ce   : > { %p3201_p1 = pnand %p3200_p12, %p3655_p10 }
 0x2cf   : > { %p3206_p4 = por %p3205_p3, %p3204_p5 }
 0x2d0   : > { %p3202_p2 = pneg %p3201_p1 }
 0x2d2   : > { %p3207_p8 = pnand %p3206_p4, %p3202_p2 }
 0x2d4   : > { %3210 = shalt.err (!%p3207_p8)
}
 0x2d5   : > { %s3278_s23 = smov 64   ;;  %s3279_s10 = smov 4  }
 0x2d6   : > { %2931 = dma.vmem_to_hbm [thread:$0]  (%p3655_p10), %s3594_s21, 128, %s3592_s30, %s3596_s8, %s3278_s23, %s3278_s23, %s3279_s10  }
 0x2d7 PF: > { %p2948_p11 = scmp.ge.s32.totalorder %s3269_s29, 2  ;;  %s2250_s27 = sand.u32 1, %s3249_s24  }
 0x2d8   : > { %p3656_p13 = scmp.ne.s32.totalorder %s3651_s13, 0  ;;  %s2251_s12 = scalar_lea.sflag [#allocation5], %s2250_s27 }
 0x2da   : > { %p2941_p0 = pnand %p2948_p11, %p3656_p13 }
 0x2dc   : > { %p2942_p6 = pneg %p2941_p0 }
 0x2de   : > { %3244 = dma.done.wait (%p2942_p6), %s2251_s12, 128  }
 0x2df   : > { %3246 = vsyncadd (%p2942_p6), %s2251_s12, 4294967168  ;;  %s22_s29 = sadd.s32 1, %s3269_s29   ;;  %s3657_s24 = smov %s3253_s25 }
 0x2e0   : > { %p19_p7 = scmp.ge.s32.totalorder %s22_s29, 4   ;;  %s3658_s25 = smov %s3257_s26 }
 0x2e1   : > { %s3659_s26 = smov %s3373_s14  ;;  %s3660_s27 = smov %s3265_s28 }
 0x2e2   : > { %s3661_s28 = smov %s3663_s9  ;;  %21 = sbr.rel (!%p19_p7) target bundleno = 6 (0x6), region = 104 }
 0x2e7   :  { %2256 = vsyncpa [#allocation4], 1 }
 0x2e8   :  { %2258 = vsyncpa [#allocation4 + $0x1], 1 }
 0x2e9   :  { %2259 = vsyncpa [#allocation7], 1 }
 0x2ea   :  { %2260 = vsyncpa [#allocation5], 1 }
 0x2eb   :  { %2262 = vsyncpa [#allocation5 + $0x1], 1 }

</bundles_post_ra>
